<compile_context>
chip_gen: v7x
topology: tpu7x:2x2x1
jax: 0.10.0
libtpu: 0.0.40
codegen_flags: <defaults>
</compile_context>

<pallas_src>
import functools

import jax
import jax.numpy as jnp
import numpy as np
from jax import lax
from jax.experimental import pallas as pl
from jax.experimental.pallas import tpu as pltpu


def _round_up(x, m):
    return ((x + m - 1) // m) * m


def _sigmoid(x):
    # tanh-form sigmoid: one EUP op, no f32 divide on the VPU.
    return 0.5 * (jnp.tanh(0.5 * x) + 1.0)


def lstm_chunk_kernel(x_ref, wih_ref, whh_ref, h_ref, c_ref, *, hidden, chunk, unroll):
    """One grid step = `chunk` LSTM timesteps for one batch tile.

    x_ref  : (chunk, Bt, Ep) bf16   embedded inputs (+ "ones" bias column)
    wih_ref: (Ep, 4*hidden)  bf16   [W_ih^T ; bias] (gate order i,f,o,g, padded)
    whh_ref: (hidden, 4*hidden) bf16 recurrent weights (same order / padding)
    h_ref  : (Bt, hidden) f32  OUTPUT ref, doubles as the h state (resident
                               across the time-chunk grid axis)
    c_ref  : (Bt, hidden) f32  VMEM scratch cell state
    """
    c_idx = pl.program_id(1)
    H = hidden

    @pl.when(c_idx == 0)
    def _():
        h_ref[...] = jnp.zeros_like(h_ref)
        c_ref[...] = jnp.zeros_like(c_ref)

    def step(t, carry):
        h, c = carry
        # Fused input projection (independent of the carry -> off the serial
        # chain) + recurrent matmul; both bf16 on the MXU, f32 accumulation.
        gates = (
            jnp.dot(x_ref[t], wih_ref[...], preferred_element_type=jnp.float32)
            + jnp.dot(h.astype(jnp.bfloat16), whh_ref[...],
                      preferred_element_type=jnp.float32)
        )
        sig = _sigmoid(gates[:, :3 * H])          # contiguous (Bt, 3H): i|f|o
        i_g = sig[:, 0 * H:1 * H]
        f_g = sig[:, 1 * H:2 * H]
        o_g = sig[:, 2 * H:3 * H]
        g_g = jnp.tanh(gates[:, 3 * H:4 * H])
        c_new = f_g * c + i_g * g_g
        h_new = o_g * jnp.tanh(c_new)
        return h_new, c_new

    h_fin, c_fin = lax.fori_loop(0, chunk, step, (h_ref[...], c_ref[...]),
                                 unroll=unroll)
    h_ref[...] = h_fin
    c_ref[...] = c_fin


def _chip_info():
    """(vmem_capacity_bytes, has_two_tensorcores) with safe fallbacks."""
    vmem_cap = 64 * 1024 * 1024   # conservative default (v7x-like)
    two_tc = False
    try:
        vmem_cap = int(pltpu.get_tpu_info().vmem_capacity_bytes)
    except Exception:
        pass
    try:
        two_tc = "v7" in jax.devices()[0].device_kind.lower()
    except Exception:
        pass
    return vmem_cap, two_tc


def _reorder_gates(m):
    # PyTorch LSTM packs gates as (i, f, g, o) along dim 0; we use (i, f, o, g)
    # so one contiguous sigmoid covers the first 3H columns.
    i, f, g, o = jnp.split(m, 4, axis=0)
    return jnp.concatenate([i, f, o, g], axis=0)


def _pad_gate_cols(m, H, Hp):
    # (rows, 4H) -> (rows, 4Hp): zero-pad each gate block to Hp lanes.
    r = m.shape[0]
    return jnp.pad(m.reshape(r, 4, H),
                   ((0, 0), (0, 0), (0, Hp - H))).reshape(r, 4 * Hp)


def tracegen_forward(inputs, params, *, embed=True, time_chunk=None,
                     batch_tile=None):
    """inputs: (B, T) int32 token ids (embed=True) or (B, T) floats (embed=False)."""
    if embed:
        embeds = params["embedding"][inputs]                      # (B, T, E)
    else:
        embeds = inputs.reshape(inputs.shape[0], inputs.shape[1], 1)
    embeds = embeds.astype(jnp.float32)

    B, T, E = embeds.shape
    H = params["w_hh"].shape[1]

    # ---- alignment / generation-aware tiling --------------------------------
    Hp = _round_up(H, 128)           # lane-aligned hidden
    Ep = _round_up(E + 1, 128)       # +1 feature column carries the bias

    vmem_cap, two_tc = _chip_info()
    if time_chunk is None:
        time_chunk = 64 if vmem_cap >= (100 << 20) else 32   # v5e/v6e vs v7x
    vmem_limit = (64 << 20) if vmem_cap >= (100 << 20) else (48 << 20)

    b16 = _round_up(B, 16)           # 16-row alignment (bf16 sublane packing)
    if batch_tile is not None:
        Bt = _round_up(batch_tile, 16)
    elif two_tc and b16 >= 32:
        Bt = _round_up((B + 1) // 2, 16)   # feed both v7x TensorCores
    else:
        Bt = b16
    Bp = _round_up(b16, Bt)
    num_b = Bp // Bt

    tc = max(1, min(time_chunk, T))
    T_pad = _round_up(T, tc)
    num_c = T_pad // tc
    unroll = True if tc <= 16 else 8

    # ---- host-side weight packing (bf16 MXU operands) -----------------------
    w_ih = _reorder_gates(params["w_ih"].astype(jnp.float32))          # (4H, E)
    w_hh = _reorder_gates(params["w_hh"].astype(jnp.float32))          # (4H, H)
    bias = _reorder_gates(
        (params["b_ih"] + params["b_hh"]).astype(jnp.float32).reshape(4 * H, 1))

    wih_t = _pad_gate_cols(w_ih.T, H, Hp)                              # (E, 4Hp)
    b_row = _pad_gate_cols(bias.T, H, Hp)                              # (1, 4Hp)
    wih_p = jnp.pad(jnp.concatenate([wih_t, b_row], axis=0),
                    ((0, Ep - (E + 1)), (0, 0))).astype(jnp.bfloat16)  # (Ep, 4Hp)

    whh_p = jnp.pad(_pad_gate_cols(w_hh.T, H, Hp),
                    ((0, Hp - H), (0, 0))).astype(jnp.bfloat16)        # (Hp, 4Hp)

    # ---- input packing: time-major, ones column for the bias, front-pad -----
    # Front-padded timesteps have a zero ones-column -> gates == 0 -> h=c=0
    # stays exact; padded hidden / feature lanes are zero weights -> exact.
    x_tbe = jnp.transpose(embeds, (1, 0, 2))                           # (T, B, E)
    ones_col = jnp.ones((T, B, 1), jnp.float32)
    x_aug = jnp.concatenate([x_tbe, ones_col], axis=-1)                # (T, B, E+1)
    x_pad = jnp.pad(
        x_aug, ((T_pad - T, 0), (0, Bp - B), (0, Ep - (E + 1)))
    ).astype(jnp.bfloat16)                                             # (T_pad, Bp, Ep)

    kernel = functools.partial(lstm_chunk_kernel, hidden=Hp, chunk=tc,
                               unroll=unroll)

    def run(single_buffer_weights):
        # Loop-invariant weights: request single-buffering to halve their VMEM.
        w_mode = pl.Buffered(1) if single_buffer_weights else None
        return pl.pallas_call(
            kernel,
            out_shape=jax.ShapeDtypeStruct((Bp, Hp), jnp.float32),
            grid_spec=pltpu.PrefetchScalarGridSpec(
                num_scalar_prefetch=0,
                grid=(num_b, num_c),
                in_specs=[
                    pl.BlockSpec((tc, Bt, Ep), lambda b, c: (c, b, 0)),   # x chunk
                    pl.BlockSpec((Ep, 4 * Hp), lambda b, c: (0, 0),
                                 pipeline_mode=w_mode),                    # [W_ih^T; b]
                    pl.BlockSpec((Hp, 4 * Hp), lambda b, c: (0, 0),
                                 pipeline_mode=w_mode),                    # W_hh^T
                ],
                out_specs=pl.BlockSpec((Bt, Hp), lambda b, c: (b, 0)),     # h_last
                scratch_shapes=[pltpu.VMEM((Bt, Hp), jnp.float32)],        # c state
            ),
            compiler_params=pltpu.CompilerParams(
                dimension_semantics=("parallel", "arbitrary"),  # batch ||, time serial
                vmem_limit_bytes=vmem_limit,
            ),
        )(x_pad, wih_p, whh_p)

    try:
        h_last_p = run(True)
    except Exception:
        # pipeline_mode=pl.Buffered(1) not supported on this jax version:
        # fall back to default (double-buffered) invariant weights.
        h_last_p = run(False)

    # Final dense kept outside the kernel (frees W_out from VMEM residency;
    # XLA tiles it fine at any vocab size) and computed in f32.
    h_last = h_last_p[:B, :H]                                          # (B, H)
    return (h_last @ params["w_out"].astype(jnp.float32).T
            + params["b_out"].astype(jnp.float32))


def tracegen_reference(inputs, params):
    """Pure-JAX f32 reference of the PyTorch forward (embed=True path)."""
    emb = params["embedding"][inputs].astype(jnp.float32)              # (B, T, E)
    H = params["w_hh"].shape[1]
    w_ih_t = params["w_ih"].astype(jnp.float32).T
    w_hh_t = params["w_hh"].astype(jnp.float32).T
    b = (params["b_ih"] + params["b_hh"]).astype(jnp.float32)

    def step(carry, x_t):
        h, c = carry
        gates = x_t @ w_ih_t + h @ w_hh_t + b
        i = jax.nn.sigmoid(gates[:, 0 * H:1 * H])
        f = jax.nn.sigmoid(gates[:, 1 * H:2 * H])
        g = jnp.tanh(gates[:, 2 * H:3 * H])
        o = jax.nn.sigmoid(gates[:, 3 * H:4 * H])
        c_new = f * c + i * g
        h_new = o * jnp.tanh(c_new)
        return (h_new, c_new), h_new

    B = emb.shape[0]
    h0 = jnp.zeros((B, H), jnp.float32)
    c0 = jnp.zeros((B, H), jnp.float32)
    (h_last, _), _ = lax.scan(step, (h0, c0), jnp.transpose(emb, (1, 0, 2)))
    return (h_last @ params["w_out"].astype(jnp.float32).T
            + params["b_out"].astype(jnp.float32))


def init_params(key, vocab_size, embedding_dim, hidden_dim):
    ks = jax.random.split(key, 7)
    s = 1.0 / np.sqrt(hidden_dim)
    return {
        "embedding": jax.random.normal(ks[0], (vocab_size, embedding_dim), jnp.float32),
        "w_ih": jax.random.uniform(ks[1], (4 * hidden_dim, embedding_dim), jnp.float32, -s, s),
        "w_hh": jax.random.uniform(ks[2], (4 * hidden_dim, hidden_dim), jnp.float32, -s, s),
        "b_ih": jax.random.uniform(ks[3], (4 * hidden_dim,), jnp.float32, -s, s),
        "b_hh": jax.random.uniform(ks[4], (4 * hidden_dim,), jnp.float32, -s, s),
        "w_out": jax.random.uniform(ks[5], (vocab_size, hidden_dim), jnp.float32, -s, s),
        "b_out": jax.random.uniform(ks[6], (vocab_size,), jnp.float32, -s, s),
    }


if __name__ == "__main__":
    # bf16 MXU operands -> loosened tolerance vs. the f32 reference.
    ATOL = RTOL = 2e-2

    # Config 1: small canonical test (B=2, T=8, E=H=V=32).
    vocab_size, embedding_dim, hidden_dim = 32, 32, 32
    batch, seq = 2, 8

    key = jax.random.PRNGKey(0)
    k_param, k_ids = jax.random.split(key)
    params = init_params(k_param, vocab_size, embedding_dim, hidden_dim)
    token_ids = jax.random.randint(k_ids, (batch, seq), 0, vocab_size, dtype=jnp.int32)

    out = jax.block_until_ready(tracegen_forward(token_ids, params, embed=True))
    ref = jax.block_until_ready(tracegen_reference(token_ids, params))
    assert out.shape == (batch, vocab_size)
    assert np.allclose(np.asarray(out), np.asarray(ref), atol=ATOL, rtol=RTOL)

    # Config 2: non-aligned H/V/B and a multi-chunk time axis (exercises
    # front-padding, chunked recurrence, and zero-padding of gates/hidden).
    vs2, ed2, hd2 = 50, 24, 40
    b2, t2 = 3, 20
    k2p, k2i = jax.random.split(jax.random.PRNGKey(1))
    params2 = init_params(k2p, vs2, ed2, hd2)
    ids2 = jax.random.randint(k2i, (b2, t2), 0, vs2, dtype=jnp.int32)
    out2 = jax.block_until_ready(
        tracegen_forward(ids2, params2, embed=True, time_chunk=8))
    ref2 = jax.block_until_ready(tracegen_reference(ids2, params2))
    assert out2.shape == (b2, vs2)
    assert np.allclose(np.asarray(out2), np.asarray(ref2), atol=ATOL, rtol=RTOL)

    print("KERNEL_OK")
</pallas_src>

<mosaic_0001>
module attributes {stable_mosaic.version = 11 : i64} {
  func.func @lstm_chunk_kernel(%arg0: i32, %arg1: i32, %arg2: memref<8x16x128xbf16, #tpu.memory_space<vmem>>, %arg3: memref<128x512xbf16, #tpu.memory_space<vmem>>, %arg4: memref<128x512xbf16, #tpu.memory_space<vmem>>, %arg5: memref<16x128xf32, #tpu.memory_space<vmem>>, %arg6: memref<16x128xf32, #tpu.memory_space<vmem>>) attributes {dimension_semantics = [#tpu.dimension_semantics<parallel>, #tpu.dimension_semantics<arbitrary>], iteration_bounds = array<i64: 1, 1>, scalar_prefetch = 0 : i64, scratch_operands = 1 : i64, tpu.core_type = #tpu.core_type<tc>, window_params = [{transform_indices = @transform_0, window_bounds = array<i64: 8, 16, 128>}, {pipeline_mode = #tpu.pipeline_mode<synchronous>, transform_indices = @transform_1, window_bounds = array<i64: 128, 512>}, {pipeline_mode = #tpu.pipeline_mode<synchronous>, transform_indices = @transform_2, window_bounds = array<i64: 128, 512>}, {transform_indices = @transform_3, window_bounds = array<i64: 16, 128>}]} {
    %c0_i32 = arith.constant 0 : i32
    %0 = arith.cmpi eq, %arg1, %c0_i32 : i32
    %1 = arith.extui %0 : i1 to i32
    %c0_i32_0 = arith.constant 0 : i32
    %2 = arith.cmpi ne, %1, %c0_i32_0 : i32
    scf.if %2 {
      %cst_96 = arith.constant 0.000000e+00 : f32
      %223 = vector.broadcast %cst_96 : f32 to vector<16x128xf32>
      %c0_97 = arith.constant 0 : index
      %c0_98 = arith.constant 0 : index
      %224 = vector.load %arg5[%c0_97, %c0_98] : memref<16x128xf32, #tpu.memory_space<vmem>>, vector<16x128xf32>
      tpu.vector_store %arg5[%c0_97, %c0_98], %223 {strides = array<i32>} : memref<16x128xf32, #tpu.memory_space<vmem>>, vector<16x128xf32>,
      %cst_99 = arith.constant 0.000000e+00 : f32
      %225 = vector.broadcast %cst_99 : f32 to vector<16x128xf32>
      %c0_100 = arith.constant 0 : index
      %c0_101 = arith.constant 0 : index
      %226 = vector.load %arg6[%c0_100, %c0_101] : memref<16x128xf32, #tpu.memory_space<vmem>>, vector<16x128xf32>
      tpu.vector_store %arg6[%c0_100, %c0_101], %225 {strides = array<i32>} : memref<16x128xf32, #tpu.memory_space<vmem>>, vector<16x128xf32>,
    } else {
    }
    %c0 = arith.constant 0 : index
    %c0_1 = arith.constant 0 : index
    %3 = vector.load %arg5[%c0, %c0_1] : memref<16x128xf32, #tpu.memory_space<vmem>>, vector<16x128xf32>
    %c0_2 = arith.constant 0 : index
    %c0_3 = arith.constant 0 : index
    %4 = vector.load %arg6[%c0_2, %c0_3] : memref<16x128xf32, #tpu.memory_space<vmem>>, vector<16x128xf32>
    %c0_i32_4 = arith.constant 0 : i32
    %5 = arith.index_cast %c0_i32_4 : i32 to index
    %c0_5 = arith.constant 0 : index
    %c0_6 = arith.constant 0 : index
    %6 = vector.load %arg2[%5, %c0_5, %c0_6] : memref<8x16x128xbf16, #tpu.memory_space<vmem>>, vector<1x16x128xbf16>
    %7 = vector.shape_cast %6 : vector<1x16x128xbf16> to vector<16x128xbf16>
    %c0_7 = arith.constant 0 : index
    %c0_8 = arith.constant 0 : index
    %8 = vector.load %arg3[%c0_7, %c0_8] : memref<128x512xbf16, #tpu.memory_space<vmem>>, vector<128x512xbf16>
    %cst = arith.constant dense<0.000000e+00> : vector<16x512xf32>
    %9 = tpu.matmul %7, %8, %cst {dimension_numbers = #tpu.dot_dimension_numbers<[1], [0], [0], [1], [0, 0, 1, 1], [], []>} : vector<16x128xbf16>, vector<128x512xbf16>, vector<16x512xf32> -> vector<16x512xf32>
    %10 = arith.truncf %3 : vector<16x128xf32> to vector<16x128xbf16>
    %c0_9 = arith.constant 0 : index
    %c0_10 = arith.constant 0 : index
    %11 = vector.load %arg4[%c0_9, %c0_10] : memref<128x512xbf16, #tpu.memory_space<vmem>>, vector<128x512xbf16>
    %cst_11 = arith.constant dense<0.000000e+00> : vector<16x512xf32>
    %12 = tpu.matmul %10, %11, %cst_11 {dimension_numbers = #tpu.dot_dimension_numbers<[1], [0], [0], [1], [0, 0, 1, 1], [], []>} : vector<16x128xbf16>, vector<128x512xbf16>, vector<16x512xf32> -> vector<16x512xf32>
    %13 = arith.addf %9, %12 : vector<16x512xf32>
    %14 = vector.extract_strided_slice %13 {offsets = [0, 0], sizes = [16, 384], strides = [1, 1]} : vector<16x512xf32> to vector<16x384xf32>
    %cst_12 = arith.constant 5.000000e-01 : f32
    %15 = vector.broadcast %cst_12 : f32 to vector<16x384xf32>
    %16 = arith.mulf %15, %14 : vector<16x384xf32>
    %17 = math.tanh %16 : vector<16x384xf32>
    %cst_13 = arith.constant 1.000000e+00 : f32
    %18 = vector.broadcast %cst_13 : f32 to vector<16x384xf32>
    %19 = arith.addf %17, %18 : vector<16x384xf32>
    %cst_14 = arith.constant 5.000000e-01 : f32
    %20 = vector.broadcast %cst_14 : f32 to vector<16x384xf32>
    %21 = arith.mulf %20, %19 : vector<16x384xf32>
    %22 = vector.extract_strided_slice %21 {offsets = [0, 0], sizes = [16, 128], strides = [1, 1]} : vector<16x384xf32> to vector<16x128xf32>
    %23 = vector.extract_strided_slice %21 {offsets = [0, 128], sizes = [16, 128], strides = [1, 1]} : vector<16x384xf32> to vector<16x128xf32>
    %24 = vector.extract_strided_slice %21 {offsets = [0, 256], sizes = [16, 128], strides = [1, 1]} : vector<16x384xf32> to vector<16x128xf32>
    %25 = vector.extract_strided_slice %13 {offsets = [0, 384], sizes = [16, 128], strides = [1, 1]} : vector<16x512xf32> to vector<16x128xf32>
    %26 = math.tanh %25 : vector<16x128xf32>
    %27 = arith.mulf %23, %4 : vector<16x128xf32>
    %28 = arith.mulf %22, %26 : vector<16x128xf32>
    %29 = arith.addf %27, %28 : vector<16x128xf32>
    %30 = math.tanh %29 : vector<16x128xf32>
    %31 = arith.mulf %24, %30 : vector<16x128xf32>
    %c1_i32 = arith.constant 1 : i32
    %32 = arith.index_cast %c1_i32 : i32 to index
    %c0_15 = arith.constant 0 : index
    %c0_16 = arith.constant 0 : index
    %33 = vector.load %arg2[%32, %c0_15, %c0_16] : memref<8x16x128xbf16, #tpu.memory_space<vmem>>, vector<1x16x128xbf16>
    %34 = vector.shape_cast %33 : vector<1x16x128xbf16> to vector<16x128xbf16>
    %c0_17 = arith.constant 0 : index
    %c0_18 = arith.constant 0 : index
    %35 = vector.load %arg3[%c0_17, %c0_18] : memref<128x512xbf16, #tpu.memory_space<vmem>>, vector<128x512xbf16>
    %cst_19 = arith.constant dense<0.000000e+00> : vector<16x512xf32>
    %36 = tpu.matmul %34, %35, %cst_19 {dimension_numbers = #tpu.dot_dimension_numbers<[1], [0], [0], [1], [0, 0, 1, 1], [], []>} : vector<16x128xbf16>, vector<128x512xbf16>, vector<16x512xf32> -> vector<16x512xf32>
    %37 = arith.truncf %31 : vector<16x128xf32> to vector<16x128xbf16>
    %c0_20 = arith.constant 0 : index
    %c0_21 = arith.constant 0 : index
    %38 = vector.load %arg4[%c0_20, %c0_21] : memref<128x512xbf16, #tpu.memory_space<vmem>>, vector<128x512xbf16>
    %cst_22 = arith.constant dense<0.000000e+00> : vector<16x512xf32>
    %39 = tpu.matmul %37, %38, %cst_22 {dimension_numbers = #tpu.dot_dimension_numbers<[1], [0], [0], [1], [0, 0, 1, 1], [], []>} : vector<16x128xbf16>, vector<128x512xbf16>, vector<16x512xf32> -> vector<16x512xf32>
    %40 = arith.addf %36, %39 : vector<16x512xf32>
    %41 = vector.extract_strided_slice %40 {offsets = [0, 0], sizes = [16, 384], strides = [1, 1]} : vector<16x512xf32> to vector<16x384xf32>
    %cst_23 = arith.constant 5.000000e-01 : f32
    %42 = vector.broadcast %cst_23 : f32 to vector<16x384xf32>
    %43 = arith.mulf %42, %41 : vector<16x384xf32>
    %44 = math.tanh %43 : vector<16x384xf32>
    %cst_24 = arith.constant 1.000000e+00 : f32
    %45 = vector.broadcast %cst_24 : f32 to vector<16x384xf32>
    %46 = arith.addf %44, %45 : vector<16x384xf32>
    %cst_25 = arith.constant 5.000000e-01 : f32
    %47 = vector.broadcast %cst_25 : f32 to vector<16x384xf32>
    %48 = arith.mulf %47, %46 : vector<16x384xf32>
    %49 = vector.extract_strided_slice %48 {offsets = [0, 0], sizes = [16, 128], strides = [1, 1]} : vector<16x384xf32> to vector<16x128xf32>
    %50 = vector.extract_strided_slice %48 {offsets = [0, 128], sizes = [16, 128], strides = [1, 1]} : vector<16x384xf32> to vector<16x128xf32>
    %51 = vector.extract_strided_slice %48 {offsets = [0, 256], sizes = [16, 128], strides = [1, 1]} : vector<16x384xf32> to vector<16x128xf32>
    %52 = vector.extract_strided_slice %40 {offsets = [0, 384], sizes = [16, 128], strides = [1, 1]} : vector<16x512xf32> to vector<16x128xf32>
    %53 = math.tanh %52 : vector<16x128xf32>
    %54 = arith.mulf %50, %29 : vector<16x128xf32>
    %55 = arith.mulf %49, %53 : vector<16x128xf32>
    %56 = arith.addf %54, %55 : vector<16x128xf32>
    %57 = math.tanh %56 : vector<16x128xf32>
    %58 = arith.mulf %51, %57 : vector<16x128xf32>
    %c2_i32 = arith.constant 2 : i32
    %59 = arith.index_cast %c2_i32 : i32 to index
    %c0_26 = arith.constant 0 : index
    %c0_27 = arith.constant 0 : index
    %60 = vector.load %arg2[%59, %c0_26, %c0_27] : memref<8x16x128xbf16, #tpu.memory_space<vmem>>, vector<1x16x128xbf16>
    %61 = vector.shape_cast %60 : vector<1x16x128xbf16> to vector<16x128xbf16>
    %c0_28 = arith.constant 0 : index
    %c0_29 = arith.constant 0 : index
    %62 = vector.load %arg3[%c0_28, %c0_29] : memref<128x512xbf16, #tpu.memory_space<vmem>>, vector<128x512xbf16>
    %cst_30 = arith.constant dense<0.000000e+00> : vector<16x512xf32>
    %63 = tpu.matmul %61, %62, %cst_30 {dimension_numbers = #tpu.dot_dimension_numbers<[1], [0], [0], [1], [0, 0, 1, 1], [], []>} : vector<16x128xbf16>, vector<128x512xbf16>, vector<16x512xf32> -> vector<16x512xf32>
    %64 = arith.truncf %58 : vector<16x128xf32> to vector<16x128xbf16>
    %c0_31 = arith.constant 0 : index
    %c0_32 = arith.constant 0 : index
    %65 = vector.load %arg4[%c0_31, %c0_32] : memref<128x512xbf16, #tpu.memory_space<vmem>>, vector<128x512xbf16>
    %cst_33 = arith.constant dense<0.000000e+00> : vector<16x512xf32>
    %66 = tpu.matmul %64, %65, %cst_33 {dimension_numbers = #tpu.dot_dimension_numbers<[1], [0], [0], [1], [0, 0, 1, 1], [], []>} : vector<16x128xbf16>, vector<128x512xbf16>, vector<16x512xf32> -> vector<16x512xf32>
    %67 = arith.addf %63, %66 : vector<16x512xf32>
    %68 = vector.extract_strided_slice %67 {offsets = [0, 0], sizes = [16, 384], strides = [1, 1]} : vector<16x512xf32> to vector<16x384xf32>
    %cst_34 = arith.constant 5.000000e-01 : f32
    %69 = vector.broadcast %cst_34 : f32 to vector<16x384xf32>
    %70 = arith.mulf %69, %68 : vector<16x384xf32>
    %71 = math.tanh %70 : vector<16x384xf32>
    %cst_35 = arith.constant 1.000000e+00 : f32
    %72 = vector.broadcast %cst_35 : f32 to vector<16x384xf32>
    %73 = arith.addf %71, %72 : vector<16x384xf32>
    %cst_36 = arith.constant 5.000000e-01 : f32
    %74 = vector.broadcast %cst_36 : f32 to vector<16x384xf32>
    %75 = arith.mulf %74, %73 : vector<16x384xf32>
    %76 = vector.extract_strided_slice %75 {offsets = [0, 0], sizes = [16, 128], strides = [1, 1]} : vector<16x384xf32> to vector<16x128xf32>
    %77 = vector.extract_strided_slice %75 {offsets = [0, 128], sizes = [16, 128], strides = [1, 1]} : vector<16x384xf32> to vector<16x128xf32>
    %78 = vector.extract_strided_slice %75 {offsets = [0, 256], sizes = [16, 128], strides = [1, 1]} : vector<16x384xf32> to vector<16x128xf32>
    %79 = vector.extract_strided_slice %67 {offsets = [0, 384], sizes = [16, 128], strides = [1, 1]} : vector<16x512xf32> to vector<16x128xf32>
    %80 = math.tanh %79 : vector<16x128xf32>
    %81 = arith.mulf %77, %56 : vector<16x128xf32>
    %82 = arith.mulf %76, %80 : vector<16x128xf32>
    %83 = arith.addf %81, %82 : vector<16x128xf32>
    %84 = math.tanh %83 : vector<16x128xf32>
    %85 = arith.mulf %78, %84 : vector<16x128xf32>
    %c3_i32 = arith.constant 3 : i32
    %86 = arith.index_cast %c3_i32 : i32 to index
    %c0_37 = arith.constant 0 : index
    %c0_38 = arith.constant 0 : index
    %87 = vector.load %arg2[%86, %c0_37, %c0_38] : memref<8x16x128xbf16, #tpu.memory_space<vmem>>, vector<1x16x128xbf16>
    %88 = vector.shape_cast %87 : vector<1x16x128xbf16> to vector<16x128xbf16>
    %c0_39 = arith.constant 0 : index
    %c0_40 = arith.constant 0 : index
    %89 = vector.load %arg3[%c0_39, %c0_40] : memref<128x512xbf16, #tpu.memory_space<vmem>>, vector<128x512xbf16>
    %cst_41 = arith.constant dense<0.000000e+00> : vector<16x512xf32>
    %90 = tpu.matmul %88, %89, %cst_41 {dimension_numbers = #tpu.dot_dimension_numbers<[1], [0], [0], [1], [0, 0, 1, 1], [], []>} : vector<16x128xbf16>, vector<128x512xbf16>, vector<16x512xf32> -> vector<16x512xf32>
    %91 = arith.truncf %85 : vector<16x128xf32> to vector<16x128xbf16>
    %c0_42 = arith.constant 0 : index
    %c0_43 = arith.constant 0 : index
    %92 = vector.load %arg4[%c0_42, %c0_43] : memref<128x512xbf16, #tpu.memory_space<vmem>>, vector<128x512xbf16>
    %cst_44 = arith.constant dense<0.000000e+00> : vector<16x512xf32>
    %93 = tpu.matmul %91, %92, %cst_44 {dimension_numbers = #tpu.dot_dimension_numbers<[1], [0], [0], [1], [0, 0, 1, 1], [], []>} : vector<16x128xbf16>, vector<128x512xbf16>, vector<16x512xf32> -> vector<16x512xf32>
    %94 = arith.addf %90, %93 : vector<16x512xf32>
    %95 = vector.extract_strided_slice %94 {offsets = [0, 0], sizes = [16, 384], strides = [1, 1]} : vector<16x512xf32> to vector<16x384xf32>
    %cst_45 = arith.constant 5.000000e-01 : f32
    %96 = vector.broadcast %cst_45 : f32 to vector<16x384xf32>
    %97 = arith.mulf %96, %95 : vector<16x384xf32>
    %98 = math.tanh %97 : vector<16x384xf32>
    %cst_46 = arith.constant 1.000000e+00 : f32
    %99 = vector.broadcast %cst_46 : f32 to vector<16x384xf32>
    %100 = arith.addf %98, %99 : vector<16x384xf32>
    %cst_47 = arith.constant 5.000000e-01 : f32
    %101 = vector.broadcast %cst_47 : f32 to vector<16x384xf32>
    %102 = arith.mulf %101, %100 : vector<16x384xf32>
    %103 = vector.extract_strided_slice %102 {offsets = [0, 0], sizes = [16, 128], strides = [1, 1]} : vector<16x384xf32> to vector<16x128xf32>
    %104 = vector.extract_strided_slice %102 {offsets = [0, 128], sizes = [16, 128], strides = [1, 1]} : vector<16x384xf32> to vector<16x128xf32>
    %105 = vector.extract_strided_slice %102 {offsets = [0, 256], sizes = [16, 128], strides = [1, 1]} : vector<16x384xf32> to vector<16x128xf32>
    %106 = vector.extract_strided_slice %94 {offsets = [0, 384], sizes = [16, 128], strides = [1, 1]} : vector<16x512xf32> to vector<16x128xf32>
    %107 = math.tanh %106 : vector<16x128xf32>
    %108 = arith.mulf %104, %83 : vector<16x128xf32>
    %109 = arith.mulf %103, %107 : vector<16x128xf32>
    %110 = arith.addf %108, %109 : vector<16x128xf32>
    %111 = math.tanh %110 : vector<16x128xf32>
    %112 = arith.mulf %105, %111 : vector<16x128xf32>
    %c4_i32 = arith.constant 4 : i32
    %113 = arith.index_cast %c4_i32 : i32 to index
    %c0_48 = arith.constant 0 : index
    %c0_49 = arith.constant 0 : index
    %114 = vector.load %arg2[%113, %c0_48, %c0_49] : memref<8x16x128xbf16, #tpu.memory_space<vmem>>, vector<1x16x128xbf16>
    %115 = vector.shape_cast %114 : vector<1x16x128xbf16> to vector<16x128xbf16>
    %c0_50 = arith.constant 0 : index
    %c0_51 = arith.constant 0 : index
    %116 = vector.load %arg3[%c0_50, %c0_51] : memref<128x512xbf16, #tpu.memory_space<vmem>>, vector<128x512xbf16>
    %cst_52 = arith.constant dense<0.000000e+00> : vector<16x512xf32>
    %117 = tpu.matmul %115, %116, %cst_52 {dimension_numbers = #tpu.dot_dimension_numbers<[1], [0], [0], [1], [0, 0, 1, 1], [], []>} : vector<16x128xbf16>, vector<128x512xbf16>, vector<16x512xf32> -> vector<16x512xf32>
    %118 = arith.truncf %112 : vector<16x128xf32> to vector<16x128xbf16>
    %c0_53 = arith.constant 0 : index
    %c0_54 = arith.constant 0 : index
    %119 = vector.load %arg4[%c0_53, %c0_54] : memref<128x512xbf16, #tpu.memory_space<vmem>>, vector<128x512xbf16>
    %cst_55 = arith.constant dense<0.000000e+00> : vector<16x512xf32>
    %120 = tpu.matmul %118, %119, %cst_55 {dimension_numbers = #tpu.dot_dimension_numbers<[1], [0], [0], [1], [0, 0, 1, 1], [], []>} : vector<16x128xbf16>, vector<128x512xbf16>, vector<16x512xf32> -> vector<16x512xf32>
    %121 = arith.addf %117, %120 : vector<16x512xf32>
    %122 = vector.extract_strided_slice %121 {offsets = [0, 0], sizes = [16, 384], strides = [1, 1]} : vector<16x512xf32> to vector<16x384xf32>
    %cst_56 = arith.constant 5.000000e-01 : f32
    %123 = vector.broadcast %cst_56 : f32 to vector<16x384xf32>
    %124 = arith.mulf %123, %122 : vector<16x384xf32>
    %125 = math.tanh %124 : vector<16x384xf32>
    %cst_57 = arith.constant 1.000000e+00 : f32
    %126 = vector.broadcast %cst_57 : f32 to vector<16x384xf32>
    %127 = arith.addf %125, %126 : vector<16x384xf32>
    %cst_58 = arith.constant 5.000000e-01 : f32
    %128 = vector.broadcast %cst_58 : f32 to vector<16x384xf32>
    %129 = arith.mulf %128, %127 : vector<16x384xf32>
    %130 = vector.extract_strided_slice %129 {offsets = [0, 0], sizes = [16, 128], strides = [1, 1]} : vector<16x384xf32> to vector<16x128xf32>
    %131 = vector.extract_strided_slice %129 {offsets = [0, 128], sizes = [16, 128], strides = [1, 1]} : vector<16x384xf32> to vector<16x128xf32>
    %132 = vector.extract_strided_slice %129 {offsets = [0, 256], sizes = [16, 128], strides = [1, 1]} : vector<16x384xf32> to vector<16x128xf32>
    %133 = vector.extract_strided_slice %121 {offsets = [0, 384], sizes = [16, 128], strides = [1, 1]} : vector<16x512xf32> to vector<16x128xf32>
    %134 = math.tanh %133 : vector<16x128xf32>
    %135 = arith.mulf %131, %110 : vector<16x128xf32>
    %136 = arith.mulf %130, %134 : vector<16x128xf32>
    %137 = arith.addf %135, %136 : vector<16x128xf32>
    %138 = math.tanh %137 : vector<16x128xf32>
    %139 = arith.mulf %132, %138 : vector<16x128xf32>
    %c5_i32 = arith.constant 5 : i32
    %140 = arith.index_cast %c5_i32 : i32 to index
    %c0_59 = arith.constant 0 : index
    %c0_60 = arith.constant 0 : index
    %141 = vector.load %arg2[%140, %c0_59, %c0_60] : memref<8x16x128xbf16, #tpu.memory_space<vmem>>, vector<1x16x128xbf16>
    %142 = vector.shape_cast %141 : vector<1x16x128xbf16> to vector<16x128xbf16>
    %c0_61 = arith.constant 0 : index
    %c0_62 = arith.constant 0 : index
    %143 = vector.load %arg3[%c0_61, %c0_62] : memref<128x512xbf16, #tpu.memory_space<vmem>>, vector<128x512xbf16>
    %cst_63 = arith.constant dense<0.000000e+00> : vector<16x512xf32>
    %144 = tpu.matmul %142, %143, %cst_63 {dimension_numbers = #tpu.dot_dimension_numbers<[1], [0], [0], [1], [0, 0, 1, 1], [], []>} : vector<16x128xbf16>, vector<128x512xbf16>, vector<16x512xf32> -> vector<16x512xf32>
    %145 = arith.truncf %139 : vector<16x128xf32> to vector<16x128xbf16>
    %c0_64 = arith.constant 0 : index
    %c0_65 = arith.constant 0 : index
    %146 = vector.load %arg4[%c0_64, %c0_65] : memref<128x512xbf16, #tpu.memory_space<vmem>>, vector<128x512xbf16>
    %cst_66 = arith.constant dense<0.000000e+00> : vector<16x512xf32>
    %147 = tpu.matmul %145, %146, %cst_66 {dimension_numbers = #tpu.dot_dimension_numbers<[1], [0], [0], [1], [0, 0, 1, 1], [], []>} : vector<16x128xbf16>, vector<128x512xbf16>, vector<16x512xf32> -> vector<16x512xf32>
    %148 = arith.addf %144, %147 : vector<16x512xf32>
    %149 = vector.extract_strided_slice %148 {offsets = [0, 0], sizes = [16, 384], strides = [1, 1]} : vector<16x512xf32> to vector<16x384xf32>
    %cst_67 = arith.constant 5.000000e-01 : f32
    %150 = vector.broadcast %cst_67 : f32 to vector<16x384xf32>
    %151 = arith.mulf %150, %149 : vector<16x384xf32>
    %152 = math.tanh %151 : vector<16x384xf32>
    %cst_68 = arith.constant 1.000000e+00 : f32
    %153 = vector.broadcast %cst_68 : f32 to vector<16x384xf32>
    %154 = arith.addf %152, %153 : vector<16x384xf32>
    %cst_69 = arith.constant 5.000000e-01 : f32
    %155 = vector.broadcast %cst_69 : f32 to vector<16x384xf32>
    %156 = arith.mulf %155, %154 : vector<16x384xf32>
    %157 = vector.extract_strided_slice %156 {offsets = [0, 0], sizes = [16, 128], strides = [1, 1]} : vector<16x384xf32> to vector<16x128xf32>
    %158 = vector.extract_strided_slice %156 {offsets = [0, 128], sizes = [16, 128], strides = [1, 1]} : vector<16x384xf32> to vector<16x128xf32>
    %159 = vector.extract_strided_slice %156 {offsets = [0, 256], sizes = [16, 128], strides = [1, 1]} : vector<16x384xf32> to vector<16x128xf32>
    %160 = vector.extract_strided_slice %148 {offsets = [0, 384], sizes = [16, 128], strides = [1, 1]} : vector<16x512xf32> to vector<16x128xf32>
    %161 = math.tanh %160 : vector<16x128xf32>
    %162 = arith.mulf %158, %137 : vector<16x128xf32>
    %163 = arith.mulf %157, %161 : vector<16x128xf32>
    %164 = arith.addf %162, %163 : vector<16x128xf32>
    %165 = math.tanh %164 : vector<16x128xf32>
    %166 = arith.mulf %159, %165 : vector<16x128xf32>
    %c6_i32 = arith.constant 6 : i32
    %167 = arith.index_cast %c6_i32 : i32 to index
    %c0_70 = arith.constant 0 : index
    %c0_71 = arith.constant 0 : index
    %168 = vector.load %arg2[%167, %c0_70, %c0_71] : memref<8x16x128xbf16, #tpu.memory_space<vmem>>, vector<1x16x128xbf16>
    %169 = vector.shape_cast %168 : vector<1x16x128xbf16> to vector<16x128xbf16>
    %c0_72 = arith.constant 0 : index
    %c0_73 = arith.constant 0 : index
    %170 = vector.load %arg3[%c0_72, %c0_73] : memref<128x512xbf16, #tpu.memory_space<vmem>>, vector<128x512xbf16>
    %cst_74 = arith.constant dense<0.000000e+00> : vector<16x512xf32>
    %171 = tpu.matmul %169, %170, %cst_74 {dimension_numbers = #tpu.dot_dimension_numbers<[1], [0], [0], [1], [0, 0, 1, 1], [], []>} : vector<16x128xbf16>, vector<128x512xbf16>, vector<16x512xf32> -> vector<16x512xf32>
    %172 = arith.truncf %166 : vector<16x128xf32> to vector<16x128xbf16>
    %c0_75 = arith.constant 0 : index
    %c0_76 = arith.constant 0 : index
    %173 = vector.load %arg4[%c0_75, %c0_76] : memref<128x512xbf16, #tpu.memory_space<vmem>>, vector<128x512xbf16>
    %cst_77 = arith.constant dense<0.000000e+00> : vector<16x512xf32>
    %174 = tpu.matmul %172, %173, %cst_77 {dimension_numbers = #tpu.dot_dimension_numbers<[1], [0], [0], [1], [0, 0, 1, 1], [], []>} : vector<16x128xbf16>, vector<128x512xbf16>, vector<16x512xf32> -> vector<16x512xf32>
    %175 = arith.addf %171, %174 : vector<16x512xf32>
    %176 = vector.extract_strided_slice %175 {offsets = [0, 0], sizes = [16, 384], strides = [1, 1]} : vector<16x512xf32> to vector<16x384xf32>
    %cst_78 = arith.constant 5.000000e-01 : f32
    %177 = vector.broadcast %cst_78 : f32 to vector<16x384xf32>
    %178 = arith.mulf %177, %176 : vector<16x384xf32>
    %179 = math.tanh %178 : vector<16x384xf32>
    %cst_79 = arith.constant 1.000000e+00 : f32
    %180 = vector.broadcast %cst_79 : f32 to vector<16x384xf32>
    %181 = arith.addf %179, %180 : vector<16x384xf32>
    %cst_80 = arith.constant 5.000000e-01 : f32
    %182 = vector.broadcast %cst_80 : f32 to vector<16x384xf32>
    %183 = arith.mulf %182, %181 : vector<16x384xf32>
    %184 = vector.extract_strided_slice %183 {offsets = [0, 0], sizes = [16, 128], strides = [1, 1]} : vector<16x384xf32> to vector<16x128xf32>
    %185 = vector.extract_strided_slice %183 {offsets = [0, 128], sizes = [16, 128], strides = [1, 1]} : vector<16x384xf32> to vector<16x128xf32>
    %186 = vector.extract_strided_slice %183 {offsets = [0, 256], sizes = [16, 128], strides = [1, 1]} : vector<16x384xf32> to vector<16x128xf32>
    %187 = vector.extract_strided_slice %175 {offsets = [0, 384], sizes = [16, 128], strides = [1, 1]} : vector<16x512xf32> to vector<16x128xf32>
    %188 = math.tanh %187 : vector<16x128xf32>
    %189 = arith.mulf %185, %164 : vector<16x128xf32>
    %190 = arith.mulf %184, %188 : vector<16x128xf32>
    %191 = arith.addf %189, %190 : vector<16x128xf32>
    %192 = math.tanh %191 : vector<16x128xf32>
    %193 = arith.mulf %186, %192 : vector<16x128xf32>
    %c7_i32 = arith.constant 7 : i32
    %194 = arith.index_cast %c7_i32 : i32 to index
    %c0_81 = arith.constant 0 : index
    %c0_82 = arith.constant 0 : index
    %195 = vector.load %arg2[%194, %c0_81, %c0_82] : memref<8x16x128xbf16, #tpu.memory_space<vmem>>, vector<1x16x128xbf16>
    %196 = vector.shape_cast %195 : vector<1x16x128xbf16> to vector<16x128xbf16>
    %c0_83 = arith.constant 0 : index
    %c0_84 = arith.constant 0 : index
    %197 = vector.load %arg3[%c0_83, %c0_84] : memref<128x512xbf16, #tpu.memory_space<vmem>>, vector<128x512xbf16>
    %cst_85 = arith.constant dense<0.000000e+00> : vector<16x512xf32>
    %198 = tpu.matmul %196, %197, %cst_85 {dimension_numbers = #tpu.dot_dimension_numbers<[1], [0], [0], [1], [0, 0, 1, 1], [], []>} : vector<16x128xbf16>, vector<128x512xbf16>, vector<16x512xf32> -> vector<16x512xf32>
    %199 = arith.truncf %193 : vector<16x128xf32> to vector<16x128xbf16>
    %c0_86 = arith.constant 0 : index
    %c0_87 = arith.constant 0 : index
    %200 = vector.load %arg4[%c0_86, %c0_87] : memref<128x512xbf16, #tpu.memory_space<vmem>>, vector<128x512xbf16>
    %cst_88 = arith.constant dense<0.000000e+00> : vector<16x512xf32>
    %201 = tpu.matmul %199, %200, %cst_88 {dimension_numbers = #tpu.dot_dimension_numbers<[1], [0], [0], [1], [0, 0, 1, 1], [], []>} : vector<16x128xbf16>, vector<128x512xbf16>, vector<16x512xf32> -> vector<16x512xf32>
    %202 = arith.addf %198, %201 : vector<16x512xf32>
    %203 = vector.extract_strided_slice %202 {offsets = [0, 0], sizes = [16, 384], strides = [1, 1]} : vector<16x512xf32> to vector<16x384xf32>
    %cst_89 = arith.constant 5.000000e-01 : f32
    %204 = vector.broadcast %cst_89 : f32 to vector<16x384xf32>
    %205 = arith.mulf %204, %203 : vector<16x384xf32>
    %206 = math.tanh %205 : vector<16x384xf32>
    %cst_90 = arith.constant 1.000000e+00 : f32
    %207 = vector.broadcast %cst_90 : f32 to vector<16x384xf32>
    %208 = arith.addf %206, %207 : vector<16x384xf32>
    %cst_91 = arith.constant 5.000000e-01 : f32
    %209 = vector.broadcast %cst_91 : f32 to vector<16x384xf32>
    %210 = arith.mulf %209, %208 : vector<16x384xf32>
    %211 = vector.extract_strided_slice %210 {offsets = [0, 0], sizes = [16, 128], strides = [1, 1]} : vector<16x384xf32> to vector<16x128xf32>
    %212 = vector.extract_strided_slice %210 {offsets = [0, 128], sizes = [16, 128], strides = [1, 1]} : vector<16x384xf32> to vector<16x128xf32>
    %213 = vector.extract_strided_slice %210 {offsets = [0, 256], sizes = [16, 128], strides = [1, 1]} : vector<16x384xf32> to vector<16x128xf32>
    %214 = vector.extract_strided_slice %202 {offsets = [0, 384], sizes = [16, 128], strides = [1, 1]} : vector<16x512xf32> to vector<16x128xf32>
    %215 = math.tanh %214 : vector<16x128xf32>
    %216 = arith.mulf %212, %191 : vector<16x128xf32>
    %217 = arith.mulf %211, %215 : vector<16x128xf32>
    %218 = arith.addf %216, %217 : vector<16x128xf32>
    %219 = math.tanh %218 : vector<16x128xf32>
    %220 = arith.mulf %213, %219 : vector<16x128xf32>
    %c8_i32 = arith.constant 8 : i32
    %c0_92 = arith.constant 0 : index
    %c0_93 = arith.constant 0 : index
    %221 = vector.load %arg5[%c0_92, %c0_93] : memref<16x128xf32, #tpu.memory_space<vmem>>, vector<16x128xf32>
    tpu.vector_store %arg5[%c0_92, %c0_93], %220 {strides = array<i32>} : memref<16x128xf32, #tpu.memory_space<vmem>>, vector<16x128xf32>,
    %c0_94 = arith.constant 0 : index
    %c0_95 = arith.constant 0 : index
    %222 = vector.load %arg6[%c0_94, %c0_95] : memref<16x128xf32, #tpu.memory_space<vmem>>, vector<16x128xf32>
    tpu.vector_store %arg6[%c0_94, %c0_95], %218 {strides = array<i32>} : memref<16x128xf32, #tpu.memory_space<vmem>>, vector<16x128xf32>,
    return
  }
  func.func @transform_0(%arg0: i32, %arg1: i32) -> (i32, i32, i32) {
    %c0_i32 = arith.constant 0 : i32
    %c0_i32_0 = arith.constant 0 : i32
    return %arg1, %arg0, %c0_i32 : i32, i32, i32
  }
  func.func @transform_1(%arg0: i32, %arg1: i32) -> (i32, i32) {
    %c0_i32 = arith.constant 0 : i32
    %c0_i32_0 = arith.constant 0 : i32
    %c0_i32_1 = arith.constant 0 : i32
    return %c0_i32, %c0_i32_0 : i32, i32
  }
  func.func @transform_2(%arg0: i32, %arg1: i32) -> (i32, i32) {
    %c0_i32 = arith.constant 0 : i32
    %c0_i32_0 = arith.constant 0 : i32
    %c0_i32_1 = arith.constant 0 : i32
    return %c0_i32, %c0_i32_0 : i32, i32
  }
  func.func @transform_3(%arg0: i32, %arg1: i32) -> (i32, i32) {
    %c0_i32 = arith.constant 0 : i32
    %c0_i32_0 = arith.constant 0 : i32
    return %arg0, %c0_i32 : i32, i32
  }
}

module attributes {stable_mosaic.version = 11 : i64} {
  func.func @lstm_chunk_kernel(%arg0: i32, %arg1: i32, %arg2: memref<8x16x128xbf16, #tpu.memory_space<vmem>>, %arg3: memref<128x512xbf16, #tpu.memory_space<vmem>>, %arg4: memref<128x512xbf16, #tpu.memory_space<vmem>>, %arg5: memref<16x128xf32, #tpu.memory_space<vmem>>, %arg6: memref<16x128xf32, #tpu.memory_space<vmem>>) attributes {dimension_semantics = [#tpu.dimension_semantics<parallel>, #tpu.dimension_semantics<arbitrary>], iteration_bounds = array<i64: 1, 1>, scalar_prefetch = 0 : i64, scratch_operands = 1 : i64, tpu.core_type = #tpu.core_type<tc>, window_params = [{transform_indices = @transform_0, window_bounds = array<i64: 8, 16, 128>}, {pipeline_mode = #tpu.pipeline_mode<synchronous>, transform_indices = @transform_1, window_bounds = array<i64: 128, 512>}, {pipeline_mode = #tpu.pipeline_mode<synchronous>, transform_indices = @transform_2, window_bounds = array<i64: 128, 512>}, {transform_indices = @transform_3, window_bounds = array<i64: 16, 128>}]} {
    %c0_i32 = arith.constant 0 : i32
    %0 = arith.cmpi eq, %arg1, %c0_i32 : i32
    %1 = arith.extui %0 : i1 to i32
    %c0_i32_0 = arith.constant 0 : i32
    %2 = arith.cmpi ne, %1, %c0_i32_0 : i32
    scf.if %2 {
      %cst_96 = arith.constant 0.000000e+00 : f32
      %223 = vector.broadcast %cst_96 : f32 to vector<16x128xf32>
      %c0_97 = arith.constant 0 : index
      %c0_98 = arith.constant 0 : index
      %224 = vector.load %arg5[%c0_97, %c0_98] : memref<16x128xf32, #tpu.memory_space<vmem>>, vector<16x128xf32>
      tpu.vector_store %arg5[%c0_97, %c0_98], %223 {strides = array<i32>} : memref<16x128xf32, #tpu.memory_space<vmem>>, vector<16x128xf32>,
      %cst_99 = arith.constant 0.000000e+00 : f32
      %225 = vector.broadcast %cst_99 : f32 to vector<16x128xf32>
      %c0_100 = arith.constant 0 : index
      %c0_101 = arith.constant 0 : index
      %226 = vector.load %arg6[%c0_100, %c0_101] : memref<16x128xf32, #tpu.memory_space<vmem>>, vector<16x128xf32>
      tpu.vector_store %arg6[%c0_100, %c0_101], %225 {strides = array<i32>} : memref<16x128xf32, #tpu.memory_space<vmem>>, vector<16x128xf32>,
    } else {
    }
    %c0 = arith.constant 0 : index
    %c0_1 = arith.constant 0 : index
    %3 = vector.load %arg5[%c0, %c0_1] : memref<16x128xf32, #tpu.memory_space<vmem>>, vector<16x128xf32>
    %c0_2 = arith.constant 0 : index
    %c0_3 = arith.constant 0 : index
    %4 = vector.load %arg6[%c0_2, %c0_3] : memref<16x128xf32, #tpu.memory_space<vmem>>, vector<16x128xf32>
    %c0_i32_4 = arith.constant 0 : i32
    %5 = arith.index_cast %c0_i32_4 : i32 to index
    %c0_5 = arith.constant 0 : index
    %c0_6 = arith.constant 0 : index
    %6 = vector.load %arg2[%5, %c0_5, %c0_6] : memref<8x16x128xbf16, #tpu.memory_space<vmem>>, vector<1x16x128xbf16>
    %7 = vector.shape_cast %6 : vector<1x16x128xbf16> to vector<16x128xbf16>
    %c0_7 = arith.constant 0 : index
    %c0_8 = arith.constant 0 : index
    %8 = vector.load %arg3[%c0_7, %c0_8] : memref<128x512xbf16, #tpu.memory_space<vmem>>, vector<128x512xbf16>
    %cst = arith.constant dense<0.000000e+00> : vector<16x512xf32>
    %9 = tpu.matmul %7, %8, %cst {dimension_numbers = #tpu.dot_dimension_numbers<[1], [0], [0], [1], [0, 0, 1, 1], [], []>} : vector<16x128xbf16>, vector<128x512xbf16>, vector<16x512xf32> -> vector<16x512xf32>
    %10 = arith.truncf %3 : vector<16x128xf32> to vector<16x128xbf16>
    %c0_9 = arith.constant 0 : index
    %c0_10 = arith.constant 0 : index
    %11 = vector.load %arg4[%c0_9, %c0_10] : memref<128x512xbf16, #tpu.memory_space<vmem>>, vector<128x512xbf16>
    %cst_11 = arith.constant dense<0.000000e+00> : vector<16x512xf32>
    %12 = tpu.matmul %10, %11, %cst_11 {dimension_numbers = #tpu.dot_dimension_numbers<[1], [0], [0], [1], [0, 0, 1, 1], [], []>} : vector<16x128xbf16>, vector<128x512xbf16>, vector<16x512xf32> -> vector<16x512xf32>
    %13 = arith.addf %9, %12 : vector<16x512xf32>
    %14 = vector.extract_strided_slice %13 {offsets = [0, 0], sizes = [16, 384], strides = [1, 1]} : vector<16x512xf32> to vector<16x384xf32>
    %cst_12 = arith.constant 5.000000e-01 : f32
    %15 = vector.broadcast %cst_12 : f32 to vector<16x384xf32>
    %16 = arith.mulf %15, %14 : vector<16x384xf32>
    %17 = math.tanh %16 : vector<16x384xf32>
    %cst_13 = arith.constant 1.000000e+00 : f32
    %18 = vector.broadcast %cst_13 : f32 to vector<16x384xf32>
    %19 = arith.addf %17, %18 : vector<16x384xf32>
    %cst_14 = arith.constant 5.000000e-01 : f32
    %20 = vector.broadcast %cst_14 : f32 to vector<16x384xf32>
    %21 = arith.mulf %20, %19 : vector<16x384xf32>
    %22 = vector.extract_strided_slice %21 {offsets = [0, 0], sizes = [16, 128], strides = [1, 1]} : vector<16x384xf32> to vector<16x128xf32>
    %23 = vector.extract_strided_slice %21 {offsets = [0, 128], sizes = [16, 128], strides = [1, 1]} : vector<16x384xf32> to vector<16x128xf32>
    %24 = vector.extract_strided_slice %21 {offsets = [0, 256], sizes = [16, 128], strides = [1, 1]} : vector<16x384xf32> to vector<16x128xf32>
    %25 = vector.extract_strided_slice %13 {offsets = [0, 384], sizes = [16, 128], strides = [1, 1]} : vector<16x512xf32> to vector<16x128xf32>
    %26 = math.tanh %25 : vector<16x128xf32>
    %27 = arith.mulf %23, %4 : vector<16x128xf32>
    %28 = arith.mulf %22, %26 : vector<16x128xf32>
    %29 = arith.addf %27, %28 : vector<16x128xf32>
    %30 = math.tanh %29 : vector<16x128xf32>
    %31 = arith.mulf %24, %30 : vector<16x128xf32>
    %c1_i32 = arith.constant 1 : i32
    %32 = arith.index_cast %c1_i32 : i32 to index
    %c0_15 = arith.constant 0 : index
    %c0_16 = arith.constant 0 : index
    %33 = vector.load %arg2[%32, %c0_15, %c0_16] : memref<8x16x128xbf16, #tpu.memory_space<vmem>>, vector<1x16x128xbf16>
    %34 = vector.shape_cast %33 : vector<1x16x128xbf16> to vector<16x128xbf16>
    %c0_17 = arith.constant 0 : index
    %c0_18 = arith.constant 0 : index
    %35 = vector.load %arg3[%c0_17, %c0_18] : memref<128x512xbf16, #tpu.memory_space<vmem>>, vector<128x512xbf16>
    %cst_19 = arith.constant dense<0.000000e+00> : vector<16x512xf32>
    %36 = tpu.matmul %34, %35, %cst_19 {dimension_numbers = #tpu.dot_dimension_numbers<[1], [0], [0], [1], [0, 0, 1, 1], [], []>} : vector<16x128xbf16>, vector<128x512xbf16>, vector<16x512xf32> -> vector<16x512xf32>
    %37 = arith.truncf %31 : vector<16x128xf32> to vector<16x128xbf16>
    %c0_20 = arith.constant 0 : index
    %c0_21 = arith.constant 0 : index
    %38 = vector.load %arg4[%c0_20, %c0_21] : memref<128x512xbf16, #tpu.memory_space<vmem>>, vector<128x512xbf16>
    %cst_22 = arith.constant dense<0.000000e+00> : vector<16x512xf32>
    %39 = tpu.matmul %37, %38, %cst_22 {dimension_numbers = #tpu.dot_dimension_numbers<[1], [0], [0], [1], [0, 0, 1, 1], [], []>} : vector<16x128xbf16>, vector<128x512xbf16>, vector<16x512xf32> -> vector<16x512xf32>
    %40 = arith.addf %36, %39 : vector<16x512xf32>
    %41 = vector.extract_strided_slice %40 {offsets = [0, 0], sizes = [16, 384], strides = [1, 1]} : vector<16x512xf32> to vector<16x384xf32>
    %cst_23 = arith.constant 5.000000e-01 : f32
    %42 = vector.broadcast %cst_23 : f32 to vector<16x384xf32>
    %43 = arith.mulf %42, %41 : vector<16x384xf32>
    %44 = math.tanh %43 : vector<16x384xf32>
    %cst_24 = arith.constant 1.000000e+00 : f32
    %45 = vector.broadcast %cst_24 : f32 to vector<16x384xf32>
    %46 = arith.addf %44, %45 : vector<16x384xf32>
    %cst_25 = arith.constant 5.000000e-01 : f32
    %47 = vector.broadcast %cst_25 : f32 to vector<16x384xf32>
    %48 = arith.mulf %47, %46 : vector<16x384xf32>
    %49 = vector.extract_strided_slice %48 {offsets = [0, 0], sizes = [16, 128], strides = [1, 1]} : vector<16x384xf32> to vector<16x128xf32>
    %50 = vector.extract_strided_slice %48 {offsets = [0, 128], sizes = [16, 128], strides = [1, 1]} : vector<16x384xf32> to vector<16x128xf32>
    %51 = vector.extract_strided_slice %48 {offsets = [0, 256], sizes = [16, 128], strides = [1, 1]} : vector<16x384xf32> to vector<16x128xf32>
    %52 = vector.extract_strided_slice %40 {offsets = [0, 384], sizes = [16, 128], strides = [1, 1]} : vector<16x512xf32> to vector<16x128xf32>
    %53 = math.tanh %52 : vector<16x128xf32>
    %54 = arith.mulf %50, %29 : vector<16x128xf32>
    %55 = arith.mulf %49, %53 : vector<16x128xf32>
    %56 = arith.addf %54, %55 : vector<16x128xf32>
    %57 = math.tanh %56 : vector<16x128xf32>
    %58 = arith.mulf %51, %57 : vector<16x128xf32>
    %c2_i32 = arith.constant 2 : i32
    %59 = arith.index_cast %c2_i32 : i32 to index
    %c0_26 = arith.constant 0 : index
    %c0_27 = arith.constant 0 : index
    %60 = vector.load %arg2[%59, %c0_26, %c0_27] : memref<8x16x128xbf16, #tpu.memory_space<vmem>>, vector<1x16x128xbf16>
    %61 = vector.shape_cast %60 : vector<1x16x128xbf16> to vector<16x128xbf16>
    %c0_28 = arith.constant 0 : index
    %c0_29 = arith.constant 0 : index
    %62 = vector.load %arg3[%c0_28, %c0_29] : memref<128x512xbf16, #tpu.memory_space<vmem>>, vector<128x512xbf16>
    %cst_30 = arith.constant dense<0.000000e+00> : vector<16x512xf32>
    %63 = tpu.matmul %61, %62, %cst_30 {dimension_numbers = #tpu.dot_dimension_numbers<[1], [0], [0], [1], [0, 0, 1, 1], [], []>} : vector<16x128xbf16>, vector<128x512xbf16>, vector<16x512xf32> -> vector<16x512xf32>
    %64 = arith.truncf %58 : vector<16x128xf32> to vector<16x128xbf16>
    %c0_31 = arith.constant 0 : index
    %c0_32 = arith.constant 0 : index
    %65 = vector.load %arg4[%c0_31, %c0_32] : memref<128x512xbf16, #tpu.memory_space<vmem>>, vector<128x512xbf16>
    %cst_33 = arith.constant dense<0.000000e+00> : vector<16x512xf32>
    %66 = tpu.matmul %64, %65, %cst_33 {dimension_numbers = #tpu.dot_dimension_numbers<[1], [0], [0], [1], [0, 0, 1, 1], [], []>} : vector<16x128xbf16>, vector<128x512xbf16>, vector<16x512xf32> -> vector<16x512xf32>
    %67 = arith.addf %63, %66 : vector<16x512xf32>
    %68 = vector.extract_strided_slice %67 {offsets = [0, 0], sizes = [16, 384], strides = [1, 1]} : vector<16x512xf32> to vector<16x384xf32>
    %cst_34 = arith.constant 5.000000e-01 : f32
    %69 = vector.broadcast %cst_34 : f32 to vector<16x384xf32>
    %70 = arith.mulf %69, %68 : vector<16x384xf32>
    %71 = math.tanh %70 : vector<16x384xf32>
    %cst_35 = arith.constant 1.000000e+00 : f32
    %72 = vector.broadcast %cst_35 : f32 to vector<16x384xf32>
    %73 = arith.addf %71, %72 : vector<16x384xf32>
    %cst_36 = arith.constant 5.000000e-01 : f32
    %74 = vector.broadcast %cst_36 : f32 to vector<16x384xf32>
    %75 = arith.mulf %74, %73 : vector<16x384xf32>
    %76 = vector.extract_strided_slice %75 {offsets = [0, 0], sizes = [16, 128], strides = [1, 1]} : vector<16x384xf32> to vector<16x128xf32>
    %77 = vector.extract_strided_slice %75 {offsets = [0, 128], sizes = [16, 128], strides = [1, 1]} : vector<16x384xf32> to vector<16x128xf32>
    %78 = vector.extract_strided_slice %75 {offsets = [0, 256], sizes = [16, 128], strides = [1, 1]} : vector<16x384xf32> to vector<16x128xf32>
    %79 = vector.extract_strided_slice %67 {offsets = [0, 384], sizes = [16, 128], strides = [1, 1]} : vector<16x512xf32> to vector<16x128xf32>
    %80 = math.tanh %79 : vector<16x128xf32>
    %81 = arith.mulf %77, %56 : vector<16x128xf32>
    %82 = arith.mulf %76, %80 : vector<16x128xf32>
    %83 = arith.addf %81, %82 : vector<16x128xf32>
    %84 = math.tanh %83 : vector<16x128xf32>
    %85 = arith.mulf %78, %84 : vector<16x128xf32>
    %c3_i32 = arith.constant 3 : i32
    %86 = arith.index_cast %c3_i32 : i32 to index
    %c0_37 = arith.constant 0 : index
    %c0_38 = arith.constant 0 : index
    %87 = vector.load %arg2[%86, %c0_37, %c0_38] : memref<8x16x128xbf16, #tpu.memory_space<vmem>>, vector<1x16x128xbf16>
    %88 = vector.shape_cast %87 : vector<1x16x128xbf16> to vector<16x128xbf16>
    %c0_39 = arith.constant 0 : index
    %c0_40 = arith.constant 0 : index
    %89 = vector.load %arg3[%c0_39, %c0_40] : memref<128x512xbf16, #tpu.memory_space<vmem>>, vector<128x512xbf16>
    %cst_41 = arith.constant dense<0.000000e+00> : vector<16x512xf32>
    %90 = tpu.matmul %88, %89, %cst_41 {dimension_numbers = #tpu.dot_dimension_numbers<[1], [0], [0], [1], [0, 0, 1, 1], [], []>} : vector<16x128xbf16>, vector<128x512xbf16>, vector<16x512xf32> -> vector<16x512xf32>
    %91 = arith.truncf %85 : vector<16x128xf32> to vector<16x128xbf16>
    %c0_42 = arith.constant 0 : index
    %c0_43 = arith.constant 0 : index
    %92 = vector.load %arg4[%c0_42, %c0_43] : memref<128x512xbf16, #tpu.memory_space<vmem>>, vector<128x512xbf16>
    %cst_44 = arith.constant dense<0.000000e+00> : vector<16x512xf32>
    %93 = tpu.matmul %91, %92, %cst_44 {dimension_numbers = #tpu.dot_dimension_numbers<[1], [0], [0], [1], [0, 0, 1, 1], [], []>} : vector<16x128xbf16>, vector<128x512xbf16>, vector<16x512xf32> -> vector<16x512xf32>
    %94 = arith.addf %90, %93 : vector<16x512xf32>
    %95 = vector.extract_strided_slice %94 {offsets = [0, 0], sizes = [16, 384], strides = [1, 1]} : vector<16x512xf32> to vector<16x384xf32>
    %cst_45 = arith.constant 5.000000e-01 : f32
    %96 = vector.broadcast %cst_45 : f32 to vector<16x384xf32>
    %97 = arith.mulf %96, %95 : vector<16x384xf32>
    %98 = math.tanh %97 : vector<16x384xf32>
    %cst_46 = arith.constant 1.000000e+00 : f32
    %99 = vector.broadcast %cst_46 : f32 to vector<16x384xf32>
    %100 = arith.addf %98, %99 : vector<16x384xf32>
    %cst_47 = arith.constant 5.000000e-01 : f32
    %101 = vector.broadcast %cst_47 : f32 to vector<16x384xf32>
    %102 = arith.mulf %101, %100 : vector<16x384xf32>
    %103 = vector.extract_strided_slice %102 {offsets = [0, 0], sizes = [16, 128], strides = [1, 1]} : vector<16x384xf32> to vector<16x128xf32>
    %104 = vector.extract_strided_slice %102 {offsets = [0, 128], sizes = [16, 128], strides = [1, 1]} : vector<16x384xf32> to vector<16x128xf32>
    %105 = vector.extract_strided_slice %102 {offsets = [0, 256], sizes = [16, 128], strides = [1, 1]} : vector<16x384xf32> to vector<16x128xf32>
    %106 = vector.extract_strided_slice %94 {offsets = [0, 384], sizes = [16, 128], strides = [1, 1]} : vector<16x512xf32> to vector<16x128xf32>
    %107 = math.tanh %106 : vector<16x128xf32>
    %108 = arith.mulf %104, %83 : vector<16x128xf32>
    %109 = arith.mulf %103, %107 : vector<16x128xf32>
    %110 = arith.addf %108, %109 : vector<16x128xf32>
    %111 = math.tanh %110 : vector<16x128xf32>
    %112 = arith.mulf %105, %111 : vector<16x128xf32>
    %c4_i32 = arith.constant 4 : i32
    %113 = arith.index_cast %c4_i32 : i32 to index
    %c0_48 = arith.constant 0 : index
    %c0_49 = arith.constant 0 : index
    %114 = vector.load %arg2[%113, %c0_48, %c0_49] : memref<8x16x128xbf16, #tpu.memory_space<vmem>>, vector<1x16x128xbf16>
    %115 = vector.shape_cast %114 : vector<1x16x128xbf16> to vector<16x128xbf16>
    %c0_50 = arith.constant 0 : index
    %c0_51 = arith.constant 0 : index
    %116 = vector.load %arg3[%c0_50, %c0_51] : memref<128x512xbf16, #tpu.memory_space<vmem>>, vector<128x512xbf16>
    %cst_52 = arith.constant dense<0.000000e+00> : vector<16x512xf32>
    %117 = tpu.matmul %115, %116, %cst_52 {dimension_numbers = #tpu.dot_dimension_numbers<[1], [0], [0], [1], [0, 0, 1, 1], [], []>} : vector<16x128xbf16>, vector<128x512xbf16>, vector<16x512xf32> -> vector<16x512xf32>
    %118 = arith.truncf %112 : vector<16x128xf32> to vector<16x128xbf16>
    %c0_53 = arith.constant 0 : index
    %c0_54 = arith.constant 0 : index
    %119 = vector.load %arg4[%c0_53, %c0_54] : memref<128x512xbf16, #tpu.memory_space<vmem>>, vector<128x512xbf16>
    %cst_55 = arith.constant dense<0.000000e+00> : vector<16x512xf32>
    %120 = tpu.matmul %118, %119, %cst_55 {dimension_numbers = #tpu.dot_dimension_numbers<[1], [0], [0], [1], [0, 0, 1, 1], [], []>} : vector<16x128xbf16>, vector<128x512xbf16>, vector<16x512xf32> -> vector<16x512xf32>
    %121 = arith.addf %117, %120 : vector<16x512xf32>
    %122 = vector.extract_strided_slice %121 {offsets = [0, 0], sizes = [16, 384], strides = [1, 1]} : vector<16x512xf32> to vector<16x384xf32>
    %cst_56 = arith.constant 5.000000e-01 : f32
    %123 = vector.broadcast %cst_56 : f32 to vector<16x384xf32>
    %124 = arith.mulf %123, %122 : vector<16x384xf32>
    %125 = math.tanh %124 : vector<16x384xf32>
    %cst_57 = arith.constant 1.000000e+00 : f32
    %126 = vector.broadcast %cst_57 : f32 to vector<16x384xf32>
    %127 = arith.addf %125, %126 : vector<16x384xf32>
    %cst_58 = arith.constant 5.000000e-01 : f32
    %128 = vector.broadcast %cst_58 : f32 to vector<16x384xf32>
    %129 = arith.mulf %128, %127 : vector<16x384xf32>
    %130 = vector.extract_strided_slice %129 {offsets = [0, 0], sizes = [16, 128], strides = [1, 1]} : vector<16x384xf32> to vector<16x128xf32>
    %131 = vector.extract_strided_slice %129 {offsets = [0, 128], sizes = [16, 128], strides = [1, 1]} : vector<16x384xf32> to vector<16x128xf32>
    %132 = vector.extract_strided_slice %129 {offsets = [0, 256], sizes = [16, 128], strides = [1, 1]} : vector<16x384xf32> to vector<16x128xf32>
    %133 = vector.extract_strided_slice %121 {offsets = [0, 384], sizes = [16, 128], strides = [1, 1]} : vector<16x512xf32> to vector<16x128xf32>
    %134 = math.tanh %133 : vector<16x128xf32>
    %135 = arith.mulf %131, %110 : vector<16x128xf32>
    %136 = arith.mulf %130, %134 : vector<16x128xf32>
    %137 = arith.addf %135, %136 : vector<16x128xf32>
    %138 = math.tanh %137 : vector<16x128xf32>
    %139 = arith.mulf %132, %138 : vector<16x128xf32>
    %c5_i32 = arith.constant 5 : i32
    %140 = arith.index_cast %c5_i32 : i32 to index
    %c0_59 = arith.constant 0 : index
    %c0_60 = arith.constant 0 : index
    %141 = vector.load %arg2[%140, %c0_59, %c0_60] : memref<8x16x128xbf16, #tpu.memory_space<vmem>>, vector<1x16x128xbf16>
    %142 = vector.shape_cast %141 : vector<1x16x128xbf16> to vector<16x128xbf16>
    %c0_61 = arith.constant 0 : index
    %c0_62 = arith.constant 0 : index
    %143 = vector.load %arg3[%c0_61, %c0_62] : memref<128x512xbf16, #tpu.memory_space<vmem>>, vector<128x512xbf16>
    %cst_63 = arith.constant dense<0.000000e+00> : vector<16x512xf32>
    %144 = tpu.matmul %142, %143, %cst_63 {dimension_numbers = #tpu.dot_dimension_numbers<[1], [0], [0], [1], [0, 0, 1, 1], [], []>} : vector<16x128xbf16>, vector<128x512xbf16>, vector<16x512xf32> -> vector<16x512xf32>
    %145 = arith.truncf %139 : vector<16x128xf32> to vector<16x128xbf16>
    %c0_64 = arith.constant 0 : index
    %c0_65 = arith.constant 0 : index
    %146 = vector.load %arg4[%c0_64, %c0_65] : memref<128x512xbf16, #tpu.memory_space<vmem>>, vector<128x512xbf16>
    %cst_66 = arith.constant dense<0.000000e+00> : vector<16x512xf32>
    %147 = tpu.matmul %145, %146, %cst_66 {dimension_numbers = #tpu.dot_dimension_numbers<[1], [0], [0], [1], [0, 0, 1, 1], [], []>} : vector<16x128xbf16>, vector<128x512xbf16>, vector<16x512xf32> -> vector<16x512xf32>
    %148 = arith.addf %144, %147 : vector<16x512xf32>
    %149 = vector.extract_strided_slice %148 {offsets = [0, 0], sizes = [16, 384], strides = [1, 1]} : vector<16x512xf32> to vector<16x384xf32>
    %cst_67 = arith.constant 5.000000e-01 : f32
    %150 = vector.broadcast %cst_67 : f32 to vector<16x384xf32>
    %151 = arith.mulf %150, %149 : vector<16x384xf32>
    %152 = math.tanh %151 : vector<16x384xf32>
    %cst_68 = arith.constant 1.000000e+00 : f32
    %153 = vector.broadcast %cst_68 : f32 to vector<16x384xf32>
    %154 = arith.addf %152, %153 : vector<16x384xf32>
    %cst_69 = arith.constant 5.000000e-01 : f32
    %155 = vector.broadcast %cst_69 : f32 to vector<16x384xf32>
    %156 = arith.mulf %155, %154 : vector<16x384xf32>
    %157 = vector.extract_strided_slice %156 {offsets = [0, 0], sizes = [16, 128], strides = [1, 1]} : vector<16x384xf32> to vector<16x128xf32>
    %158 = vector.extract_strided_slice %156 {offsets = [0, 128], sizes = [16, 128], strides = [1, 1]} : vector<16x384xf32> to vector<16x128xf32>
    %159 = vector.extract_strided_slice %156 {offsets = [0, 256], sizes = [16, 128], strides = [1, 1]} : vector<16x384xf32> to vector<16x128xf32>
    %160 = vector.extract_strided_slice %148 {offsets = [0, 384], sizes = [16, 128], strides = [1, 1]} : vector<16x512xf32> to vector<16x128xf32>
    %161 = math.tanh %160 : vector<16x128xf32>
    %162 = arith.mulf %158, %137 : vector<16x128xf32>
    %163 = arith.mulf %157, %161 : vector<16x128xf32>
    %164 = arith.addf %162, %163 : vector<16x128xf32>
    %165 = math.tanh %164 : vector<16x128xf32>
    %166 = arith.mulf %159, %165 : vector<16x128xf32>
    %c6_i32 = arith.constant 6 : i32
    %167 = arith.index_cast %c6_i32 : i32 to index
    %c0_70 = arith.constant 0 : index
    %c0_71 = arith.constant 0 : index
    %168 = vector.load %arg2[%167, %c0_70, %c0_71] : memref<8x16x128xbf16, #tpu.memory_space<vmem>>, vector<1x16x128xbf16>
    %169 = vector.shape_cast %168 : vector<1x16x128xbf16> to vector<16x128xbf16>
    %c0_72 = arith.constant 0 : index
    %c0_73 = arith.constant 0 : index
    %170 = vector.load %arg3[%c0_72, %c0_73] : memref<128x512xbf16, #tpu.memory_space<vmem>>, vector<128x512xbf16>
    %cst_74 = arith.constant dense<0.000000e+00> : vector<16x512xf32>
    %171 = tpu.matmul %169, %170, %cst_74 {dimension_numbers = #tpu.dot_dimension_numbers<[1], [0], [0], [1], [0, 0, 1, 1], [], []>} : vector<16x128xbf16>, vector<128x512xbf16>, vector<16x512xf32> -> vector<16x512xf32>
    %172 = arith.truncf %166 : vector<16x128xf32> to vector<16x128xbf16>
    %c0_75 = arith.constant 0 : index
    %c0_76 = arith.constant 0 : index
    %173 = vector.load %arg4[%c0_75, %c0_76] : memref<128x512xbf16, #tpu.memory_space<vmem>>, vector<128x512xbf16>
    %cst_77 = arith.constant dense<0.000000e+00> : vector<16x512xf32>
    %174 = tpu.matmul %172, %173, %cst_77 {dimension_numbers = #tpu.dot_dimension_numbers<[1], [0], [0], [1], [0, 0, 1, 1], [], []>} : vector<16x128xbf16>, vector<128x512xbf16>, vector<16x512xf32> -> vector<16x512xf32>
    %175 = arith.addf %171, %174 : vector<16x512xf32>
    %176 = vector.extract_strided_slice %175 {offsets = [0, 0], sizes = [16, 384], strides = [1, 1]} : vector<16x512xf32> to vector<16x384xf32>
    %cst_78 = arith.constant 5.000000e-01 : f32
    %177 = vector.broadcast %cst_78 : f32 to vector<16x384xf32>
    %178 = arith.mulf %177, %176 : vector<16x384xf32>
    %179 = math.tanh %178 : vector<16x384xf32>
    %cst_79 = arith.constant 1.000000e+00 : f32
    %180 = vector.broadcast %cst_79 : f32 to vector<16x384xf32>
    %181 = arith.addf %179, %180 : vector<16x384xf32>
    %cst_80 = arith.constant 5.000000e-01 : f32
    %182 = vector.broadcast %cst_80 : f32 to vector<16x384xf32>
    %183 = arith.mulf %182, %181 : vector<16x384xf32>
    %184 = vector.extract_strided_slice %183 {offsets = [0, 0], sizes = [16, 128], strides = [1, 1]} : vector<16x384xf32> to vector<16x128xf32>
    %185 = vector.extract_strided_slice %183 {offsets = [0, 128], sizes = [16, 128], strides = [1, 1]} : vector<16x384xf32> to vector<16x128xf32>
    %186 = vector.extract_strided_slice %183 {offsets = [0, 256], sizes = [16, 128], strides = [1, 1]} : vector<16x384xf32> to vector<16x128xf32>
    %187 = vector.extract_strided_slice %175 {offsets = [0, 384], sizes = [16, 128], strides = [1, 1]} : vector<16x512xf32> to vector<16x128xf32>
    %188 = math.tanh %187 : vector<16x128xf32>
    %189 = arith.mulf %185, %164 : vector<16x128xf32>
    %190 = arith.mulf %184, %188 : vector<16x128xf32>
    %191 = arith.addf %189, %190 : vector<16x128xf32>
    %192 = math.tanh %191 : vector<16x128xf32>
    %193 = arith.mulf %186, %192 : vector<16x128xf32>
    %c7_i32 = arith.constant 7 : i32
    %194 = arith.index_cast %c7_i32 : i32 to index
    %c0_81 = arith.constant 0 : index
    %c0_82 = arith.constant 0 : index
    %195 = vector.load %arg2[%194, %c0_81, %c0_82] : memref<8x16x128xbf16, #tpu.memory_space<vmem>>, vector<1x16x128xbf16>
    %196 = vector.shape_cast %195 : vector<1x16x128xbf16> to vector<16x128xbf16>
    %c0_83 = arith.constant 0 : index
    %c0_84 = arith.constant 0 : index
    %197 = vector.load %arg3[%c0_83, %c0_84] : memref<128x512xbf16, #tpu.memory_space<vmem>>, vector<128x512xbf16>
    %cst_85 = arith.constant dense<0.000000e+00> : vector<16x512xf32>
    %198 = tpu.matmul %196, %197, %cst_85 {dimension_numbers = #tpu.dot_dimension_numbers<[1], [0], [0], [1], [0, 0, 1, 1], [], []>} : vector<16x128xbf16>, vector<128x512xbf16>, vector<16x512xf32> -> vector<16x512xf32>
    %199 = arith.truncf %193 : vector<16x128xf32> to vector<16x128xbf16>
    %c0_86 = arith.constant 0 : index
    %c0_87 = arith.constant 0 : index
    %200 = vector.load %arg4[%c0_86, %c0_87] : memref<128x512xbf16, #tpu.memory_space<vmem>>, vector<128x512xbf16>
    %cst_88 = arith.constant dense<0.000000e+00> : vector<16x512xf32>
    %201 = tpu.matmul %199, %200, %cst_88 {dimension_numbers = #tpu.dot_dimension_numbers<[1], [0], [0], [1], [0, 0, 1, 1], [], []>} : vector<16x128xbf16>, vector<128x512xbf16>, vector<16x512xf32> -> vector<16x512xf32>
    %202 = arith.addf %198, %201 : vector<16x512xf32>
    %203 = vector.extract_strided_slice %202 {offsets = [0, 0], sizes = [16, 384], strides = [1, 1]} : vector<16x512xf32> to vector<16x384xf32>
    %cst_89 = arith.constant 5.000000e-01 : f32
    %204 = vector.broadcast %cst_89 : f32 to vector<16x384xf32>
    %205 = arith.mulf %204, %203 : vector<16x384xf32>
    %206 = math.tanh %205 : vector<16x384xf32>
    %cst_90 = arith.constant 1.000000e+00 : f32
    %207 = vector.broadcast %cst_90 : f32 to vector<16x384xf32>
    %208 = arith.addf %206, %207 : vector<16x384xf32>
    %cst_91 = arith.constant 5.000000e-01 : f32
    %209 = vector.broadcast %cst_91 : f32 to vector<16x384xf32>
    %210 = arith.mulf %209, %208 : vector<16x384xf32>
    %211 = vector.extract_strided_slice %210 {offsets = [0, 0], sizes = [16, 128], strides = [1, 1]} : vector<16x384xf32> to vector<16x128xf32>
    %212 = vector.extract_strided_slice %210 {offsets = [0, 128], sizes = [16, 128], strides = [1, 1]} : vector<16x384xf32> to vector<16x128xf32>
    %213 = vector.extract_strided_slice %210 {offsets = [0, 256], sizes = [16, 128], strides = [1, 1]} : vector<16x384xf32> to vector<16x128xf32>
    %214 = vector.extract_strided_slice %202 {offsets = [0, 384], sizes = [16, 128], strides = [1, 1]} : vector<16x512xf32> to vector<16x128xf32>
    %215 = math.tanh %214 : vector<16x128xf32>
    %216 = arith.mulf %212, %191 : vector<16x128xf32>
    %217 = arith.mulf %211, %215 : vector<16x128xf32>
    %218 = arith.addf %216, %217 : vector<16x128xf32>
    %219 = math.tanh %218 : vector<16x128xf32>
    %220 = arith.mulf %213, %219 : vector<16x128xf32>
    %c8_i32 = arith.constant 8 : i32
    %c0_92 = arith.constant 0 : index
    %c0_93 = arith.constant 0 : index
    %221 = vector.load %arg5[%c0_92, %c0_93] : memref<16x128xf32, #tpu.memory_space<vmem>>, vector<16x128xf32>
    tpu.vector_store %arg5[%c0_92, %c0_93], %220 {strides = array<i32>} : memref<16x128xf32, #tpu.memory_space<vmem>>, vector<16x128xf32>,
    %c0_94 = arith.constant 0 : index
    %c0_95 = arith.constant 0 : index
    %222 = vector.load %arg6[%c0_94, %c0_95] : memref<16x128xf32, #tpu.memory_space<vmem>>, vector<16x128xf32>
    tpu.vector_store %arg6[%c0_94, %c0_95], %218 {strides = array<i32>} : memref<16x128xf32, #tpu.memory_space<vmem>>, vector<16x128xf32>,
    return
  }
  func.func @transform_0(%arg0: i32, %arg1: i32) -> (i32, i32, i32) {
    %c0_i32 = arith.constant 0 : i32
    %c0_i32_0 = arith.constant 0 : i32
    return %arg1, %arg0, %c0_i32 : i32, i32, i32
  }
  func.func @transform_1(%arg0: i32, %arg1: i32) -> (i32, i32) {
    %c0_i32 = arith.constant 0 : i32
    %c0_i32_0 = arith.constant 0 : i32
    %c0_i32_1 = arith.constant 0 : i32
    return %c0_i32, %c0_i32_0 : i32, i32
  }
  func.func @transform_2(%arg0: i32, %arg1: i32) -> (i32, i32) {
    %c0_i32 = arith.constant 0 : i32
    %c0_i32_0 = arith.constant 0 : i32
    %c0_i32_1 = arith.constant 0 : i32
    return %c0_i32, %c0_i32_0 : i32, i32
  }
  func.func @transform_3(%arg0: i32, %arg1: i32) -> (i32, i32) {
    %c0_i32 = arith.constant 0 : i32
    %c0_i32_0 = arith.constant 0 : i32
    return %arg0, %c0_i32 : i32, i32
  }
}

</mosaic_0001>

<bundles_post_ra>
// kernel: tpu_custom_call.1
= control target key start
LH: loop header
LB: loop body
LE: loop exit
PB: predicated region body
PF: predicated region fallthrough
CT: control target
= control target key end

     0   :  { %8 = vsyncpa [#allocation4], 0  ;;  %s3730_s0 = inlined_call_operand.hbm [shape: bf16[8,16,128], index: 0, kind: input, shape index: {}]   ;;  %s3731_s1 = inlined_call_operand.hbm [shape: bf16[128,512], index: 1, kind: input, shape index: {}]   ;;  %s3732_s2 = inlined_call_operand.hbm [shape: bf16[128,512], index: 2, kind: input, shape index: {}]   ;;  %s3733_s3 = inlined_call_operand.hbm [shape: f32[16,128], index: 3, kind: output, shape index: {}]  }
   0x1   :  { %9 = vsyncpa [#allocation7], 0 }
   0x2   :  { %10 = vsyncpa [#allocation5], 0  ;;  %s2788_s12 = smov [#allocation6]   ;;  %s2694_s16 = scalar_lea.hbm %s3731_s1, 4096 }
   0x3   :  { %s28_s13 = sshll.u32 %s2788_s12, 4  ;;  %p2695_p0 = scmp.ne.s32.totalorder %s3731_s1, %s2694_s16  ;;  %s29_s13 = int_to_ptr.vmem [resolvable:$true] %s28_s13 }
   0x4   :  { %p2698_p1 = scmp.lt.u32.totalorder %s2694_s16, %s3731_s1 }
   0x6   :  { %p2700_p2 = pnand %p2698_p1, %p2695_p0 }
   0x8   :  { %2703 = shalt.err (!%p2700_p2)
}
   0x9   :  { %s2704_s21 = scalar_lea.vmem %s29_s13, 4096  ;;  %p2709_p4 = scmp.lt.s32.totalorder %s29_s13, %s29_s13 }
   0xa   :  { %p2705_p3 = scmp.ne.s32.totalorder %s29_s13, %s2704_s21  ;;  %p2710_p5 = scmp.lt.s32.totalorder %s2704_s21, %s2704_s21 }
   0xc   :  { %p2711_p6 = por %p2710_p5, %p2709_p4 }
   0xe   :  { %p2712_p7 = pnand %p2711_p6, %p2705_p3 }
  0x10   :  { %2715 = shalt.err (!%p2712_p7)
}
  0x11   :  { %s2789_s22 = smov 256   ;;  %s2790_s23 = smov 16  }
  0x12   :  { %34 = dma.hbm_to_vmem [thread:$0]  %s3731_s1, 4096, %s29_s13, [#allocation7], %s2789_s22, %s2789_s22, %s2790_s23  }
  0x13   :  { %s2791_s26 = smov [#allocation3]   ;;  %s2716_s30 = scalar_lea.hbm %s3730_s0, 1024 }
  0x14   :  { %s16_s27 = sshll.u32 %s2791_s26, 4  ;;  %p2717_p8 = scmp.ne.s32.totalorder %s3730_s0, %s2716_s30  ;;  %s17_s27 = int_to_ptr.vmem [resolvable:$true] %s16_s27 }
  0x15   :  { %p2720_p9 = scmp.lt.u32.totalorder %s2716_s30, %s3730_s0 }
  0x17   :  { %p2722_p10 = pnand %p2720_p9, %p2717_p8 }
  0x19   :  { %2725 = shalt.err (!%p2722_p10)
}
  0x1a   :  { %s2726_s8 = scalar_lea.vmem %s17_s27, 1024  ;;  %p2731_p12 = scmp.lt.s32.totalorder %s17_s27, %s17_s27 }
  0x1b   :  { %p2727_p11 = scmp.ne.s32.totalorder %s17_s27, %s2726_s8  ;;  %p2732_p13 = scmp.lt.s32.totalorder %s2726_s8, %s2726_s8 }
  0x1d   :  { %p2733_p0 = por %p2732_p13, %p2731_p12 }
  0x1f   :  { %p2734_p1 = pnand %p2733_p0, %p2727_p11 }
  0x21   :  { %2737 = shalt.err (!%p2734_p1)
}
  0x22   :  { %s2792_s1 = smov 64   ;;  %s2793_s9 = smov 4  }
  0x23   :  { %22 = dma.hbm_to_vmem [thread:$0]  %s3730_s0, 1024, %s17_s27, [#allocation4], %s2792_s1, %s2792_s1, %s2793_s9  }
  0x24   :  { %s2794_s12 = smov [#allocation8]   ;;  %s2738_s16 = scalar_lea.hbm %s3732_s2, 4096 }
  0x25   :  { %s40_s13 = sshll.u32 %s2794_s12, 4  ;;  %p2739_p2 = scmp.ne.s32.totalorder %s3732_s2, %s2738_s16  ;;  %s41_s13 = int_to_ptr.vmem [resolvable:$true] %s40_s13 }
  0x26   :  { %p2742_p3 = scmp.lt.u32.totalorder %s2738_s16, %s3732_s2 }
  0x28   :  { %p2744_p4 = pnand %p2742_p3, %p2739_p2 }
  0x2a   :  { %2747 = shalt.err (!%p2744_p4)
}
  0x2b   :  { %s2748_s21 = scalar_lea.vmem %s41_s13, 4096  ;;  %p2753_p6 = scmp.lt.s32.totalorder %s41_s13, %s41_s13 }
  0x2c   :  { %p2749_p5 = scmp.ne.s32.totalorder %s41_s13, %s2748_s21  ;;  %p2754_p7 = scmp.lt.s32.totalorder %s2748_s21, %s2748_s21 }
  0x2e   :  { %p2755_p8 = por %p2754_p7, %p2753_p6 }
  0x30   :  { %p2756_p9 = pnand %p2755_p8, %p2749_p5 }
  0x32   :  { %2759 = shalt.err (!%p2756_p9)
}
  0x33   :  { %46 = dma.hbm_to_vmem [thread:$0]  %s3732_s2, 4096, %s41_s13, [#allocation7], %s2789_s22, %s2789_s22, %s2790_s23  }
  0x34   :  { %2782 = dma.done.wait [#allocation4], 1024  }
  0x35   :  { %2783 = vsyncadd [#allocation4], 4294966272 }
  0x36   :  { %2784 = dma.done.wait [#allocation7], 8192  }
  0x37   :  { %2785 = vsyncadd [#allocation7], 4294959104  ;;  %v3734_v0 = vmov 0   ;;  %v2864_v1 = vld [vmem:[#allocation8 + $0x4] ss:$16 sps:$4 sm:$0xff]   ;;  %v2796_v39 = vmov 0.0|0.0  }
  0x38   :  { %328 = vmatprep.mubr.bf16.mxu0 %v3734_v0  ;;  %371 = vmatprep.mubr.bf16.mxu1 %v3734_v0  ;;  %v2866_v2 = vld [vmem:[#allocation8 + $0xc] ss:$16 sps:$4 sm:$0xff]   ;;  %v2869_v3 = vld [vmem:[#allocation8] ss:$16 sps:$4 sm:$0xff]   ;;  %v2871_v4 = vld [vmem:[#allocation8 + $0x8] ss:$16 sps:$4 sm:$0xff]  }
  0x39   :  { %296 = vmatprep.subr.bf16.mxu0 %v2864_v1  ;;  %339 = vmatprep.subr.bf16.mxu1 %v2866_v2  ;;  %v2874_v5 = vld [vmem:[#allocation8 + $0x24] ss:$16 sps:$4 sm:$0xff]   ;;  %v2878_v6 = vld [vmem:[#allocation8 + $0x2c] ss:$16 sps:$4 sm:$0xff]   ;;  %v2880_v7 = vld [vmem:[#allocation8 + $0x20] ss:$16 sps:$4 sm:$0xff]  }
  0x3a   :  { %297 = vmatpush1.bf16.msra.mxu0 %v2869_v3  ;;  %340 = vmatpush1.bf16.msra.mxu1 %v2871_v4  ;;  %v2883_v8 = vld [vmem:[#allocation8 + $0x28] ss:$16 sps:$4 sm:$0xff]   ;;  %v2886_v9 = vld [vmem:[#allocation8 + $0x44] ss:$16 sps:$4 sm:$0xff]   ;;  %v2888_v10 = vld [vmem:[#allocation8 + $0x4c] ss:$16 sps:$4 sm:$0xff]  }
  0x3b   :  { %298 = vmatprep.subr.bf16.mxu0 %v2874_v5  ;;  %341 = vmatprep.subr.bf16.mxu1 %v2878_v6  ;;  %v2890_v11 = vld [vmem:[#allocation8 + $0x40] ss:$16 sps:$4 sm:$0xff]   ;;  %v2892_v12 = vld [vmem:[#allocation8 + $0x48] ss:$16 sps:$4 sm:$0xff]   ;;  %v2896_v13 = vld [vmem:[#allocation8 + $0x64] ss:$16 sps:$4 sm:$0xff]  }
  0x3c   :  { %3836 = vst [vmem:[#allocation13_spill] sm:$0xff] %v2890_v11  ;;  %3837 = vst [vmem:[#allocation14_spill] sm:$0xff] %v2892_v12  ;;  %v2900_v14 = vld [vmem:[#allocation8 + $0x6c] ss:$16 sps:$4 sm:$0xff]   ;;  %v2902_v15 = vld [vmem:[#allocation8 + $0x60] ss:$16 sps:$4 sm:$0xff]  }
  0x3d   :  { %3838 = vst [vmem:[#allocation15_spill] sm:$0xff] %v2896_v13  ;;  %3839 = vst [vmem:[#allocation16_spill] sm:$0xff] %v2900_v14  ;;  %v2906_v16 = vld [vmem:[#allocation8 + $0x68] ss:$16 sps:$4 sm:$0xff]   ;;  %v2908_v17 = vld [vmem:[#allocation8 + $0x84] ss:$16 sps:$4 sm:$0xff]  }
  0x3e   :  { %299 = vmatpush1.bf16.msra.mxu0 %v2880_v7  ;;  %342 = vmatpush1.bf16.msra.mxu1 %v2883_v8  ;;  %3840 = vst [vmem:[#allocation17_spill] sm:$0xff] %v2902_v15  ;;  %3841 = vst [vmem:[#allocation18_spill] sm:$0xff] %v2906_v16  ;;  %v2912_v18 = vld [vmem:[#allocation8 + $0x8c] ss:$16 sps:$4 sm:$0xff]   ;;  %v2914_v19 = vld [vmem:[#allocation8 + $0x80] ss:$16 sps:$4 sm:$0xff]  }
  0x3f   :  { %300 = vmatprep.subr.bf16.mxu0 %v2886_v9  ;;  %343 = vmatprep.subr.bf16.mxu1 %v2888_v10  ;;  %3842 = vst [vmem:[#allocation19_spill] sm:$0xff] %v2908_v17  ;;  %3843 = vst [vmem:[#allocation20_spill] sm:$0xff] %v2912_v18  ;;  %v2916_v20 = vld [vmem:[#allocation8 + $0x88] ss:$16 sps:$4 sm:$0xff]   ;;  %v2920_v21 = vld [vmem:[#allocation8 + $0xa4] ss:$16 sps:$4 sm:$0xff]  }
  0x40   :  { %3844 = vst [vmem:[#allocation21_spill] sm:$0xff] %v2914_v19  ;;  %3845 = vst [vmem:[#allocation22_spill] sm:$0xff] %v2916_v20  ;;  %v2924_v22 = vld [vmem:[#allocation8 + $0xac] ss:$16 sps:$4 sm:$0xff]   ;;  %v2926_v23 = vld [vmem:[#allocation8 + $0xa0] ss:$16 sps:$4 sm:$0xff]  }
  0x41   :  { %3846 = vst [vmem:[#allocation23_spill] sm:$0xff] %v2920_v21  ;;  %3847 = vst [vmem:[#allocation24_spill] sm:$0xff] %v2924_v22  ;;  %v2930_v24 = vld [vmem:[#allocation8 + $0xa8] ss:$16 sps:$4 sm:$0xff]   ;;  %v2932_v25 = vld [vmem:[#allocation8 + $0xc4] ss:$16 sps:$4 sm:$0xff]  }
  0x42   :  { %301 = vmatpush1.bf16.msra.mxu0 %v2890_v11  ;;  %344 = vmatpush1.bf16.msra.mxu1 %v2892_v12  ;;  %3848 = vst [vmem:[#allocation25_spill] sm:$0xff] %v2926_v23  ;;  %3849 = vst [vmem:[#allocation26_spill] sm:$0xff] %v2930_v24  ;;  %v2936_v26 = vld [vmem:[#allocation8 + $0xcc] ss:$16 sps:$4 sm:$0xff]   ;;  %v2938_v27 = vld [vmem:[#allocation8 + $0xc0] ss:$16 sps:$4 sm:$0xff]  }
  0x43   :  { %302 = vmatprep.subr.bf16.mxu0 %v2896_v13  ;;  %345 = vmatprep.subr.bf16.mxu1 %v2900_v14  ;;  %3850 = vst [vmem:[#allocation27_spill] sm:$0xff] %v2932_v25  ;;  %3851 = vst [vmem:[#allocation28_spill] sm:$0xff] %v2936_v26  ;;  %v2940_v28 = vld [vmem:[#allocation8 + $0xc8] ss:$16 sps:$4 sm:$0xff]   ;;  %v2944_v29 = vld [vmem:[#allocation8 + $0xe4] ss:$16 sps:$4 sm:$0xff]  }
  0x44   :  { %3852 = vst [vmem:[#allocation29_spill] sm:$0xff] %v2938_v27  ;;  %3853 = vst [vmem:[#allocation30_spill] sm:$0xff] %v2940_v28  ;;  %v2948_v30 = vld [vmem:[#allocation8 + $0xec] ss:$16 sps:$4 sm:$0xff]   ;;  %v2950_v31 = vld [vmem:[#allocation8 + $0xe0] ss:$16 sps:$4 sm:$0xff]  }
  0x45   :  { %3854 = vst [vmem:[#allocation31_spill] sm:$0xff] %v2944_v29  ;;  %3855 = vst [vmem:[#allocation32_spill] sm:$0xff] %v2948_v30  ;;  %v2954_v32 = vld [vmem:[#allocation8 + $0xe8] ss:$16 sps:$4 sm:$0xff]   ;;  %v2956_v33 = vld [vmem:[#allocation6 + $0x4] ss:$16 sps:$4 sm:$0xff]  }
  0x46   :  { %303 = vmatpush1.bf16.msra.mxu0 %v2902_v15  ;;  %346 = vmatpush1.bf16.msra.mxu1 %v2906_v16  ;;  %3856 = vst [vmem:[#allocation33_spill] sm:$0xff] %v2950_v31  ;;  %3857 = vst [vmem:[#allocation34_spill] sm:$0xff] %v2954_v32  ;;  %v2960_v34 = vld [vmem:[#allocation6 + $0xc] ss:$16 sps:$4 sm:$0xff]   ;;  %v2962_v35 = vld [vmem:[#allocation6] ss:$16 sps:$4 sm:$0xff]  }
  0x47   :  { %304 = vmatprep.subr.bf16.mxu0 %v2908_v17  ;;  %347 = vmatprep.subr.bf16.mxu1 %v2912_v18  ;;  %3858 = vst [vmem:[#allocation35_spill] sm:$0xff] %v2956_v33  ;;  %3859 = vst [vmem:[#allocation36_spill] sm:$0xff] %v2960_v34  ;;  %v2964_v36 = vld [vmem:[#allocation6 + $0x8] ss:$16 sps:$4 sm:$0xff]   ;;  %v2968_v37 = vld [vmem:[#allocation6 + $0x24] ss:$16 sps:$4 sm:$0xff]  }
  0x48   :  { %v2972_v38 = vld [vmem:[#allocation6 + $0x2c] ss:$16 sps:$4 sm:$0xff]   ;;  %v2974_v40 = vld [vmem:[#allocation6 + $0x20] ss:$16 sps:$4 sm:$0xff]   ;;  %v2978_v41 = vld [vmem:[#allocation6 + $0x28] ss:$16 sps:$4 sm:$0xff]  }
  0x49   :  { %v2980_v42 = vld [vmem:[#allocation6 + $0x44] ss:$16 sps:$4 sm:$0xff]   ;;  %v2984_v43 = vld [vmem:[#allocation6 + $0x4c] ss:$16 sps:$4 sm:$0xff]   ;;  %v2988_v44 = vld [vmem:[#allocation6 + $0x40] ss:$16 sps:$4 sm:$0xff]  }
  0x4a   :  { %305 = vmatpush1.bf16.msra.mxu0 %v2914_v19  ;;  %348 = vmatpush1.bf16.msra.mxu1 %v2916_v20  ;;  %v2990_v45 = vld [vmem:[#allocation6 + $0x48] ss:$16 sps:$4 sm:$0xff]   ;;  %v2994_v46 = vld [vmem:[#allocation6 + $0x64] ss:$16 sps:$4 sm:$0xff]   ;;  %v2998_v47 = vld [vmem:[#allocation6 + $0x6c] ss:$16 sps:$4 sm:$0xff]  }
  0x4b   :  { %306 = vmatprep.subr.bf16.mxu0 %v2920_v21  ;;  %349 = vmatprep.subr.bf16.mxu1 %v2924_v22  ;;  %v3000_v48 = vld [vmem:[#allocation6 + $0x60] ss:$16 sps:$4 sm:$0xff]   ;;  %v3002_v49 = vld [vmem:[#allocation6 + $0x68] ss:$16 sps:$4 sm:$0xff]   ;;  %v3004_v50 = vld [vmem:[#allocation6 + $0x84] ss:$16 sps:$4 sm:$0xff]  }
  0x4c   :  { %v3006_v51 = vld [vmem:[#allocation6 + $0x8c] ss:$16 sps:$4 sm:$0xff]   ;;  %v3014_v52 = vld [vmem:[#allocation6 + $0x80] ss:$16 sps:$4 sm:$0xff]   ;;  %v3016_v53 = vld [vmem:[#allocation6 + $0x88] ss:$16 sps:$4 sm:$0xff]  }
  0x4d   :  { %v3020_v54 = vld [vmem:[#allocation6 + $0xa4] ss:$16 sps:$4 sm:$0xff]   ;;  %v3022_v55 = vld [vmem:[#allocation6 + $0xac] ss:$16 sps:$4 sm:$0xff]   ;;  %v3026_v56 = vld [vmem:[#allocation6 + $0xa0] ss:$16 sps:$4 sm:$0xff]  }
  0x4e   :  { %307 = vmatpush1.bf16.msra.mxu0 %v2926_v23  ;;  %350 = vmatpush1.bf16.msra.mxu1 %v2930_v24  ;;  %v3028_v57 = vld [vmem:[#allocation6 + $0xa8] ss:$16 sps:$4 sm:$0xff]   ;;  %v3032_v58 = vld [vmem:[#allocation6 + $0xc4] ss:$16 sps:$4 sm:$0xff]   ;;  %v3034_v59 = vld [vmem:[#allocation6 + $0xcc] ss:$16 sps:$4 sm:$0xff]  }
  0x4f   :  { %308 = vmatprep.subr.bf16.mxu0 %v2932_v25  ;;  %351 = vmatprep.subr.bf16.mxu1 %v2936_v26  ;;  %3860 = vst [vmem:[#allocation37_spill] sm:$0xff] %v3028_v57  ;;  %v3038_v60 = vld [vmem:[#allocation6 + $0xc0] ss:$16 sps:$4 sm:$0xff]   ;;  %v3040_v61 = vld [vmem:[#allocation6 + $0xc8] ss:$16 sps:$4 sm:$0xff]   ;;  %s2797_s2 = smov [#allocation9]  }
  0x50   :  { %v3044_v62 = vld [vmem:[#allocation6 + $0xe4] ss:$16 sps:$4 sm:$0xff]   ;;  %v3046_v63 = vld [vmem:[#allocation6 + $0xec] ss:$16 sps:$4 sm:$0xff]   ;;  %s2205_s22 = sshll.u32 %s2797_s2, 4  ;;  %s2206_s22 = int_to_ptr.vmem [resolvable:$true] %s2205_s22 }
  0x51   :  { %3861 = vst [vmem:[#allocation38_spill] sm:$0xff] %v3046_v63  ;;  %s2760_s23 = scalar_lea.vmem %s2206_s22, 256  ;;  %p2765_p11 = scmp.lt.s32.totalorder %s2206_s22, %s2206_s22 }
  0x52   :  { %309 = vmatpush1.bf16.msra.mxu0 %v2938_v27  ;;  %352 = vmatpush1.bf16.msra.mxu1 %v2940_v28  ;;  %p2761_p10 = scmp.ne.s32.totalorder %s2206_s22, %s2760_s23  ;;  %p2766_p12 = scmp.lt.s32.totalorder %s2760_s23, %s2760_s23 }
  0x53   :  { %310 = vmatprep.subr.bf16.mxu0 %v2944_v29  ;;  %353 = vmatprep.subr.bf16.mxu1 %v2948_v30 }
  0x54   :  { %p2767_p13 = por %p2766_p12, %p2765_p11 }
  0x56   :  { %311 = vmatpush1.bf16.msra.mxu0 %v2950_v31  ;;  %354 = vmatpush1.bf16.msra.mxu1 %v2954_v32  ;;  %p2768_p0 = pnand %p2767_p13, %p2761_p10 }
  0x57   :  { %548 = vmatprep.subr.bf16.mxu0 %v2956_v33  ;;  %591 = vmatprep.subr.bf16.mxu1 %v2960_v34 }
  0x59   :  { %329 = vmatmul.mubr.bf16.vlgmr.msra.gmra.mrb[0].mxu0 %v2796_v39  ;;  %372 = vmatmul.mubr.bf16.vlgmr.msra.gmra.mrb[0].mxu1 %v2796_v39  ;;  %v3050_v39 = vld [vmem:[#allocation6 + $0xe0] ss:$16 sps:$4 sm:$0xff]  }
  0x5a   :  { %549 = vmatpush1.bf16.msra.mxu0 %v2962_v35  ;;  %592 = vmatpush1.bf16.msra.mxu1 %v2964_v36 }
  0x5b   :  { %550 = vmatprep.subr.bf16.mxu0 %v2968_v37  ;;  %593 = vmatprep.subr.bf16.mxu1 %v2972_v38 }
  0x5c   :  { %580 = vmatprep.mubr.bf16.mxu0 %v3734_v0  ;;  %623 = vmatprep.mubr.bf16.mxu1 %v3734_v0  ;;  %v3052_v0 = vld [vmem:[#allocation6 + $0xe8] ss:$16 sps:$4 sm:$0xff]  }
  0x5e   :  { %551 = vmatpush1.bf16.msra.mxu0 %v2974_v40  ;;  %594 = vmatpush1.bf16.msra.mxu1 %v2978_v41 }
  0x5f   :  { %552 = vmatprep.subr.bf16.mxu0 %v2980_v42  ;;  %595 = vmatprep.subr.bf16.mxu1 %v2984_v43 }
  0x62   :  { %553 = vmatpush1.bf16.msra.mxu0 %v2988_v44  ;;  %596 = vmatpush1.bf16.msra.mxu1 %v2990_v45 }
  0x63   :  { %554 = vmatprep.subr.bf16.mxu0 %v2994_v46  ;;  %597 = vmatprep.subr.bf16.mxu1 %v2998_v47 }
  0x66   :  { %555 = vmatpush1.bf16.msra.mxu0 %v3000_v48  ;;  %598 = vmatpush1.bf16.msra.mxu1 %v3002_v49 }
  0x67   :  { %556 = vmatprep.subr.bf16.mxu0 %v3004_v50  ;;  %599 = vmatprep.subr.bf16.mxu1 %v3006_v51 }
  0x6a   :  { %557 = vmatpush1.bf16.msra.mxu0 %v3014_v52  ;;  %600 = vmatpush1.bf16.msra.mxu1 %v3016_v53 }
  0x6b   :  { %558 = vmatprep.subr.bf16.mxu0 %v3020_v54  ;;  %601 = vmatprep.subr.bf16.mxu1 %v3022_v55 }
  0x6e   :  { %559 = vmatpush1.bf16.msra.mxu0 %v3026_v56  ;;  %602 = vmatpush1.bf16.msra.mxu1 %v3028_v57  ;;  %v2462_v57 = vld [vmem:[#allocation3] sm:$0xff]  }
  0x6f   :  { %560 = vmatprep.subr.bf16.mxu0 %v3032_v58  ;;  %603 = vmatprep.subr.bf16.mxu1 %v3034_v59 }
  0x72   :  { %561 = vmatpush1.bf16.msra.mxu0 %v3038_v60  ;;  %604 = vmatpush1.bf16.msra.mxu1 %v3040_v61 }
  0x73   :  { %562 = vmatprep.subr.bf16.mxu0 %v3044_v62  ;;  %605 = vmatprep.subr.bf16.mxu1 %v3046_v63  ;;  %v3862_v63 = vmov 0  }
  0x76   :  { %563 = vmatpush1.bf16.msra.mxu0 %v3050_v39  ;;  %606 = vmatpush1.bf16.msra.mxu1 %v3052_v0 }
  0x77   :  { %674 = vmatprep.subr.bf16.mxu0 %v2864_v1  ;;  %717 = vmatprep.subr.bf16.mxu1 %v2866_v2 }
  0x79   :  { %581 = vmatmul.mubr.bf16.vlgmr.msra.gmra.mrb[0].mxu0 %v2462_v57  ;;  %624 = vmatmul.mubr.bf16.vlgmr.msra.gmra.mrb[0].mxu1 %v2462_v57 }
  0x7a   :  { %675 = vmatpush1.bf16.msra.mxu0 %v2869_v3  ;;  %718 = vmatpush1.bf16.msra.mxu1 %v2871_v4 }
  0x7b   :  { %676 = vmatprep.subr.bf16.mxu0 %v2874_v5  ;;  %719 = vmatprep.subr.bf16.mxu1 %v2878_v6 }
  0x7c   :  { %706 = vmatprep.mubr.bf16.mxu0 %v3862_v63  ;;  %749 = vmatprep.mubr.bf16.mxu1 %v3862_v63 }
  0x7e   :  { %677 = vmatpush1.bf16.msra.mxu0 %v2880_v7  ;;  %720 = vmatpush1.bf16.msra.mxu1 %v2883_v8 }
  0x7f   :  { %678 = vmatprep.subr.bf16.mxu0 %v2886_v9  ;;  %721 = vmatprep.subr.bf16.mxu1 %v2888_v10 }
  0x82   :  { %679 = vmatpush1.bf16.msra.mxu0 %v2890_v11  ;;  %722 = vmatpush1.bf16.msra.mxu1 %v2892_v12 }
  0x83   :  { %680 = vmatprep.subr.bf16.mxu0 %v2896_v13  ;;  %723 = vmatprep.subr.bf16.mxu1 %v2900_v14 }
  0x86   :  { %681 = vmatpush1.bf16.msra.mxu0 %v2902_v15  ;;  %724 = vmatpush1.bf16.msra.mxu1 %v2906_v16 }
  0x87   :  { %682 = vmatprep.subr.bf16.mxu0 %v2908_v17  ;;  %725 = vmatprep.subr.bf16.mxu1 %v2912_v18 }
  0x8a   :  { %683 = vmatpush1.bf16.msra.mxu0 %v2914_v19  ;;  %726 = vmatpush1.bf16.msra.mxu1 %v2916_v20 }
  0x8b   :  { %684 = vmatprep.subr.bf16.mxu0 %v2920_v21  ;;  %727 = vmatprep.subr.bf16.mxu1 %v2924_v22 }
  0x8e   :  { %685 = vmatpush1.bf16.msra.mxu0 %v2926_v23  ;;  %728 = vmatpush1.bf16.msra.mxu1 %v2930_v24 }
  0x8f   :  { %686 = vmatprep.subr.bf16.mxu0 %v2932_v25  ;;  %729 = vmatprep.subr.bf16.mxu1 %v2936_v26 }
  0x92   :  { %687 = vmatpush1.bf16.msra.mxu0 %v2938_v27  ;;  %730 = vmatpush1.bf16.msra.mxu1 %v2940_v28 }
  0x93   :  { %688 = vmatprep.subr.bf16.mxu0 %v2944_v29  ;;  %731 = vmatprep.subr.bf16.mxu1 %v2948_v30 }
  0x96   :  { %689 = vmatpush1.bf16.msra.mxu0 %v2950_v31  ;;  %732 = vmatpush1.bf16.msra.mxu1 %v2954_v32 }
  0x97   :  { %766 = vmatprep.subr.bf16.mxu0 %v2956_v33  ;;  %809 = vmatprep.subr.bf16.mxu1 %v2960_v34 }
 0x14c   :  { %v582_v57 = vpop.f32.mrb[0].mxu0  ;;  %v625_v25 = vpop.f32.mrb[0].mxu1 }
 0x14d   :  { %v634_v24 = vmul.f32 0.5, %v582_v57  ;;  %v584_v26 = vpop.f32.mrb[1].mxu0  ;;  %v627_v23 = vpop.f32.mrb[1].mxu1  ;;  %v636_v32 = vmul.f32 0.5, %v625_v25 }
 0x14e   :  { %v635_v27 = vmul.f32 0.5, %v584_v26  ;;  %v586_v22 = vpop.f32.mrb[2].mxu0  ;;  %v629_v28 = vpop.f32.mrb[2].mxu1 }
 0x14f   :  { %2470 = vtanh.f32 %v634_v24  ;;  %v637_v29 = vmul.f32 0.5, %v586_v22  ;;  %v588_v21 = vpop.f32.mrb[3].mxu0  ;;  %v631_v30 = vpop.f32.mrb[3].mxu1  ;;  %v639_v57 = vmul.f32 0.5, %v629_v28 }
 0x150   :  { %v638_v20 = vmul.f32 0.5, %v588_v21  ;;  %2472 = vtanh.f32 %v635_v27 }
 0x151   :  { %2474 = vtanh.f32 %v637_v29 }
 0x152   :  { %2476 = vtanh.f32 %v627_v23 }
 0x153   :  { %2478 = vtanh.f32 %v638_v20 }
 0x154   :  { %2480 = vtanh.f32 %v631_v30 }
 0x155   :  { %2482 = vtanh.f32 %v636_v32 }
 0x156   :  { %2484 = vtanh.f32 %v639_v57 }
 0x159   :  { %v2471_v33 = vpop.eup %2470 }
 0x15a   :  { %v646_v34 = vadd.f32 1.0, %v2471_v33  ;;  %v2473_v31 = vpop.eup %2472 }
 0x15b   :  { %v2475_v19 = vpop.eup %2474  ;;  %v647_v26 = vadd.f32 1.0, %v2473_v31 }
 0x15c   :  { %v652_v18 = vmul.f32 0.5, %v646_v34  ;;  %v2477_v17 = vpop.eup %2476  ;;  %v649_v16 = vadd.f32 1.0, %v2475_v19 }
 0x15d   :  { %v2479_v24 = vpop.eup %2478  ;;  %v653_v22 = vmul.f32 0.5, %v647_v26 }
 0x15e   :  { %v662_v15 = vmul.f32 %v2477_v17, %v652_v18  ;;  %v655_v21 = vmul.f32 0.5, %v649_v16  ;;  %v650_v27 = vadd.f32 1.0, %v2479_v24  ;;  %v2481_v23 = vpop.eup %2480 }
 0x15f   :  { %v660_v20 = vmul.f32 0.0, %v653_v22  ;;  %v2483_v19 = vpop.eup %2482 }
 0x160   :  { %v656_v29 = vmul.f32 0.5, %v650_v27  ;;  %v663_v30 = vmul.f32 %v2481_v23, %v655_v21  ;;  %v2485_v31 = vpop.eup %2484  ;;  %v648_v32 = vadd.f32 1.0, %v2483_v19  ;;  %v3864_v21 = vld [vmem:[#allocation38_spill] sm:$0xff]  ;;  %v2463_v27 = vld [vmem:[#allocation3 + $0x8] sm:$0xff]   ;;  %v3865_v23 = vld [vmem:[#allocation17_spill] sm:$0xff] }
 0x161   :  { %v3094_v33 = vadd.f32 %v662_v15, %v660_v20  ;;  %v651_v17 = vadd.f32 1.0, %v2485_v31  ;;  %v3863_v15 = vld [vmem:[#allocation37_spill] sm:$0xff]  ;;  %v3866_v20 = vld [vmem:[#allocation18_spill] sm:$0xff]  ;;  %v3871_v31 = vld [vmem:[#allocation23_spill] sm:$0xff] }
 0x162   :  { %v661_v25 = vmul.f32 0.0, %v656_v29  ;;  %v654_v18 = vmul.f32 0.5, %v648_v32  ;;  %v3867_v29 = vld [vmem:[#allocation19_spill] sm:$0xff]  ;;  %v3870_v19 = vld [vmem:[#allocation22_spill] sm:$0xff]  ;;  %v3872_v32 = vld [vmem:[#allocation24_spill] sm:$0xff] }
 0x163   :  { %2486 = vtanh.f32 %v3094_v33  ;;  %v657_v34 = vmul.f32 0.5, %v651_v17  ;;  %v3873_v17 = vld [vmem:[#allocation25_spill] sm:$0xff] }
 0x164   :  { %v3097_v28 = vadd.f32 %v663_v30, %v661_v25  ;;  %v3868_v30 = vld [vmem:[#allocation20_spill] sm:$0xff]  ;;  %v3869_v25 = vld [vmem:[#allocation21_spill] sm:$0xff] }
 0x166   :  { %2488 = vtanh.f32 %v3097_v28 }
 0x16d   :  { %v2487_v16 = vpop.eup %2486 }
 0x16e   :  { %v668_v26 = vmul.f32 %v2487_v16, %v654_v18  ;;  %v3874_v16 = vld [vmem:[#allocation26_spill] sm:$0xff]  ;;  %v3875_v18 = vld [vmem:[#allocation27_spill] sm:$0xff] }
 0x170   :  { %v2489_v57 = vpop.eup %2488 }
 0x171   :  { %v669_v24 = vmul.f32 %v2489_v57, %v657_v34  ;;  %v3876_v34 = vld [vmem:[#allocation28_spill] sm:$0xff]  ;;  %v3877_v57 = vld [vmem:[#allocation29_spill] sm:$0xff] }
 0x173   :  { %v673_v22 = vpack.c.bf16 %v669_v24, %v668_v26  ;;  %v3878_v26 = vld [vmem:[#allocation30_spill] sm:$0xff]  ;;  %v3879_v24 = vld [vmem:[#allocation31_spill] sm:$0xff] }
 0x175   :  { %707 = vmatmul.mubr.bf16.vlgmr.msra.gmra.mrb[4].mxu0 %v673_v22  ;;  %750 = vmatmul.mubr.bf16.vlgmr.msra.gmra.mrb[4].mxu1 %v673_v22  ;;  %v3880_v22 = vld [vmem:[#allocation32_spill] sm:$0xff] }
 0x176   :  { %767 = vmatpush1.bf16.msra.mxu0 %v2962_v35  ;;  %810 = vmatpush1.bf16.msra.mxu1 %v2964_v36 }
 0x177   :  { %768 = vmatprep.subr.bf16.mxu0 %v2968_v37  ;;  %811 = vmatprep.subr.bf16.mxu1 %v2972_v38 }
 0x178   :  { %798 = vmatprep.mubr.bf16.mxu0 %v3862_v63  ;;  %841 = vmatprep.mubr.bf16.mxu1 %v3862_v63 }
 0x17a   :  { %769 = vmatpush1.bf16.msra.mxu0 %v2974_v40  ;;  %812 = vmatpush1.bf16.msra.mxu1 %v2978_v41 }
 0x17b   :  { %770 = vmatprep.subr.bf16.mxu0 %v2980_v42  ;;  %813 = vmatprep.subr.bf16.mxu1 %v2984_v43 }
 0x17e   :  { %771 = vmatpush1.bf16.msra.mxu0 %v2988_v44  ;;  %814 = vmatpush1.bf16.msra.mxu1 %v2990_v45 }
 0x17f   :  { %772 = vmatprep.subr.bf16.mxu0 %v2994_v46  ;;  %815 = vmatprep.subr.bf16.mxu1 %v2998_v47 }
 0x182   :  { %773 = vmatpush1.bf16.msra.mxu0 %v3000_v48  ;;  %816 = vmatpush1.bf16.msra.mxu1 %v3002_v49 }
 0x183   :  { %774 = vmatprep.subr.bf16.mxu0 %v3004_v50  ;;  %817 = vmatprep.subr.bf16.mxu1 %v3006_v51 }
 0x186   :  { %775 = vmatpush1.bf16.msra.mxu0 %v3014_v52  ;;  %818 = vmatpush1.bf16.msra.mxu1 %v3016_v53 }
 0x187   :  { %776 = vmatprep.subr.bf16.mxu0 %v3020_v54  ;;  %819 = vmatprep.subr.bf16.mxu1 %v3022_v55 }
 0x18a   :  { %777 = vmatpush1.bf16.msra.mxu0 %v3026_v56  ;;  %820 = vmatpush1.bf16.msra.mxu1 %v3863_v15 }
 0x18b   :  { %778 = vmatprep.subr.bf16.mxu0 %v3032_v58  ;;  %821 = vmatprep.subr.bf16.mxu1 %v3034_v59 }
 0x18e   :  { %779 = vmatpush1.bf16.msra.mxu0 %v3038_v60  ;;  %822 = vmatpush1.bf16.msra.mxu1 %v3040_v61 }
 0x18f   :  { %780 = vmatprep.subr.bf16.mxu0 %v3044_v62  ;;  %823 = vmatprep.subr.bf16.mxu1 %v3864_v21 }
 0x192   :  { %781 = vmatpush1.bf16.msra.mxu0 %v3050_v39  ;;  %824 = vmatpush1.bf16.msra.mxu1 %v3052_v0 }
 0x193   :  { %892 = vmatprep.subr.bf16.mxu0 %v2864_v1  ;;  %935 = vmatprep.subr.bf16.mxu1 %v2866_v2 }
 0x195   :  { %799 = vmatmul.mubr.bf16.vlgmr.msra.gmra.mrb[4].mxu0 %v2463_v27  ;;  %842 = vmatmul.mubr.bf16.vlgmr.msra.gmra.mrb[4].mxu1 %v2463_v27  ;;  %v3881_v27 = vld [vmem:[#allocation33_spill] sm:$0xff] }
 0x196   :  { %893 = vmatpush1.bf16.msra.mxu0 %v2869_v3  ;;  %936 = vmatpush1.bf16.msra.mxu1 %v2871_v4 }
 0x197   :  { %894 = vmatprep.subr.bf16.mxu0 %v2874_v5  ;;  %937 = vmatprep.subr.bf16.mxu1 %v2878_v6 }
 0x198   :  { %924 = vmatprep.mubr.bf16.mxu0 %v3862_v63  ;;  %967 = vmatprep.mubr.bf16.mxu1 %v3862_v63 }
 0x19a   :  { %895 = vmatpush1.bf16.msra.mxu0 %v2880_v7  ;;  %938 = vmatpush1.bf16.msra.mxu1 %v2883_v8 }
 0x19b   :  { %896 = vmatprep.subr.bf16.mxu0 %v2886_v9  ;;  %939 = vmatprep.subr.bf16.mxu1 %v2888_v10 }
 0x19e   :  { %897 = vmatpush1.bf16.msra.mxu0 %v2890_v11  ;;  %940 = vmatpush1.bf16.msra.mxu1 %v2892_v12 }
 0x19f   :  { %898 = vmatprep.subr.bf16.mxu0 %v2896_v13  ;;  %941 = vmatprep.subr.bf16.mxu1 %v2900_v14 }
 0x1a2   :  { %899 = vmatpush1.bf16.msra.mxu0 %v3865_v23  ;;  %942 = vmatpush1.bf16.msra.mxu1 %v3866_v20 }
 0x1a3   :  { %900 = vmatprep.subr.bf16.mxu0 %v3867_v29  ;;  %943 = vmatprep.subr.bf16.mxu1 %v3868_v30 }
 0x1a6   :  { %901 = vmatpush1.bf16.msra.mxu0 %v3869_v25  ;;  %944 = vmatpush1.bf16.msra.mxu1 %v3870_v19 }
 0x1a7   :  { %902 = vmatprep.subr.bf16.mxu0 %v3871_v31  ;;  %945 = vmatprep.subr.bf16.mxu1 %v3872_v32  ;;  %v3882_v31 = vld [vmem:[#allocation34_spill] sm:$0xff]  ;;  %v3883_v32 = vld [vmem:[#allocation35_spill] sm:$0xff] }
 0x1aa   :  { %903 = vmatpush1.bf16.msra.mxu0 %v3873_v17  ;;  %946 = vmatpush1.bf16.msra.mxu1 %v3874_v16  ;;  %v3884_v17 = vld [vmem:[#allocation36_spill] sm:$0xff] }
 0x1ab   :  { %904 = vmatprep.subr.bf16.mxu0 %v3875_v18  ;;  %947 = vmatprep.subr.bf16.mxu1 %v3876_v34 }
 0x1ae   :  { %905 = vmatpush1.bf16.msra.mxu0 %v3877_v57  ;;  %948 = vmatpush1.bf16.msra.mxu1 %v3878_v26 }
 0x1af   :  { %906 = vmatprep.subr.bf16.mxu0 %v3879_v24  ;;  %949 = vmatprep.subr.bf16.mxu1 %v3880_v22 }
 0x1b2   :  { %907 = vmatpush1.bf16.msra.mxu0 %v3881_v27  ;;  %950 = vmatpush1.bf16.msra.mxu1 %v3882_v31 }
 0x1b3   :  { %984 = vmatprep.subr.bf16.mxu0 %v3883_v32  ;;  %1027 = vmatprep.subr.bf16.mxu1 %v3884_v17 }
 0x268   :  { %v800_v16 = vpop.f32.mrb[4].mxu0  ;;  %v843_v18 = vpop.f32.mrb[4].mxu1 }
 0x269   :  { %v852_v19 = vmul.f32 0.5, %v800_v16  ;;  %v802_v34 = vpop.f32.mrb[5].mxu0  ;;  %v845_v25 = vpop.f32.mrb[5].mxu1  ;;  %v854_v31 = vmul.f32 0.5, %v843_v18 }
 0x26a   :  { %v853_v57 = vmul.f32 0.5, %v802_v34  ;;  %v804_v30 = vpop.f32.mrb[6].mxu0  ;;  %v847_v26 = vpop.f32.mrb[6].mxu1 }
 0x26b   :  { %2490 = vtanh.f32 %v852_v19  ;;  %v855_v24 = vmul.f32 0.5, %v804_v30  ;;  %v806_v29 = vpop.f32.mrb[7].mxu0  ;;  %v849_v22 = vpop.f32.mrb[7].mxu1  ;;  %v857_v16 = vmul.f32 0.5, %v847_v26 }
 0x26c   :  { %v856_v20 = vmul.f32 0.5, %v806_v29  ;;  %2492 = vtanh.f32 %v853_v57 }
 0x26d   :  { %2494 = vtanh.f32 %v855_v24 }
 0x26e   :  { %2496 = vtanh.f32 %v845_v25 }
 0x26f   :  { %2498 = vtanh.f32 %v856_v20 }
 0x270   :  { %2500 = vtanh.f32 %v849_v22 }
 0x271   :  { %2502 = vtanh.f32 %v854_v31 }
 0x272   :  { %2504 = vtanh.f32 %v857_v16 }
 0x275   :  { %v2491_v32 = vpop.eup %2490 }
 0x276   :  { %v864_v17 = vadd.f32 1.0, %v2491_v32  ;;  %v2493_v27 = vpop.eup %2492 }
 0x277   :  { %v2495_v23 = vpop.eup %2494  ;;  %v865_v34 = vadd.f32 1.0, %v2493_v27 }
 0x278   :  { %v870_v14 = vmul.f32 0.5, %v864_v17  ;;  %v2497_v13 = vpop.eup %2496  ;;  %v867_v12 = vadd.f32 1.0, %v2495_v23 }
 0x279   :  { %v2499_v19 = vpop.eup %2498  ;;  %v871_v30 = vmul.f32 0.5, %v865_v34 }
 0x27a   :  { %v880_v11 = vmul.f32 %v2497_v13, %v870_v14  ;;  %v873_v29 = vmul.f32 0.5, %v867_v12  ;;  %v868_v57 = vadd.f32 1.0, %v2499_v19  ;;  %v2501_v25 = vpop.eup %2500  ;;  %v3891_v19 = vld [vmem:[#allocation19_spill] sm:$0xff] }
 0x27b   :  { %v878_v20 = vmul.f32 %v871_v30, %v3094_v33  ;;  %v2503_v23 = vpop.eup %2502  ;;  %v3896_v30 = vld [vmem:[#allocation24_spill] sm:$0xff] }
 0x27c   :  { %v874_v24 = vmul.f32 0.5, %v868_v57  ;;  %v881_v32 = vmul.f32 %v2501_v25, %v873_v29  ;;  %v2505_v13 = vpop.eup %2504  ;;  %v866_v12 = vadd.f32 1.0, %v2503_v23  ;;  %v3897_v29 = vld [vmem:[#allocation25_spill] sm:$0xff]  ;;  %v3898_v57 = vld [vmem:[#allocation26_spill] sm:$0xff]  ;;  %v3899_v25 = vld [vmem:[#allocation27_spill] sm:$0xff] }
 0x27d   :  { %v3169_v18 = vadd.f32 %v880_v11, %v878_v20  ;;  %v869_v14 = vadd.f32 1.0, %v2505_v13  ;;  %v3900_v20 = vld [vmem:[#allocation28_spill] sm:$0xff]  ;;  %v3905_v13 = vld [vmem:[#allocation33_spill] sm:$0xff] }
 0x27e   :  { %v879_v26 = vmul.f32 %v874_v24, %v3097_v28  ;;  %v872_v22 = vmul.f32 0.5, %v866_v12  ;;  %v2464_v28 = vld [vmem:[#allocation3 + $0x10] sm:$0xff]   ;;  %v3904_v23 = vld [vmem:[#allocation32_spill] sm:$0xff]  ;;  %v3906_v12 = vld [vmem:[#allocation34_spill] sm:$0xff] }
 0x27f   :  { %2506 = vtanh.f32 %v3169_v18  ;;  %v875_v27 = vmul.f32 0.5, %v869_v14  ;;  %v3901_v24 = vld [vmem:[#allocation29_spill] sm:$0xff]  ;;  %v3907_v14 = vld [vmem:[#allocation35_spill] sm:$0xff] }
 0x280   :  { %v3173_v17 = vadd.f32 %v881_v32, %v879_v26  ;;  %v3902_v32 = vld [vmem:[#allocation30_spill] sm:$0xff]  ;;  %v3903_v26 = vld [vmem:[#allocation31_spill] sm:$0xff] }
 0x282   :  { %2508 = vtanh.f32 %v3173_v17 }
 0x289   :  { %v2507_v31 = vpop.eup %2506 }
 0x28a   :  { %v886_v16 = vmul.f32 %v2507_v31, %v872_v22  ;;  %v3908_v31 = vld [vmem:[#allocation36_spill] sm:$0xff] }
 0x28c   :  { %v2509_v33 = vpop.eup %2508 }
 0x28d   :  { %v887_v34 = vmul.f32 %v2509_v33, %v875_v27 }
 0x28f   :  { %v891_v11 = vpack.c.bf16 %v887_v34, %v886_v16 }
 0x291   :  { %925 = vmatmul.mubr.bf16.vlgmr.msra.gmra.mrb[8].mxu0 %v891_v11  ;;  %968 = vmatmul.mubr.bf16.vlgmr.msra.gmra.mrb[8].mxu1 %v891_v11 }
 0x292   :  { %985 = vmatpush1.bf16.msra.mxu0 %v2962_v35  ;;  %1028 = vmatpush1.bf16.msra.mxu1 %v2964_v36 }
 0x293   :  { %986 = vmatprep.subr.bf16.mxu0 %v2968_v37  ;;  %1029 = vmatprep.subr.bf16.mxu1 %v2972_v38 }
 0x294   :  { %1016 = vmatprep.mubr.bf16.mxu0 %v3862_v63  ;;  %1059 = vmatprep.mubr.bf16.mxu1 %v3862_v63 }
 0x296   :  { %987 = vmatpush1.bf16.msra.mxu0 %v2974_v40  ;;  %1030 = vmatpush1.bf16.msra.mxu1 %v2978_v41 }
 0x297   :  { %988 = vmatprep.subr.bf16.mxu0 %v2980_v42  ;;  %1031 = vmatprep.subr.bf16.mxu1 %v2984_v43 }
 0x29a   :  { %989 = vmatpush1.bf16.msra.mxu0 %v2988_v44  ;;  %1032 = vmatpush1.bf16.msra.mxu1 %v2990_v45 }
 0x29b   :  { %990 = vmatprep.subr.bf16.mxu0 %v2994_v46  ;;  %1033 = vmatprep.subr.bf16.mxu1 %v2998_v47 }
 0x29e   :  { %991 = vmatpush1.bf16.msra.mxu0 %v3000_v48  ;;  %1034 = vmatpush1.bf16.msra.mxu1 %v3002_v49 }
 0x29f   :  { %992 = vmatprep.subr.bf16.mxu0 %v3004_v50  ;;  %1035 = vmatprep.subr.bf16.mxu1 %v3006_v51 }
 0x2a2   :  { %993 = vmatpush1.bf16.msra.mxu0 %v3014_v52  ;;  %1036 = vmatpush1.bf16.msra.mxu1 %v3016_v53 }
 0x2a3   :  { %994 = vmatprep.subr.bf16.mxu0 %v3020_v54  ;;  %1037 = vmatprep.subr.bf16.mxu1 %v3022_v55 }
 0x2a6   :  { %995 = vmatpush1.bf16.msra.mxu0 %v3026_v56  ;;  %1038 = vmatpush1.bf16.msra.mxu1 %v3863_v15 }
 0x2a7   :  { %996 = vmatprep.subr.bf16.mxu0 %v3032_v58  ;;  %1039 = vmatprep.subr.bf16.mxu1 %v3034_v59 }
 0x2aa   :  { %997 = vmatpush1.bf16.msra.mxu0 %v3038_v60  ;;  %1040 = vmatpush1.bf16.msra.mxu1 %v3040_v61 }
 0x2ab   :  { %998 = vmatprep.subr.bf16.mxu0 %v3044_v62  ;;  %1041 = vmatprep.subr.bf16.mxu1 %v3864_v21 }
 0x2ae   :  { %999 = vmatpush1.bf16.msra.mxu0 %v3050_v39  ;;  %1042 = vmatpush1.bf16.msra.mxu1 %v3052_v0 }
 0x2af   :  { %1110 = vmatprep.subr.bf16.mxu0 %v2864_v1  ;;  %1153 = vmatprep.subr.bf16.mxu1 %v2866_v2  ;;  %v3885_v1 = vld [vmem:[#allocation13_spill] sm:$0xff]  ;;  %v3886_v2 = vld [vmem:[#allocation14_spill] sm:$0xff] }
 0x2b1   :  { %1017 = vmatmul.mubr.bf16.vlgmr.msra.gmra.mrb[8].mxu0 %v2464_v28  ;;  %1060 = vmatmul.mubr.bf16.vlgmr.msra.gmra.mrb[8].mxu1 %v2464_v28 }
 0x2b2   :  { %1111 = vmatpush1.bf16.msra.mxu0 %v2869_v3  ;;  %1154 = vmatpush1.bf16.msra.mxu1 %v2871_v4  ;;  %v3887_v3 = vld [vmem:[#allocation15_spill] sm:$0xff]  ;;  %v3888_v4 = vld [vmem:[#allocation16_spill] sm:$0xff] }
 0x2b3   :  { %1112 = vmatprep.subr.bf16.mxu0 %v2874_v5  ;;  %1155 = vmatprep.subr.bf16.mxu1 %v2878_v6  ;;  %v3889_v5 = vld [vmem:[#allocation17_spill] sm:$0xff]  ;;  %v3890_v6 = vld [vmem:[#allocation18_spill] sm:$0xff] }
 0x2b4   :  { %1142 = vmatprep.mubr.bf16.mxu0 %v3862_v63  ;;  %1185 = vmatprep.mubr.bf16.mxu1 %v3862_v63 }
 0x2b6   :  { %1113 = vmatpush1.bf16.msra.mxu0 %v2880_v7  ;;  %1156 = vmatpush1.bf16.msra.mxu1 %v2883_v8  ;;  %v3892_v7 = vld [vmem:[#allocation20_spill] sm:$0xff]  ;;  %v3893_v8 = vld [vmem:[#allocation21_spill] sm:$0xff] }
 0x2b7   :  { %1114 = vmatprep.subr.bf16.mxu0 %v2886_v9  ;;  %1157 = vmatprep.subr.bf16.mxu1 %v2888_v10  ;;  %v3894_v9 = vld [vmem:[#allocation22_spill] sm:$0xff]  ;;  %v3895_v10 = vld [vmem:[#allocation23_spill] sm:$0xff] }
 0x2ba   :  { %1115 = vmatpush1.bf16.msra.mxu0 %v3885_v1  ;;  %1158 = vmatpush1.bf16.msra.mxu1 %v3886_v2 }
 0x2bb   :  { %1116 = vmatprep.subr.bf16.mxu0 %v3887_v3  ;;  %1159 = vmatprep.subr.bf16.mxu1 %v3888_v4 }
 0x2be   :  { %1117 = vmatpush1.bf16.msra.mxu0 %v3889_v5  ;;  %1160 = vmatpush1.bf16.msra.mxu1 %v3890_v6 }
 0x2bf   :  { %1118 = vmatprep.subr.bf16.mxu0 %v3891_v19  ;;  %1161 = vmatprep.subr.bf16.mxu1 %v3892_v7 }
 0x2c2   :  { %1119 = vmatpush1.bf16.msra.mxu0 %v3893_v8  ;;  %1162 = vmatpush1.bf16.msra.mxu1 %v3894_v9 }
 0x2c3   :  { %1120 = vmatprep.subr.bf16.mxu0 %v3895_v10  ;;  %1163 = vmatprep.subr.bf16.mxu1 %v3896_v30 }
 0x2c6   :  { %1121 = vmatpush1.bf16.msra.mxu0 %v3897_v29  ;;  %1164 = vmatpush1.bf16.msra.mxu1 %v3898_v57 }
 0x2c7   :  { %1122 = vmatprep.subr.bf16.mxu0 %v3899_v25  ;;  %1165 = vmatprep.subr.bf16.mxu1 %v3900_v20 }
 0x2ca   :  { %1123 = vmatpush1.bf16.msra.mxu0 %v3901_v24  ;;  %1166 = vmatpush1.bf16.msra.mxu1 %v3902_v32 }
 0x2cb   :  { %1124 = vmatprep.subr.bf16.mxu0 %v3903_v26  ;;  %1167 = vmatprep.subr.bf16.mxu1 %v3904_v23 }
 0x2ce   :  { %1125 = vmatpush1.bf16.msra.mxu0 %v3905_v13  ;;  %1168 = vmatpush1.bf16.msra.mxu1 %v3906_v12 }
 0x2cf   :  { %1202 = vmatprep.subr.bf16.mxu0 %v3907_v14  ;;  %1245 = vmatprep.subr.bf16.mxu1 %v3908_v31 }
 0x384   :  { %v1018_v22 = vpop.f32.mrb[8].mxu0  ;;  %v1061_v27 = vpop.f32.mrb[8].mxu1 }
 0x385   :  { %v1070_v33 = vmul.f32 0.5, %v1018_v22  ;;  %v1020_v16 = vpop.f32.mrb[9].mxu0  ;;  %v1063_v34 = vpop.f32.mrb[9].mxu1  ;;  %v1072_v7 = vmul.f32 0.5, %v1061_v27 }
 0x386   :  { %v1071_v11 = vmul.f32 0.5, %v1020_v16  ;;  %v1022_v28 = vpop.f32.mrb[10].mxu0  ;;  %v1065_v1 = vpop.f32.mrb[10].mxu1 }
 0x387   :  { %2510 = vtanh.f32 %v1070_v33  ;;  %v1073_v2 = vmul.f32 0.5, %v1022_v28  ;;  %v1024_v3 = vpop.f32.mrb[11].mxu0  ;;  %v1067_v4 = vpop.f32.mrb[11].mxu1  ;;  %v1075_v9 = vmul.f32 0.5, %v1065_v1 }
 0x388   :  { %v1074_v5 = vmul.f32 0.5, %v1024_v3  ;;  %2512 = vtanh.f32 %v1071_v11 }
 0x389   :  { %2514 = vtanh.f32 %v1073_v2 }
 0x38a   :  { %2516 = vtanh.f32 %v1063_v34 }
 0x38b   :  { %2518 = vtanh.f32 %v1074_v5 }
 0x38c   :  { %2520 = vtanh.f32 %v1067_v4 }
 0x38d   :  { %2522 = vtanh.f32 %v1072_v7  ;;  %v3379_v7 = vld [vmem:[#allocation8 + $0xe8] ss:$16 sps:$4 sm:$0xff]  }
 0x38e   :  { %2524 = vtanh.f32 %v1075_v9  ;;  %3930 = vst [vmem:[#allocation32_spill] sm:$0xff] %v3379_v7  ;;  %v3385_v9 = vld [vmem:[#allocation6 + $0xc] ss:$16 sps:$4 sm:$0xff]  }
 0x38f   :  { %3932 = vst [vmem:[#allocation34_spill] sm:$0xff] %v3385_v9 }
 0x391   :  { %v2511_v6 = vpop.eup %2510 }
 0x392   :  { %v1082_v19 = vadd.f32 1.0, %v2511_v6  ;;  %v2513_v8 = vpop.eup %2512 }
 0x393   :  { %v2515_v10 = vpop.eup %2514  ;;  %v1083_v29 = vadd.f32 1.0, %v2513_v8  ;;  %v3382_v8 = vld [vmem:[#allocation6 + $0x4] ss:$16 sps:$4 sm:$0xff]  }
 0x394   :  { %v1088_v30 = vmul.f32 0.5, %v1082_v19  ;;  %v2517_v57 = vpop.eup %2516  ;;  %v1085_v25 = vadd.f32 1.0, %v2515_v10  ;;  %v3376_v19 = vld [vmem:[#allocation8 + $0xe0] ss:$16 sps:$4 sm:$0xff]   ;;  %3931 = vst [vmem:[#allocation33_spill] sm:$0xff] %v3382_v8 }
 0x395   :  { %v2519_v20 = vpop.eup %2518  ;;  %v1089_v24 = vmul.f32 0.5, %v1083_v29  ;;  %3929 = vst [vmem:[#allocation31_spill] sm:$0xff] %v3376_v19 }
 0x396   :  { %v1098_v32 = vmul.f32 %v2517_v57, %v1088_v30  ;;  %v1091_v26 = vmul.f32 0.5, %v1085_v25  ;;  %v1086_v23 = vadd.f32 1.0, %v2519_v20  ;;  %v2521_v13 = vpop.eup %2520 }
 0x397   :  { %v1096_v12 = vmul.f32 %v1089_v24, %v3169_v18  ;;  %v2523_v16 = vpop.eup %2522 }
 0x398   :  { %v1092_v14 = vmul.f32 0.5, %v1086_v23  ;;  %v1099_v31 = vmul.f32 %v2521_v13, %v1091_v26  ;;  %v2525_v34 = vpop.eup %2524  ;;  %v1084_v11 = vadd.f32 1.0, %v2523_v16 }
 0x399   :  { %v3245_v22 = vadd.f32 %v1098_v32, %v1096_v12  ;;  %v1087_v28 = vadd.f32 1.0, %v2525_v34 }
 0x39a   :  { %v1097_v27 = vmul.f32 %v1092_v14, %v3173_v17  ;;  %v1090_v2 = vmul.f32 0.5, %v1084_v11  ;;  %v3373_v17 = vld [vmem:[#allocation8 + $0xec] ss:$16 sps:$4 sm:$0xff]  }
 0x39b   :  { %2526 = vtanh.f32 %v3245_v22  ;;  %v1093_v3 = vmul.f32 0.5, %v1087_v28  ;;  %3928 = vst [vmem:[#allocation30_spill] sm:$0xff] %v3373_v17 }
 0x39c   :  { %v3249_v33 = vadd.f32 %v1099_v31, %v1097_v27 }
 0x39e   :  { %2528 = vtanh.f32 %v3249_v33 }
 0x3a5   :  { %v2527_v1 = vpop.eup %2526 }
 0x3a6   :  { %v1104_v4 = vmul.f32 %v2527_v1, %v1090_v2 }
 0x3a8   :  { %v2529_v18 = vpop.eup %2528 }
 0x3a9   :  { %v1105_v5 = vmul.f32 %v2529_v18, %v1093_v3 }
 0x3ab   :  { %v1109_v6 = vpack.c.bf16 %v1105_v5, %v1104_v4 }
 0x3ad   :  { %1143 = vmatmul.mubr.bf16.vlgmr.msra.gmra.mrb[12].mxu0 %v1109_v6  ;;  %1186 = vmatmul.mubr.bf16.vlgmr.msra.gmra.mrb[12].mxu1 %v1109_v6 }
 0x3ae   :  { %1203 = vmatpush1.bf16.msra.mxu0 %v2962_v35  ;;  %1246 = vmatpush1.bf16.msra.mxu1 %v2964_v36  ;;  %v2465_v35 = vld [vmem:[#allocation3 + $0x18] sm:$0xff]   ;;  %v3284_v36 = vld [vmem:[#allocation8 + $0x4] ss:$16 sps:$4 sm:$0xff]  }
 0x3af   :  { %1204 = vmatprep.subr.bf16.mxu0 %v2968_v37  ;;  %1247 = vmatprep.subr.bf16.mxu1 %v2972_v38  ;;  %v3287_v37 = vld [vmem:[#allocation8 + $0xc] ss:$16 sps:$4 sm:$0xff]   ;;  %v3290_v38 = vld [vmem:[#allocation8] ss:$16 sps:$4 sm:$0xff]  }
 0x3b0   :  { %1234 = vmatprep.mubr.bf16.mxu0 %v3862_v63  ;;  %1277 = vmatprep.mubr.bf16.mxu1 %v3862_v63 }
 0x3b2   :  { %1205 = vmatpush1.bf16.msra.mxu0 %v2974_v40  ;;  %1248 = vmatpush1.bf16.msra.mxu1 %v2978_v41  ;;  %v3293_v40 = vld [vmem:[#allocation8 + $0x8] ss:$16 sps:$4 sm:$0xff]   ;;  %v3296_v41 = vld [vmem:[#allocation8 + $0x24] ss:$16 sps:$4 sm:$0xff]  }
 0x3b3   :  { %1206 = vmatprep.subr.bf16.mxu0 %v2980_v42  ;;  %1249 = vmatprep.subr.bf16.mxu1 %v2984_v43  ;;  %v3304_v42 = vld [vmem:[#allocation8 + $0x20] ss:$16 sps:$4 sm:$0xff]   ;;  %v3307_v43 = vld [vmem:[#allocation8 + $0x28] ss:$16 sps:$4 sm:$0xff]  }
 0x3b6   :  { %1207 = vmatpush1.bf16.msra.mxu0 %v2988_v44  ;;  %1250 = vmatpush1.bf16.msra.mxu1 %v2990_v45  ;;  %v3310_v44 = vld [vmem:[#allocation8 + $0x44] ss:$16 sps:$4 sm:$0xff]   ;;  %v3313_v45 = vld [vmem:[#allocation8 + $0x4c] ss:$16 sps:$4 sm:$0xff]  }
 0x3b7   :  { %1208 = vmatprep.subr.bf16.mxu0 %v2994_v46  ;;  %1251 = vmatprep.subr.bf16.mxu1 %v2998_v47  ;;  %v3316_v46 = vld [vmem:[#allocation8 + $0x40] ss:$16 sps:$4 sm:$0xff]   ;;  %v3319_v47 = vld [vmem:[#allocation8 + $0x48] ss:$16 sps:$4 sm:$0xff]  }
 0x3b8   :  { %3909 = vst [vmem:[#allocation37_spill] sm:$0xff] %v3316_v46  ;;  %3910 = vst [vmem:[#allocation38_spill] sm:$0xff] %v3319_v47 }
 0x3ba   :  { %1209 = vmatpush1.bf16.msra.mxu0 %v3000_v48  ;;  %1252 = vmatpush1.bf16.msra.mxu1 %v3002_v49  ;;  %v3322_v48 = vld [vmem:[#allocation8 + $0x64] ss:$16 sps:$4 sm:$0xff]   ;;  %v3325_v49 = vld [vmem:[#allocation8 + $0x6c] ss:$16 sps:$4 sm:$0xff]  }
 0x3bb   :  { %1210 = vmatprep.subr.bf16.mxu0 %v3004_v50  ;;  %1253 = vmatprep.subr.bf16.mxu1 %v3006_v51  ;;  %3911 = vst [vmem:[#allocation13_spill] sm:$0xff] %v3322_v48  ;;  %3912 = vst [vmem:[#allocation14_spill] sm:$0xff] %v3325_v49  ;;  %v3328_v50 = vld [vmem:[#allocation8 + $0x60] ss:$16 sps:$4 sm:$0xff]   ;;  %v3331_v51 = vld [vmem:[#allocation8 + $0x68] ss:$16 sps:$4 sm:$0xff]  }
 0x3bc   :  { %3913 = vst [vmem:[#allocation15_spill] sm:$0xff] %v3328_v50  ;;  %3914 = vst [vmem:[#allocation16_spill] sm:$0xff] %v3331_v51 }
 0x3be   :  { %1211 = vmatpush1.bf16.msra.mxu0 %v3014_v52  ;;  %1254 = vmatpush1.bf16.msra.mxu1 %v3016_v53  ;;  %v3334_v52 = vld [vmem:[#allocation8 + $0x84] ss:$16 sps:$4 sm:$0xff]   ;;  %v3337_v53 = vld [vmem:[#allocation8 + $0x8c] ss:$16 sps:$4 sm:$0xff]  }
 0x3bf   :  { %1212 = vmatprep.subr.bf16.mxu0 %v3020_v54  ;;  %1255 = vmatprep.subr.bf16.mxu1 %v3022_v55  ;;  %3915 = vst [vmem:[#allocation17_spill] sm:$0xff] %v3334_v52  ;;  %3916 = vst [vmem:[#allocation18_spill] sm:$0xff] %v3337_v53  ;;  %v3340_v54 = vld [vmem:[#allocation8 + $0x80] ss:$16 sps:$4 sm:$0xff]   ;;  %v3343_v55 = vld [vmem:[#allocation8 + $0x88] ss:$16 sps:$4 sm:$0xff]  }
 0x3c0   :  { %3917 = vst [vmem:[#allocation19_spill] sm:$0xff] %v3340_v54  ;;  %3918 = vst [vmem:[#allocation20_spill] sm:$0xff] %v3343_v55 }
 0x3c2   :  { %1213 = vmatpush1.bf16.msra.mxu0 %v3026_v56  ;;  %1256 = vmatpush1.bf16.msra.mxu1 %v3863_v15  ;;  %v3346_v56 = vld [vmem:[#allocation8 + $0xa4] ss:$16 sps:$4 sm:$0xff]   ;;  %v3367_v15 = vld [vmem:[#allocation8 + $0xc8] ss:$16 sps:$4 sm:$0xff]  }
 0x3c3   :  { %1214 = vmatprep.subr.bf16.mxu0 %v3032_v58  ;;  %1257 = vmatprep.subr.bf16.mxu1 %v3034_v59  ;;  %3919 = vst [vmem:[#allocation21_spill] sm:$0xff] %v3346_v56  ;;  %v3349_v58 = vld [vmem:[#allocation8 + $0xac] ss:$16 sps:$4 sm:$0xff]   ;;  %v3352_v59 = vld [vmem:[#allocation8 + $0xa0] ss:$16 sps:$4 sm:$0xff]   ;;  %3926 = vst [vmem:[#allocation28_spill] sm:$0xff] %v3367_v15 }
 0x3c4   :  { %3920 = vst [vmem:[#allocation22_spill] sm:$0xff] %v3349_v58  ;;  %3921 = vst [vmem:[#allocation23_spill] sm:$0xff] %v3352_v59 }
 0x3c6   :  { %1215 = vmatpush1.bf16.msra.mxu0 %v3038_v60  ;;  %1258 = vmatpush1.bf16.msra.mxu1 %v3040_v61  ;;  %v3355_v60 = vld [vmem:[#allocation8 + $0xa8] ss:$16 sps:$4 sm:$0xff]   ;;  %v3358_v61 = vld [vmem:[#allocation8 + $0xc4] ss:$16 sps:$4 sm:$0xff]  }
 0x3c7   :  { %1216 = vmatprep.subr.bf16.mxu0 %v3044_v62  ;;  %1259 = vmatprep.subr.bf16.mxu1 %v3864_v21  ;;  %3922 = vst [vmem:[#allocation24_spill] sm:$0xff] %v3355_v60  ;;  %3923 = vst [vmem:[#allocation25_spill] sm:$0xff] %v3358_v61  ;;  %v3361_v62 = vld [vmem:[#allocation8 + $0xcc] ss:$16 sps:$4 sm:$0xff]   ;;  %v3370_v21 = vld [vmem:[#allocation8 + $0xe4] ss:$16 sps:$4 sm:$0xff]  }
 0x3c8   :  { %3924 = vst [vmem:[#allocation26_spill] sm:$0xff] %v3361_v62  ;;  %3927 = vst [vmem:[#allocation29_spill] sm:$0xff] %v3370_v21 }
 0x3ca   :  { %1217 = vmatpush1.bf16.msra.mxu0 %v3050_v39  ;;  %1260 = vmatpush1.bf16.msra.mxu1 %v3052_v0  ;;  %v3299_v0 = vld [vmem:[#allocation8 + $0x2c] ss:$16 sps:$4 sm:$0xff]   ;;  %v3364_v39 = vld [vmem:[#allocation8 + $0xc0] ss:$16 sps:$4 sm:$0xff]  }
 0x3cb   :  { %1328 = vmatprep.subr.bf16.mxu0 %v3284_v36  ;;  %1371 = vmatprep.subr.bf16.mxu1 %v3287_v37  ;;  %3925 = vst [vmem:[#allocation27_spill] sm:$0xff] %v3364_v39 }
 0x3cd   :  { %1235 = vmatmul.mubr.bf16.vlgmr.msra.gmra.mrb[12].mxu0 %v2465_v35  ;;  %1278 = vmatmul.mubr.bf16.vlgmr.msra.gmra.mrb[12].mxu1 %v2465_v35 }
 0x3ce   :  { %1329 = vmatpush1.bf16.msra.mxu0 %v3290_v38  ;;  %1372 = vmatpush1.bf16.msra.mxu1 %v3293_v40 }
 0x3cf   :  { %1330 = vmatprep.subr.bf16.mxu0 %v3296_v41  ;;  %1373 = vmatprep.subr.bf16.mxu1 %v3299_v0 }
 0x3d0   :  { %1360 = vmatprep.mubr.bf16.mxu0 %v3862_v63  ;;  %1403 = vmatprep.mubr.bf16.mxu1 %v3862_v63 }
 0x3d2   :  { %1331 = vmatpush1.bf16.msra.mxu0 %v3304_v42  ;;  %1374 = vmatpush1.bf16.msra.mxu1 %v3307_v43 }
 0x3d3   :  { %1332 = vmatprep.subr.bf16.mxu0 %v3310_v44  ;;  %1375 = vmatprep.subr.bf16.mxu1 %v3313_v45 }
 0x3d6   :  { %1333 = vmatpush1.bf16.msra.mxu0 %v3316_v46  ;;  %1376 = vmatpush1.bf16.msra.mxu1 %v3319_v47 }
 0x3d7   :  { %1334 = vmatprep.subr.bf16.mxu0 %v3322_v48  ;;  %1377 = vmatprep.subr.bf16.mxu1 %v3325_v49 }
 0x3da   :  { %1335 = vmatpush1.bf16.msra.mxu0 %v3328_v50  ;;  %1378 = vmatpush1.bf16.msra.mxu1 %v3331_v51 }
 0x3db   :  { %1336 = vmatprep.subr.bf16.mxu0 %v3334_v52  ;;  %1379 = vmatprep.subr.bf16.mxu1 %v3337_v53 }
 0x3de   :  { %1337 = vmatpush1.bf16.msra.mxu0 %v3340_v54  ;;  %1380 = vmatpush1.bf16.msra.mxu1 %v3343_v55 }
 0x3df   :  { %1338 = vmatprep.subr.bf16.mxu0 %v3346_v56  ;;  %1381 = vmatprep.subr.bf16.mxu1 %v3349_v58 }
 0x3e2   :  { %1339 = vmatpush1.bf16.msra.mxu0 %v3352_v59  ;;  %1382 = vmatpush1.bf16.msra.mxu1 %v3355_v60 }
 0x3e3   :  { %1340 = vmatprep.subr.bf16.mxu0 %v3358_v61  ;;  %1383 = vmatprep.subr.bf16.mxu1 %v3361_v62 }
 0x3e6   :  { %1341 = vmatpush1.bf16.msra.mxu0 %v3364_v39  ;;  %1384 = vmatpush1.bf16.msra.mxu1 %v3367_v15 }
 0x3e7   :  { %1342 = vmatprep.subr.bf16.mxu0 %v3370_v21  ;;  %1385 = vmatprep.subr.bf16.mxu1 %v3373_v17 }
 0x3ea   :  { %1343 = vmatpush1.bf16.msra.mxu0 %v3376_v19  ;;  %1386 = vmatpush1.bf16.msra.mxu1 %v3379_v7 }
 0x3eb   :  { %1420 = vmatprep.subr.bf16.mxu0 %v3382_v8  ;;  %1463 = vmatprep.subr.bf16.mxu1 %v3385_v9 }
 0x4a0   :  { %v1236_v10 = vpop.f32.mrb[12].mxu0  ;;  %v1279_v30 = vpop.f32.mrb[12].mxu1 }
 0x4a1   :  { %v1288_v29 = vmul.f32 0.5, %v1236_v10  ;;  %v1238_v57 = vpop.f32.mrb[13].mxu0  ;;  %v1281_v25 = vpop.f32.mrb[13].mxu1  ;;  %v1290_v27 = vmul.f32 0.5, %v1279_v30 }
 0x4a2   :  { %v1289_v20 = vmul.f32 0.5, %v1238_v57  ;;  %v1240_v24 = vpop.f32.mrb[14].mxu0  ;;  %v1283_v32 = vpop.f32.mrb[14].mxu1 }
 0x4a3   :  { %2530 = vtanh.f32 %v1288_v29  ;;  %v1291_v26 = vmul.f32 0.5, %v1240_v24  ;;  %v1242_v23 = vpop.f32.mrb[15].mxu0  ;;  %v1285_v13 = vpop.f32.mrb[15].mxu1  ;;  %v1293_v34 = vmul.f32 0.5, %v1283_v32 }
 0x4a4   :  { %v1292_v12 = vmul.f32 0.5, %v1242_v23  ;;  %2532 = vtanh.f32 %v1289_v20 }
 0x4a5   :  { %2534 = vtanh.f32 %v1291_v26 }
 0x4a6   :  { %2536 = vtanh.f32 %v1281_v25 }
 0x4a7   :  { %2538 = vtanh.f32 %v1292_v12 }
 0x4a8   :  { %2540 = vtanh.f32 %v1285_v13 }
 0x4a9   :  { %2542 = vtanh.f32 %v1290_v27 }
 0x4aa   :  { %2544 = vtanh.f32 %v1293_v34 }
 0x4ad   :  { %v2531_v14 = vpop.eup %2530 }
 0x4ae   :  { %v1300_v31 = vadd.f32 1.0, %v2531_v14  ;;  %v2533_v16 = vpop.eup %2532 }
 0x4af   :  { %v2535_v11 = vpop.eup %2534  ;;  %v1301_v1 = vadd.f32 1.0, %v2533_v16 }
 0x4b0   :  { %v1306_v28 = vmul.f32 0.5, %v1300_v31  ;;  %v2537_v2 = vpop.eup %2536  ;;  %v1303_v3 = vadd.f32 1.0, %v2535_v11  ;;  %v3399_v11 = vld [vmem:[#allocation6 + $0x8] ss:$16 sps:$4 sm:$0xff]  }
 0x4b1   :  { %v2539_v18 = vpop.eup %2538  ;;  %v1307_v4 = vmul.f32 0.5, %v1301_v1  ;;  %v3405_v1 = vld [vmem:[#allocation6 + $0x2c] ss:$16 sps:$4 sm:$0xff]  }
 0x4b2   :  { %v1316_v5 = vmul.f32 %v2537_v2, %v1306_v28  ;;  %v1309_v6 = vmul.f32 0.5, %v1303_v3  ;;  %v1304_v35 = vadd.f32 1.0, %v2539_v18  ;;  %v2541_v10 = vpop.eup %2540  ;;  %v3402_v28 = vld [vmem:[#allocation6 + $0x24] ss:$16 sps:$4 sm:$0xff]   ;;  %v3410_v2 = vld [vmem:[#allocation6 + $0x20] ss:$16 sps:$4 sm:$0xff]  }
 0x4b3   :  { %v1314_v29 = vmul.f32 %v1307_v4, %v3245_v22  ;;  %v2543_v32 = vpop.eup %2542  ;;  %v3413_v3 = vld [vmem:[#allocation6 + $0x28] ss:$16 sps:$4 sm:$0xff]   ;;  %v3416_v18 = vld [vmem:[#allocation6 + $0x44] ss:$16 sps:$4 sm:$0xff]   ;;  %v3419_v4 = vld [vmem:[#allocation6 + $0x4c] ss:$16 sps:$4 sm:$0xff]  }
 0x4b4   :  { %v1310_v57 = vmul.f32 0.5, %v1304_v35  ;;  %v1317_v25 = vmul.f32 %v2541_v10, %v1309_v6  ;;  %v2545_v26 = vpop.eup %2544  ;;  %v1302_v23 = vadd.f32 1.0, %v2543_v32  ;;  %v3425_v6 = vld [vmem:[#allocation6 + $0x48] ss:$16 sps:$4 sm:$0xff]   ;;  %v3428_v35 = vld [vmem:[#allocation6 + $0x64] ss:$16 sps:$4 sm:$0xff]  }
 0x4b5   :  { %v3389_v30 = vadd.f32 %v1316_v5, %v1314_v29  ;;  %v1305_v13 = vadd.f32 1.0, %v2545_v26  ;;  %v3422_v5 = vld [vmem:[#allocation6 + $0x40] ss:$16 sps:$4 sm:$0xff]   ;;  %v3431_v10 = vld [vmem:[#allocation6 + $0x6c] ss:$16 sps:$4 sm:$0xff]  }
 0x4b6   :  { %v1315_v20 = vmul.f32 %v1310_v57, %v3249_v33  ;;  %v1308_v14 = vmul.f32 0.5, %v1302_v23  ;;  %v3396_v33 = vld [vmem:[#allocation6] ss:$16 sps:$4 sm:$0xff]   ;;  %v3437_v57 = vld [vmem:[#allocation6 + $0x68] ss:$16 sps:$4 sm:$0xff]  }
 0x4b7   :  { %2546 = vtanh.f32 %v3389_v30  ;;  %v1311_v31 = vmul.f32 0.5, %v1305_v13  ;;  %v3434_v29 = vld [vmem:[#allocation6 + $0x60] ss:$16 sps:$4 sm:$0xff]   ;;  %v3449_v26 = vld [vmem:[#allocation6 + $0x88] ss:$16 sps:$4 sm:$0xff]  }
 0x4b8   :  { %v3393_v24 = vadd.f32 %v1317_v25, %v1315_v20  ;;  %v3440_v25 = vld [vmem:[#allocation6 + $0x84] ss:$16 sps:$4 sm:$0xff]   ;;  %v3443_v20 = vld [vmem:[#allocation6 + $0x8c] ss:$16 sps:$4 sm:$0xff]   ;;  %v3446_v32 = vld [vmem:[#allocation6 + $0x80] ss:$16 sps:$4 sm:$0xff]  }
 0x4b9   :  { %v3452_v23 = vld [vmem:[#allocation6 + $0xa4] ss:$16 sps:$4 sm:$0xff]   ;;  %v3455_v13 = vld [vmem:[#allocation6 + $0xac] ss:$16 sps:$4 sm:$0xff]  }
 0x4ba   :  { %2548 = vtanh.f32 %v3393_v24 }
 0x4c1   :  { %v2547_v12 = vpop.eup %2546 }
 0x4c2   :  { %v1322_v27 = vmul.f32 %v2547_v12, %v1308_v14  ;;  %v3458_v12 = vld [vmem:[#allocation6 + $0xa0] ss:$16 sps:$4 sm:$0xff]   ;;  %v3461_v14 = vld [vmem:[#allocation6 + $0xa8] ss:$16 sps:$4 sm:$0xff]  }
 0x4c3   :  { %3933 = vst [vmem:[#allocation35_spill] sm:$0xff] %v3458_v12  ;;  %3934 = vst [vmem:[#allocation36_spill] sm:$0xff] %v3461_v14 }
 0x4c4   :  { %v2549_v22 = vpop.eup %2548 }
 0x4c5   :  { %v1323_v16 = vmul.f32 %v2549_v22, %v1311_v31  ;;  %v3464_v31 = vld [vmem:[#allocation6 + $0xc4] ss:$16 sps:$4 sm:$0xff]   ;;  %v3467_v22 = vld [vmem:[#allocation6 + $0xcc] ss:$16 sps:$4 sm:$0xff]  }
 0x4c6   :  { %3935 = vst [vmem:[#allocation39_spill] sm:$0xff] %v3464_v31  ;;  %3936 = vst [vmem:[#allocation40_spill] sm:$0xff] %v3467_v22 }
 0x4c7   :  { %v1327_v34 = vpack.c.bf16 %v1323_v16, %v1322_v27  ;;  %v3470_v27 = vld [vmem:[#allocation6 + $0xc0] ss:$16 sps:$4 sm:$0xff]   ;;  %v3473_v16 = vld [vmem:[#allocation6 + $0xc8] ss:$16 sps:$4 sm:$0xff]  }
 0x4c9   :  { %1361 = vmatmul.mubr.bf16.vlgmr.msra.gmra.mrb[16].mxu0 %v1327_v34  ;;  %1404 = vmatmul.mubr.bf16.vlgmr.msra.gmra.mrb[16].mxu1 %v1327_v34  ;;  %v3476_v34 = vld [vmem:[#allocation6 + $0xe4] ss:$16 sps:$4 sm:$0xff]  }
 0x4ca   :  { %1421 = vmatpush1.bf16.msra.mxu0 %v3396_v33  ;;  %1464 = vmatpush1.bf16.msra.mxu1 %v3399_v11 }
 0x4cb   :  { %1422 = vmatprep.subr.bf16.mxu0 %v3402_v28  ;;  %1465 = vmatprep.subr.bf16.mxu1 %v3405_v1 }
 0x4cc   :  { %1452 = vmatprep.mubr.bf16.mxu0 %v3862_v63  ;;  %1495 = vmatprep.mubr.bf16.mxu1 %v3862_v63 }
 0x4ce   :  { %1423 = vmatpush1.bf16.msra.mxu0 %v3410_v2  ;;  %1466 = vmatpush1.bf16.msra.mxu1 %v3413_v3 }
 0x4cf   :  { %1424 = vmatprep.subr.bf16.mxu0 %v3416_v18  ;;  %1467 = vmatprep.subr.bf16.mxu1 %v3419_v4 }
 0x4d2   :  { %1425 = vmatpush1.bf16.msra.mxu0 %v3422_v5  ;;  %1468 = vmatpush1.bf16.msra.mxu1 %v3425_v6 }
 0x4d3   :  { %1426 = vmatprep.subr.bf16.mxu0 %v3428_v35  ;;  %1469 = vmatprep.subr.bf16.mxu1 %v3431_v10 }
 0x4d6   :  { %1427 = vmatpush1.bf16.msra.mxu0 %v3434_v29  ;;  %1470 = vmatpush1.bf16.msra.mxu1 %v3437_v57 }
 0x4d7   :  { %1428 = vmatprep.subr.bf16.mxu0 %v3440_v25  ;;  %1471 = vmatprep.subr.bf16.mxu1 %v3443_v20 }
 0x4da   :  { %1429 = vmatpush1.bf16.msra.mxu0 %v3446_v32  ;;  %1472 = vmatpush1.bf16.msra.mxu1 %v3449_v26 }
 0x4db   :  { %1430 = vmatprep.subr.bf16.mxu0 %v3452_v23  ;;  %1473 = vmatprep.subr.bf16.mxu1 %v3455_v13 }
 0x4de   :  { %1431 = vmatpush1.bf16.msra.mxu0 %v3458_v12  ;;  %1474 = vmatpush1.bf16.msra.mxu1 %v3461_v14  ;;  %v3479_v14 = vld [vmem:[#allocation6 + $0xec] ss:$16 sps:$4 sm:$0xff]   ;;  %v3482_v12 = vld [vmem:[#allocation6 + $0xe0] ss:$16 sps:$4 sm:$0xff]  }
 0x4df   :  { %1432 = vmatprep.subr.bf16.mxu0 %v3464_v31  ;;  %1475 = vmatprep.subr.bf16.mxu1 %v3467_v22  ;;  %v2466_v31 = vld [vmem:[#allocation3 + $0x20] sm:$0xff]   ;;  %v3485_v22 = vld [vmem:[#allocation6 + $0xe8] ss:$16 sps:$4 sm:$0xff]  }
 0x4e2   :  { %1433 = vmatpush1.bf16.msra.mxu0 %v3470_v27  ;;  %1476 = vmatpush1.bf16.msra.mxu1 %v3473_v16 }
 0x4e3   :  { %1434 = vmatprep.subr.bf16.mxu0 %v3476_v34  ;;  %1477 = vmatprep.subr.bf16.mxu1 %v3479_v14 }
 0x4e6   :  { %1435 = vmatpush1.bf16.msra.mxu0 %v3482_v12  ;;  %1478 = vmatpush1.bf16.msra.mxu1 %v3485_v22 }
 0x4e7   :  { %1546 = vmatprep.subr.bf16.mxu0 %v3284_v36  ;;  %1589 = vmatprep.subr.bf16.mxu1 %v3287_v37 }
 0x4e9   :  { %1453 = vmatmul.mubr.bf16.vlgmr.msra.gmra.mrb[16].mxu0 %v2466_v31  ;;  %1496 = vmatmul.mubr.bf16.vlgmr.msra.gmra.mrb[16].mxu1 %v2466_v31 }
 0x4ea   :  { %1547 = vmatpush1.bf16.msra.mxu0 %v3290_v38  ;;  %1590 = vmatpush1.bf16.msra.mxu1 %v3293_v40 }
 0x4eb   :  { %1548 = vmatprep.subr.bf16.mxu0 %v3296_v41  ;;  %1591 = vmatprep.subr.bf16.mxu1 %v3299_v0 }
 0x4ec   :  { %1578 = vmatprep.mubr.bf16.mxu0 %v3862_v63  ;;  %1621 = vmatprep.mubr.bf16.mxu1 %v3862_v63 }
 0x4ee   :  { %1549 = vmatpush1.bf16.msra.mxu0 %v3304_v42  ;;  %1592 = vmatpush1.bf16.msra.mxu1 %v3307_v43 }
 0x4ef   :  { %1550 = vmatprep.subr.bf16.mxu0 %v3310_v44  ;;  %1593 = vmatprep.subr.bf16.mxu1 %v3313_v45 }
 0x4f2   :  { %1551 = vmatpush1.bf16.msra.mxu0 %v3316_v46  ;;  %1594 = vmatpush1.bf16.msra.mxu1 %v3319_v47 }
 0x4f3   :  { %1552 = vmatprep.subr.bf16.mxu0 %v3322_v48  ;;  %1595 = vmatprep.subr.bf16.mxu1 %v3325_v49 }
 0x4f6   :  { %1553 = vmatpush1.bf16.msra.mxu0 %v3328_v50  ;;  %1596 = vmatpush1.bf16.msra.mxu1 %v3331_v51 }
 0x4f7   :  { %1554 = vmatprep.subr.bf16.mxu0 %v3334_v52  ;;  %1597 = vmatprep.subr.bf16.mxu1 %v3337_v53 }
 0x4fa   :  { %1555 = vmatpush1.bf16.msra.mxu0 %v3340_v54  ;;  %1598 = vmatpush1.bf16.msra.mxu1 %v3343_v55 }
 0x4fb   :  { %1556 = vmatprep.subr.bf16.mxu0 %v3346_v56  ;;  %1599 = vmatprep.subr.bf16.mxu1 %v3349_v58 }
 0x4fe   :  { %1557 = vmatpush1.bf16.msra.mxu0 %v3352_v59  ;;  %1600 = vmatpush1.bf16.msra.mxu1 %v3355_v60 }
 0x4ff   :  { %1558 = vmatprep.subr.bf16.mxu0 %v3358_v61  ;;  %1601 = vmatprep.subr.bf16.mxu1 %v3361_v62 }
 0x502   :  { %1559 = vmatpush1.bf16.msra.mxu0 %v3364_v39  ;;  %1602 = vmatpush1.bf16.msra.mxu1 %v3367_v15 }
 0x503   :  { %1560 = vmatprep.subr.bf16.mxu0 %v3370_v21  ;;  %1603 = vmatprep.subr.bf16.mxu1 %v3373_v17 }
 0x506   :  { %1561 = vmatpush1.bf16.msra.mxu0 %v3376_v19  ;;  %1604 = vmatpush1.bf16.msra.mxu1 %v3379_v7 }
 0x507   :  { %1638 = vmatprep.subr.bf16.mxu0 %v3382_v8  ;;  %1681 = vmatprep.subr.bf16.mxu1 %v3385_v9 }
 0x5bc   :  { %v1454_v31 = vpop.f32.mrb[16].mxu0  ;;  %v1497_v61 = vpop.f32.mrb[16].mxu1 }
 0x5bd   :  { %v1506_v60 = vmul.f32 0.5, %v1454_v31  ;;  %v1456_v62 = vpop.f32.mrb[17].mxu0  ;;  %v1499_v59 = vpop.f32.mrb[17].mxu1  ;;  %v1508_v7 = vmul.f32 0.5, %v1497_v61 }
 0x5be   :  { %v1507_v39 = vmul.f32 0.5, %v1456_v62  ;;  %v1458_v58 = vpop.f32.mrb[18].mxu0  ;;  %v1501_v15 = vpop.f32.mrb[18].mxu1 }
 0x5bf   :  { %2550 = vtanh.f32 %v1506_v60  ;;  %v1509_v21 = vmul.f32 0.5, %v1458_v58  ;;  %v1460_v56 = vpop.f32.mrb[19].mxu0  ;;  %v1503_v17 = vpop.f32.mrb[19].mxu1  ;;  %v1511_v31 = vmul.f32 0.5, %v1501_v15 }
 0x5c0   :  { %v1510_v55 = vmul.f32 0.5, %v1460_v56  ;;  %2552 = vtanh.f32 %v1507_v39 }
 0x5c1   :  { %2554 = vtanh.f32 %v1509_v21 }
 0x5c2   :  { %2556 = vtanh.f32 %v1499_v59 }
 0x5c3   :  { %2558 = vtanh.f32 %v1510_v55 }
 0x5c4   :  { %2560 = vtanh.f32 %v1503_v17 }
 0x5c5   :  { %2562 = vtanh.f32 %v1508_v7 }
 0x5c6   :  { %2564 = vtanh.f32 %v1511_v31 }
 0x5c9   :  { %v2551_v8 = vpop.eup %2550 }
 0x5ca   :  { %v1518_v9 = vadd.f32 1.0, %v2551_v8  ;;  %v2553_v19 = vpop.eup %2552 }
 0x5cb   :  { %v2555_v54 = vpop.eup %2554  ;;  %v1519_v62 = vadd.f32 1.0, %v2553_v19 }
 0x5cc   :  { %v1524_v53 = vmul.f32 0.5, %v1518_v9  ;;  %v2557_v52 = vpop.eup %2556  ;;  %v1521_v51 = vadd.f32 1.0, %v2555_v54 }
 0x5cd   :  { %v2559_v60 = vpop.eup %2558  ;;  %v1525_v58 = vmul.f32 0.5, %v1519_v62 }
 0x5ce   :  { %v1534_v50 = vmul.f32 %v2557_v52, %v1524_v53  ;;  %v1527_v56 = vmul.f32 0.5, %v1521_v51  ;;  %v1522_v39 = vadd.f32 1.0, %v2559_v60  ;;  %v2561_v59 = vpop.eup %2560  ;;  %v3938_v60 = vld [vmem:[#allocation36_spill] sm:$0xff] }
 0x5cf   :  { %v1532_v55 = vmul.f32 %v1525_v58, %v3389_v30  ;;  %v2563_v54 = vpop.eup %2562  ;;  %v3939_v58 = vld [vmem:[#allocation39_spill] sm:$0xff] }
 0x5d0   :  { %v1528_v21 = vmul.f32 0.5, %v1522_v39  ;;  %v1535_v17 = vmul.f32 %v2561_v59, %v1527_v56  ;;  %v2565_v52 = vpop.eup %2564  ;;  %v1520_v51 = vadd.f32 1.0, %v2563_v54  ;;  %v3940_v56 = vld [vmem:[#allocation40_spill] sm:$0xff]  ;;  %v3941_v59 = vld [vmem:[#allocation15_spill] sm:$0xff] }
 0x5d1   :  { %v3525_v61 = vadd.f32 %v1534_v50, %v1532_v55  ;;  %v1523_v53 = vadd.f32 1.0, %v2565_v52  ;;  %v2467_v39 = vld [vmem:[#allocation3 + $0x28] sm:$0xff]   ;;  %v3947_v52 = vld [vmem:[#allocation21_spill] sm:$0xff] }
 0x5d2   :  { %v1533_v15 = vmul.f32 %v1528_v21, %v3393_v24  ;;  %v1526_v8 = vmul.f32 0.5, %v1520_v51  ;;  %v3937_v24 = vld [vmem:[#allocation35_spill] sm:$0xff]  ;;  %v3942_v55 = vld [vmem:[#allocation16_spill] sm:$0xff]  ;;  %v3943_v21 = vld [vmem:[#allocation17_spill] sm:$0xff] }
 0x5d3   :  { %2566 = vtanh.f32 %v3525_v61  ;;  %v1529_v9 = vmul.f32 0.5, %v1523_v53  ;;  %v3946_v54 = vld [vmem:[#allocation20_spill] sm:$0xff]  ;;  %v3948_v51 = vld [vmem:[#allocation22_spill] sm:$0xff]  ;;  %v3949_v53 = vld [vmem:[#allocation23_spill] sm:$0xff] }
 0x5d4   :  { %v3529_v19 = vadd.f32 %v1535_v17, %v1533_v15  ;;  %v3944_v17 = vld [vmem:[#allocation18_spill] sm:$0xff]  ;;  %v3945_v15 = vld [vmem:[#allocation19_spill] sm:$0xff] }
 0x5d6   :  { %2568 = vtanh.f32 %v3529_v19 }
 0x5dd   :  { %v2567_v7 = vpop.eup %2566 }
 0x5de   :  { %v1540_v31 = vmul.f32 %v2567_v7, %v1526_v8  ;;  %v3950_v7 = vld [vmem:[#allocation24_spill] sm:$0xff]  ;;  %v3951_v8 = vld [vmem:[#allocation25_spill] sm:$0xff] }
 0x5e0   :  { %v2569_v30 = vpop.eup %2568 }
 0x5e1   :  { %v1541_v62 = vmul.f32 %v2569_v30, %v1529_v9  ;;  %v3952_v9 = vld [vmem:[#allocation26_spill] sm:$0xff]  ;;  %v3953_v30 = vld [vmem:[#allocation27_spill] sm:$0xff] }
 0x5e3   :  { %v1545_v50 = vpack.c.bf16 %v1541_v62, %v1540_v31  ;;  %v3954_v31 = vld [vmem:[#allocation28_spill] sm:$0xff]  ;;  %v3955_v62 = vld [vmem:[#allocation29_spill] sm:$0xff] }
 0x5e5   :  { %1579 = vmatmul.mubr.bf16.vlgmr.msra.gmra.mrb[20].mxu0 %v1545_v50  ;;  %1622 = vmatmul.mubr.bf16.vlgmr.msra.gmra.mrb[20].mxu1 %v1545_v50  ;;  %v3956_v50 = vld [vmem:[#allocation30_spill] sm:$0xff] }
 0x5e6   :  { %1639 = vmatpush1.bf16.msra.mxu0 %v3396_v33  ;;  %1682 = vmatpush1.bf16.msra.mxu1 %v3399_v11 }
 0x5e7   :  { %1640 = vmatprep.subr.bf16.mxu0 %v3402_v28  ;;  %1683 = vmatprep.subr.bf16.mxu1 %v3405_v1 }
 0x5e8   :  { %1670 = vmatprep.mubr.bf16.mxu0 %v3862_v63  ;;  %1713 = vmatprep.mubr.bf16.mxu1 %v3862_v63 }
 0x5ea   :  { %1641 = vmatpush1.bf16.msra.mxu0 %v3410_v2  ;;  %1684 = vmatpush1.bf16.msra.mxu1 %v3413_v3 }
 0x5eb   :  { %1642 = vmatprep.subr.bf16.mxu0 %v3416_v18  ;;  %1685 = vmatprep.subr.bf16.mxu1 %v3419_v4 }
 0x5ee   :  { %1643 = vmatpush1.bf16.msra.mxu0 %v3422_v5  ;;  %1686 = vmatpush1.bf16.msra.mxu1 %v3425_v6 }
 0x5ef   :  { %1644 = vmatprep.subr.bf16.mxu0 %v3428_v35  ;;  %1687 = vmatprep.subr.bf16.mxu1 %v3431_v10 }
 0x5f2   :  { %1645 = vmatpush1.bf16.msra.mxu0 %v3434_v29  ;;  %1688 = vmatpush1.bf16.msra.mxu1 %v3437_v57 }
 0x5f3   :  { %1646 = vmatprep.subr.bf16.mxu0 %v3440_v25  ;;  %1689 = vmatprep.subr.bf16.mxu1 %v3443_v20 }
 0x5f6   :  { %1647 = vmatpush1.bf16.msra.mxu0 %v3446_v32  ;;  %1690 = vmatpush1.bf16.msra.mxu1 %v3449_v26 }
 0x5f7   :  { %1648 = vmatprep.subr.bf16.mxu0 %v3452_v23  ;;  %1691 = vmatprep.subr.bf16.mxu1 %v3455_v13 }
 0x5fa   :  { %1649 = vmatpush1.bf16.msra.mxu0 %v3937_v24  ;;  %1692 = vmatpush1.bf16.msra.mxu1 %v3938_v60 }
 0x5fb   :  { %1650 = vmatprep.subr.bf16.mxu0 %v3939_v58  ;;  %1693 = vmatprep.subr.bf16.mxu1 %v3940_v56 }
 0x5fe   :  { %1651 = vmatpush1.bf16.msra.mxu0 %v3470_v27  ;;  %1694 = vmatpush1.bf16.msra.mxu1 %v3473_v16 }
 0x5ff   :  { %1652 = vmatprep.subr.bf16.mxu0 %v3476_v34  ;;  %1695 = vmatprep.subr.bf16.mxu1 %v3479_v14 }
 0x602   :  { %1653 = vmatpush1.bf16.msra.mxu0 %v3482_v12  ;;  %1696 = vmatpush1.bf16.msra.mxu1 %v3485_v22 }
 0x603   :  { %1764 = vmatprep.subr.bf16.mxu0 %v3284_v36  ;;  %1807 = vmatprep.subr.bf16.mxu1 %v3287_v37 }
 0x605   :  { %1671 = vmatmul.mubr.bf16.vlgmr.msra.gmra.mrb[20].mxu0 %v2467_v39  ;;  %1714 = vmatmul.mubr.bf16.vlgmr.msra.gmra.mrb[20].mxu1 %v2467_v39  ;;  %v3957_v39 = vld [vmem:[#allocation31_spill] sm:$0xff] }
 0x606   :  { %1765 = vmatpush1.bf16.msra.mxu0 %v3290_v38  ;;  %1808 = vmatpush1.bf16.msra.mxu1 %v3293_v40 }
 0x607   :  { %1766 = vmatprep.subr.bf16.mxu0 %v3296_v41  ;;  %1809 = vmatprep.subr.bf16.mxu1 %v3299_v0 }
 0x608   :  { %1796 = vmatprep.mubr.bf16.mxu0 %v3862_v63  ;;  %1839 = vmatprep.mubr.bf16.mxu1 %v3862_v63 }
 0x60a   :  { %1767 = vmatpush1.bf16.msra.mxu0 %v3304_v42  ;;  %1810 = vmatpush1.bf16.msra.mxu1 %v3307_v43 }
 0x60b   :  { %1768 = vmatprep.subr.bf16.mxu0 %v3310_v44  ;;  %1811 = vmatprep.subr.bf16.mxu1 %v3313_v45 }
 0x60e   :  { %1769 = vmatpush1.bf16.msra.mxu0 %v3316_v46  ;;  %1812 = vmatpush1.bf16.msra.mxu1 %v3319_v47 }
 0x60f   :  { %1770 = vmatprep.subr.bf16.mxu0 %v3322_v48  ;;  %1813 = vmatprep.subr.bf16.mxu1 %v3325_v49 }
 0x612   :  { %1771 = vmatpush1.bf16.msra.mxu0 %v3941_v59  ;;  %1814 = vmatpush1.bf16.msra.mxu1 %v3942_v55 }
 0x613   :  { %1772 = vmatprep.subr.bf16.mxu0 %v3943_v21  ;;  %1815 = vmatprep.subr.bf16.mxu1 %v3944_v17 }
 0x616   :  { %1773 = vmatpush1.bf16.msra.mxu0 %v3945_v15  ;;  %1816 = vmatpush1.bf16.msra.mxu1 %v3946_v54 }
 0x617   :  { %1774 = vmatprep.subr.bf16.mxu0 %v3947_v52  ;;  %1817 = vmatprep.subr.bf16.mxu1 %v3948_v51  ;;  %v3958_v52 = vld [vmem:[#allocation32_spill] sm:$0xff]  ;;  %v3959_v51 = vld [vmem:[#allocation33_spill] sm:$0xff] }
 0x61a   :  { %1775 = vmatpush1.bf16.msra.mxu0 %v3949_v53  ;;  %1818 = vmatpush1.bf16.msra.mxu1 %v3950_v7  ;;  %v3960_v53 = vld [vmem:[#allocation34_spill] sm:$0xff] }
 0x61b   :  { %1776 = vmatprep.subr.bf16.mxu0 %v3951_v8  ;;  %1819 = vmatprep.subr.bf16.mxu1 %v3952_v9 }
 0x61e   :  { %1777 = vmatpush1.bf16.msra.mxu0 %v3953_v30  ;;  %1820 = vmatpush1.bf16.msra.mxu1 %v3954_v31 }
 0x61f   :  { %1778 = vmatprep.subr.bf16.mxu0 %v3955_v62  ;;  %1821 = vmatprep.subr.bf16.mxu1 %v3956_v50 }
 0x622   :  { %1779 = vmatpush1.bf16.msra.mxu0 %v3957_v39  ;;  %1822 = vmatpush1.bf16.msra.mxu1 %v3958_v52 }
 0x623   :  { %1856 = vmatprep.subr.bf16.mxu0 %v3959_v51  ;;  %1899 = vmatprep.subr.bf16.mxu1 %v3960_v53 }
 0x6d8   :  { %v1672_v7 = vpop.f32.mrb[20].mxu0  ;;  %v1715_v8 = vpop.f32.mrb[20].mxu1 }
 0x6d9   :  { %v1724_v54 = vmul.f32 0.5, %v1672_v7  ;;  %v1674_v9 = vpop.f32.mrb[21].mxu0  ;;  %v1717_v15 = vpop.f32.mrb[21].mxu1  ;;  %v1726_v52 = vmul.f32 0.5, %v1715_v8 }
 0x6da   :  { %v1725_v30 = vmul.f32 0.5, %v1674_v9  ;;  %v1676_v17 = vpop.f32.mrb[22].mxu0  ;;  %v1719_v31 = vpop.f32.mrb[22].mxu1 }
 0x6db   :  { %2570 = vtanh.f32 %v1724_v54  ;;  %v1727_v62 = vmul.f32 0.5, %v1676_v17  ;;  %v1678_v21 = vpop.f32.mrb[23].mxu0  ;;  %v1721_v50 = vpop.f32.mrb[23].mxu1  ;;  %v1729_v7 = vmul.f32 0.5, %v1719_v31 }
 0x6dc   :  { %v1728_v55 = vmul.f32 0.5, %v1678_v21  ;;  %2572 = vtanh.f32 %v1725_v30 }
 0x6dd   :  { %2574 = vtanh.f32 %v1727_v62 }
 0x6de   :  { %2576 = vtanh.f32 %v1717_v15 }
 0x6df   :  { %2578 = vtanh.f32 %v1728_v55 }
 0x6e0   :  { %2580 = vtanh.f32 %v1721_v50 }
 0x6e1   :  { %2582 = vtanh.f32 %v1726_v52 }
 0x6e2   :  { %2584 = vtanh.f32 %v1729_v7 }
 0x6e5   :  { %v2571_v51 = vpop.eup %2570 }
 0x6e6   :  { %v1736_v53 = vadd.f32 1.0, %v2571_v51  ;;  %v2573_v39 = vpop.eup %2572 }
 0x6e7   :  { %v2575_v59 = vpop.eup %2574  ;;  %v1737_v9 = vadd.f32 1.0, %v2573_v39 }
 0x6e8   :  { %v1742_v49 = vmul.f32 0.5, %v1736_v53  ;;  %v2577_v48 = vpop.eup %2576  ;;  %v1739_v47 = vadd.f32 1.0, %v2575_v59 }
 0x6e9   :  { %v2579_v54 = vpop.eup %2578  ;;  %v1743_v17 = vmul.f32 0.5, %v1737_v9 }
 0x6ea   :  { %v1752_v46 = vmul.f32 %v2577_v48, %v1742_v49  ;;  %v1745_v21 = vmul.f32 0.5, %v1739_v47  ;;  %v1740_v30 = vadd.f32 1.0, %v2579_v54  ;;  %v2581_v15 = vpop.eup %2580  ;;  %v3967_v54 = vld [vmem:[#allocation17_spill] sm:$0xff] }
 0x6eb   :  { %v1750_v55 = vmul.f32 %v1743_v17, %v3525_v61  ;;  %v2583_v59 = vpop.eup %2582  ;;  %v3972_v17 = vld [vmem:[#allocation22_spill] sm:$0xff] }
 0x6ec   :  { %v1746_v62 = vmul.f32 0.5, %v1740_v30  ;;  %v1753_v51 = vmul.f32 %v2581_v15, %v1745_v21  ;;  %v2585_v48 = vpop.eup %2584  ;;  %v1738_v47 = vadd.f32 1.0, %v2583_v59  ;;  %v3973_v21 = vld [vmem:[#allocation23_spill] sm:$0xff]  ;;  %v3974_v30 = vld [vmem:[#allocation24_spill] sm:$0xff]  ;;  %v3975_v15 = vld [vmem:[#allocation25_spill] sm:$0xff] }
 0x6ed   :  { %v3601_v8 = vadd.f32 %v1752_v46, %v1750_v55  ;;  %v1741_v49 = vadd.f32 1.0, %v2585_v48  ;;  %v3976_v55 = vld [vmem:[#allocation26_spill] sm:$0xff]  ;;  %v3981_v48 = vld [vmem:[#allocation31_spill] sm:$0xff] }
 0x6ee   :  { %v1751_v31 = vmul.f32 %v1746_v62, %v3529_v19  ;;  %v1744_v50 = vmul.f32 0.5, %v1738_v47  ;;  %v2468_v19 = vld [vmem:[#allocation3 + $0x30] sm:$0xff]   ;;  %v3977_v62 = vld [vmem:[#allocation27_spill] sm:$0xff]  ;;  %v3980_v59 = vld [vmem:[#allocation30_spill] sm:$0xff] }
 0x6ef   :  { %2586 = vtanh.f32 %v3601_v8  ;;  %v1747_v39 = vmul.f32 0.5, %v1741_v49  ;;  %v3982_v47 = vld [vmem:[#allocation32_spill] sm:$0xff]  ;;  %v3983_v49 = vld [vmem:[#allocation33_spill] sm:$0xff] }
 0x6f0   :  { %v3605_v53 = vadd.f32 %v1753_v51, %v1751_v31  ;;  %v3978_v51 = vld [vmem:[#allocation28_spill] sm:$0xff]  ;;  %v3979_v31 = vld [vmem:[#allocation29_spill] sm:$0xff] }
 0x6f2   :  { %2588 = vtanh.f32 %v3605_v53 }
 0x6f9   :  { %v2587_v52 = vpop.eup %2586 }
 0x6fa   :  { %v1758_v7 = vmul.f32 %v2587_v52, %v1744_v50  ;;  %v3984_v52 = vld [vmem:[#allocation34_spill] sm:$0xff] }
 0x6fc   :  { %v2589_v61 = vpop.eup %2588 }
 0x6fd   :  { %v1759_v9 = vmul.f32 %v2589_v61, %v1747_v39 }
 0x6ff   :  { %v1763_v46 = vpack.c.bf16 %v1759_v9, %v1758_v7 }
 0x701   :  { %1797 = vmatmul.mubr.bf16.vlgmr.msra.gmra.mrb[24].mxu0 %v1763_v46  ;;  %1840 = vmatmul.mubr.bf16.vlgmr.msra.gmra.mrb[24].mxu1 %v1763_v46 }
 0x702   :  { %1857 = vmatpush1.bf16.msra.mxu0 %v3396_v33  ;;  %1900 = vmatpush1.bf16.msra.mxu1 %v3399_v11 }
 0x703   :  { %1858 = vmatprep.subr.bf16.mxu0 %v3402_v28  ;;  %1901 = vmatprep.subr.bf16.mxu1 %v3405_v1 }
 0x704   :  { %1888 = vmatprep.mubr.bf16.mxu0 %v3862_v63  ;;  %1931 = vmatprep.mubr.bf16.mxu1 %v3862_v63 }
 0x706   :  { %1859 = vmatpush1.bf16.msra.mxu0 %v3410_v2  ;;  %1902 = vmatpush1.bf16.msra.mxu1 %v3413_v3 }
 0x707   :  { %1860 = vmatprep.subr.bf16.mxu0 %v3416_v18  ;;  %1903 = vmatprep.subr.bf16.mxu1 %v3419_v4 }
 0x70a   :  { %1861 = vmatpush1.bf16.msra.mxu0 %v3422_v5  ;;  %1904 = vmatpush1.bf16.msra.mxu1 %v3425_v6 }
 0x70b   :  { %1862 = vmatprep.subr.bf16.mxu0 %v3428_v35  ;;  %1905 = vmatprep.subr.bf16.mxu1 %v3431_v10 }
 0x70e   :  { %1863 = vmatpush1.bf16.msra.mxu0 %v3434_v29  ;;  %1906 = vmatpush1.bf16.msra.mxu1 %v3437_v57 }
 0x70f   :  { %1864 = vmatprep.subr.bf16.mxu0 %v3440_v25  ;;  %1907 = vmatprep.subr.bf16.mxu1 %v3443_v20 }
 0x712   :  { %1865 = vmatpush1.bf16.msra.mxu0 %v3446_v32  ;;  %1908 = vmatpush1.bf16.msra.mxu1 %v3449_v26 }
 0x713   :  { %1866 = vmatprep.subr.bf16.mxu0 %v3452_v23  ;;  %1909 = vmatprep.subr.bf16.mxu1 %v3455_v13 }
 0x716   :  { %1867 = vmatpush1.bf16.msra.mxu0 %v3937_v24  ;;  %1910 = vmatpush1.bf16.msra.mxu1 %v3938_v60 }
 0x717   :  { %1868 = vmatprep.subr.bf16.mxu0 %v3939_v58  ;;  %1911 = vmatprep.subr.bf16.mxu1 %v3940_v56 }
 0x71a   :  { %1869 = vmatpush1.bf16.msra.mxu0 %v3470_v27  ;;  %1912 = vmatpush1.bf16.msra.mxu1 %v3473_v16 }
 0x71b   :  { %1870 = vmatprep.subr.bf16.mxu0 %v3476_v34  ;;  %1913 = vmatprep.subr.bf16.mxu1 %v3479_v14 }
 0x71e   :  { %1871 = vmatpush1.bf16.msra.mxu0 %v3482_v12  ;;  %1914 = vmatpush1.bf16.msra.mxu1 %v3485_v22 }
 0x71f   :  { %1982 = vmatprep.subr.bf16.mxu0 %v3284_v36  ;;  %2025 = vmatprep.subr.bf16.mxu1 %v3287_v37  ;;  %v3961_v36 = vld [vmem:[#allocation37_spill] sm:$0xff]  ;;  %v3962_v37 = vld [vmem:[#allocation38_spill] sm:$0xff] }
 0x721   :  { %1889 = vmatmul.mubr.bf16.vlgmr.msra.gmra.mrb[24].mxu0 %v2468_v19  ;;  %1932 = vmatmul.mubr.bf16.vlgmr.msra.gmra.mrb[24].mxu1 %v2468_v19 }
 0x722   :  { %1983 = vmatpush1.bf16.msra.mxu0 %v3290_v38  ;;  %2026 = vmatpush1.bf16.msra.mxu1 %v3293_v40  ;;  %v3963_v38 = vld [vmem:[#allocation13_spill] sm:$0xff]  ;;  %v3964_v40 = vld [vmem:[#allocation14_spill] sm:$0xff] }
 0x723   :  { %1984 = vmatprep.subr.bf16.mxu0 %v3296_v41  ;;  %2027 = vmatprep.subr.bf16.mxu1 %v3299_v0  ;;  %v3965_v41 = vld [vmem:[#allocation15_spill] sm:$0xff]  ;;  %v3966_v0 = vld [vmem:[#allocation16_spill] sm:$0xff] }
 0x724   :  { %2014 = vmatprep.mubr.bf16.mxu0 %v3862_v63  ;;  %2057 = vmatprep.mubr.bf16.mxu1 %v3862_v63 }
 0x726   :  { %1985 = vmatpush1.bf16.msra.mxu0 %v3304_v42  ;;  %2028 = vmatpush1.bf16.msra.mxu1 %v3307_v43  ;;  %v3968_v42 = vld [vmem:[#allocation18_spill] sm:$0xff]  ;;  %v3969_v43 = vld [vmem:[#allocation19_spill] sm:$0xff] }
 0x727   :  { %1986 = vmatprep.subr.bf16.mxu0 %v3310_v44  ;;  %2029 = vmatprep.subr.bf16.mxu1 %v3313_v45  ;;  %v3970_v44 = vld [vmem:[#allocation20_spill] sm:$0xff]  ;;  %v3971_v45 = vld [vmem:[#allocation21_spill] sm:$0xff] }
 0x72a   :  { %1987 = vmatpush1.bf16.msra.mxu0 %v3961_v36  ;;  %2030 = vmatpush1.bf16.msra.mxu1 %v3962_v37 }
 0x72b   :  { %1988 = vmatprep.subr.bf16.mxu0 %v3963_v38  ;;  %2031 = vmatprep.subr.bf16.mxu1 %v3964_v40 }
 0x72e   :  { %1989 = vmatpush1.bf16.msra.mxu0 %v3965_v41  ;;  %2032 = vmatpush1.bf16.msra.mxu1 %v3966_v0 }
 0x72f   :  { %1990 = vmatprep.subr.bf16.mxu0 %v3967_v54  ;;  %2033 = vmatprep.subr.bf16.mxu1 %v3968_v42 }
 0x732   :  { %1991 = vmatpush1.bf16.msra.mxu0 %v3969_v43  ;;  %2034 = vmatpush1.bf16.msra.mxu1 %v3970_v44 }
 0x733   :  { %1992 = vmatprep.subr.bf16.mxu0 %v3971_v45  ;;  %2035 = vmatprep.subr.bf16.mxu1 %v3972_v17 }
 0x736   :  { %1993 = vmatpush1.bf16.msra.mxu0 %v3973_v21  ;;  %2036 = vmatpush1.bf16.msra.mxu1 %v3974_v30 }
 0x737   :  { %1994 = vmatprep.subr.bf16.mxu0 %v3975_v15  ;;  %2037 = vmatprep.subr.bf16.mxu1 %v3976_v55 }
 0x73a   :  { %1995 = vmatpush1.bf16.msra.mxu0 %v3977_v62  ;;  %2038 = vmatpush1.bf16.msra.mxu1 %v3978_v51 }
 0x73b   :  { %1996 = vmatprep.subr.bf16.mxu0 %v3979_v31  ;;  %2039 = vmatprep.subr.bf16.mxu1 %v3980_v59 }
 0x73e   :  { %1997 = vmatpush1.bf16.msra.mxu0 %v3981_v48  ;;  %2040 = vmatpush1.bf16.msra.mxu1 %v3982_v47 }
 0x73f   :  { %2074 = vmatprep.subr.bf16.mxu0 %v3983_v49  ;;  %2117 = vmatprep.subr.bf16.mxu1 %v3984_v52 }
 0x7f4   :  { %v1890_v50 = vpop.f32.mrb[24].mxu0  ;;  %v1933_v39 = vpop.f32.mrb[24].mxu1 }
 0x7f5   :  { %v1942_v61 = vmul.f32 0.5, %v1890_v50  ;;  %v1892_v7 = vpop.f32.mrb[25].mxu0  ;;  %v1935_v9 = vpop.f32.mrb[25].mxu1  ;;  %v1944_v42 = vmul.f32 0.5, %v1933_v39 }
 0x7f6   :  { %v1943_v46 = vmul.f32 0.5, %v1892_v7  ;;  %v1894_v19 = vpop.f32.mrb[26].mxu0  ;;  %v1937_v36 = vpop.f32.mrb[26].mxu1 }
 0x7f7   :  { %2590 = vtanh.f32 %v1942_v61  ;;  %v1945_v37 = vmul.f32 0.5, %v1894_v19  ;;  %v1896_v38 = vpop.f32.mrb[27].mxu0  ;;  %v1939_v40 = vpop.f32.mrb[27].mxu1  ;;  %v1947_v44 = vmul.f32 0.5, %v1937_v36 }
 0x7f8   :  { %v1946_v41 = vmul.f32 0.5, %v1896_v38  ;;  %2592 = vtanh.f32 %v1943_v46 }
 0x7f9   :  { %2594 = vtanh.f32 %v1945_v37 }
 0x7fa   :  { %2596 = vtanh.f32 %v1935_v9 }
 0x7fb   :  { %2598 = vtanh.f32 %v1946_v41 }
 0x7fc   :  { %2600 = vtanh.f32 %v1939_v40 }
 0x7fd   :  { %2602 = vtanh.f32 %v1944_v42 }
 0x7fe   :  { %2604 = vtanh.f32 %v1947_v44 }
 0x801   :  { %v2591_v0 = vpop.eup %2590 }
 0x802   :  { %v1954_v54 = vadd.f32 1.0, %v2591_v0  ;;  %v2593_v43 = vpop.eup %2592 }
 0x803   :  { %v2595_v45 = vpop.eup %2594  ;;  %v1955_v21 = vadd.f32 1.0, %v2593_v43 }
 0x804   :  { %v1960_v17 = vmul.f32 0.5, %v1954_v54  ;;  %v2597_v30 = vpop.eup %2596  ;;  %v1957_v15 = vadd.f32 1.0, %v2595_v45 }
 0x805   :  { %v2599_v55 = vpop.eup %2598  ;;  %v1961_v62 = vmul.f32 0.5, %v1955_v21 }
 0x806   :  { %v1970_v51 = vmul.f32 %v2597_v30, %v1960_v17  ;;  %v1963_v31 = vmul.f32 0.5, %v1957_v15  ;;  %v1958_v59 = vadd.f32 1.0, %v2599_v55  ;;  %v2601_v48 = vpop.eup %2600 }
 0x807   :  { %v1968_v47 = vmul.f32 %v1961_v62, %v3601_v8  ;;  %v2603_v7 = vpop.eup %2602 }
 0x808   :  { %v1964_v49 = vmul.f32 0.5, %v1958_v59  ;;  %v1971_v52 = vmul.f32 %v2601_v48, %v1963_v31  ;;  %v2605_v9 = vpop.eup %2604  ;;  %v1956_v46 = vadd.f32 1.0, %v2603_v7 }
 0x809   :  { %v3677_v50 = vadd.f32 %v1970_v51, %v1968_v47  ;;  %v1959_v19 = vadd.f32 1.0, %v2605_v9 }
 0x80a   :  { %v1969_v39 = vmul.f32 %v1964_v49, %v3605_v53  ;;  %v1962_v37 = vmul.f32 0.5, %v1956_v46 }
 0x80b   :  { %2606 = vtanh.f32 %v3677_v50  ;;  %v1965_v38 = vmul.f32 0.5, %v1959_v19 }
 0x80c   :  { %v3681_v61 = vadd.f32 %v1971_v52, %v1969_v39 }
 0x80e   :  { %2608 = vtanh.f32 %v3681_v61 }
 0x815   :  { %v2607_v36 = vpop.eup %2606 }
 0x816   :  { %v1976_v40 = vmul.f32 %v2607_v36, %v1962_v37 }
 0x818   :  { %v2609_v8 = vpop.eup %2608 }
 0x819   :  { %v1977_v41 = vmul.f32 %v2609_v8, %v1965_v38 }
 0x81b   :  { %v1981_v0 = vpack.c.bf16 %v1977_v41, %v1976_v40 }
 0x81d   :  { %2015 = vmatmul.mubr.bf16.vlgmr.msra.gmra.mrb[28].mxu0 %v1981_v0  ;;  %2058 = vmatmul.mubr.bf16.vlgmr.msra.gmra.mrb[28].mxu1 %v1981_v0 }
 0x81e   :  { %2075 = vmatpush1.bf16.msra.mxu0 %v3396_v33  ;;  %2118 = vmatpush1.bf16.msra.mxu1 %v3399_v11 }
 0x81f   :  { %2076 = vmatprep.subr.bf16.mxu0 %v3402_v28  ;;  %2119 = vmatprep.subr.bf16.mxu1 %v3405_v1 }
 0x820   :  { %2106 = vmatprep.mubr.bf16.mxu0 %v3862_v63  ;;  %2149 = vmatprep.mubr.bf16.mxu1 %v3862_v63  ;;  %v2469_v63 = vld [vmem:[#allocation3 + $0x38] sm:$0xff]  }
 0x822   :  { %2077 = vmatpush1.bf16.msra.mxu0 %v3410_v2  ;;  %2120 = vmatpush1.bf16.msra.mxu1 %v3413_v3 }
 0x823   :  { %2078 = vmatprep.subr.bf16.mxu0 %v3416_v18  ;;  %2121 = vmatprep.subr.bf16.mxu1 %v3419_v4 }
 0x826   :  { %2079 = vmatpush1.bf16.msra.mxu0 %v3422_v5  ;;  %2122 = vmatpush1.bf16.msra.mxu1 %v3425_v6 }
 0x827   :  { %2080 = vmatprep.subr.bf16.mxu0 %v3428_v35  ;;  %2123 = vmatprep.subr.bf16.mxu1 %v3431_v10 }
 0x82a   :  { %2081 = vmatpush1.bf16.msra.mxu0 %v3434_v29  ;;  %2124 = vmatpush1.bf16.msra.mxu1 %v3437_v57 }
 0x82b   :  { %2082 = vmatprep.subr.bf16.mxu0 %v3440_v25  ;;  %2125 = vmatprep.subr.bf16.mxu1 %v3443_v20 }
 0x82e   :  { %2083 = vmatpush1.bf16.msra.mxu0 %v3446_v32  ;;  %2126 = vmatpush1.bf16.msra.mxu1 %v3449_v26 }
 0x82f   :  { %2084 = vmatprep.subr.bf16.mxu0 %v3452_v23  ;;  %2127 = vmatprep.subr.bf16.mxu1 %v3455_v13 }
 0x832   :  { %2085 = vmatpush1.bf16.msra.mxu0 %v3937_v24  ;;  %2128 = vmatpush1.bf16.msra.mxu1 %v3938_v60 }
 0x833   :  { %2086 = vmatprep.subr.bf16.mxu0 %v3939_v58  ;;  %2129 = vmatprep.subr.bf16.mxu1 %v3940_v56 }
 0x836   :  { %2087 = vmatpush1.bf16.msra.mxu0 %v3470_v27  ;;  %2130 = vmatpush1.bf16.msra.mxu1 %v3473_v16 }
 0x837   :  { %2088 = vmatprep.subr.bf16.mxu0 %v3476_v34  ;;  %2131 = vmatprep.subr.bf16.mxu1 %v3479_v14 }
 0x83a   :  { %2089 = vmatpush1.bf16.msra.mxu0 %v3482_v12  ;;  %2132 = vmatpush1.bf16.msra.mxu1 %v3485_v22 }
 0x83d   :  { %2107 = vmatmul.mubr.bf16.vlgmr.msra.gmra.mrb[28].mxu0 %v2469_v63  ;;  %2150 = vmatmul.mubr.bf16.vlgmr.msra.gmra.mrb[28].mxu1 %v2469_v63 }
 0x910   :  { %v2108_v33 = vpop.f32.mrb[28].mxu0  ;;  %v2151_v11 = vpop.f32.mrb[28].mxu1 }
 0x911   :  { %v2160_v28 = vmul.f32 0.5, %v2108_v33  ;;  %v2110_v1 = vpop.f32.mrb[29].mxu0  ;;  %v2153_v2 = vpop.f32.mrb[29].mxu1  ;;  %v2162_v29 = vmul.f32 0.5, %v2151_v11 }
 0x912   :  { %v2161_v3 = vmul.f32 0.5, %v2110_v1  ;;  %v2112_v18 = vpop.f32.mrb[30].mxu0  ;;  %v2155_v4 = vpop.f32.mrb[30].mxu1 }
 0x913   :  { %2610 = vtanh.f32 %v2160_v28  ;;  %v2163_v5 = vmul.f32 0.5, %v2112_v18  ;;  %v2114_v6 = vpop.f32.mrb[31].mxu0  ;;  %v2157_v35 = vpop.f32.mrb[31].mxu1  ;;  %v2165_v32 = vmul.f32 0.5, %v2155_v4 }
 0x914   :  { %v2164_v10 = vmul.f32 0.5, %v2114_v6  ;;  %2612 = vtanh.f32 %v2161_v3 }
 0x915   :  { %2614 = vtanh.f32 %v2163_v5 }
 0x916   :  { %2616 = vtanh.f32 %v2153_v2 }
 0x917   :  { %2618 = vtanh.f32 %v2164_v10 }
 0x918   :  { %2620 = vtanh.f32 %v2157_v35 }
 0x919   :  { %2622 = vtanh.f32 %v2162_v29 }
 0x91a   :  { %2624 = vtanh.f32 %v2165_v32 }
 0x91d   :  { %v2611_v57 = vpop.eup %2610 }
 0x91e   :  { %v2172_v25 = vadd.f32 1.0, %v2611_v57  ;;  %v2613_v20 = vpop.eup %2612 }
 0x91f   :  { %v2615_v26 = vpop.eup %2614  ;;  %v2173_v13 = vadd.f32 1.0, %v2613_v20 }
 0x920   :  { %v2178_v23 = vmul.f32 0.5, %v2172_v25  ;;  %v2617_v12 = vpop.eup %2616  ;;  %v2175_v14 = vadd.f32 1.0, %v2615_v26 }
 0x921   :  { %v2619_v22 = vpop.eup %2618  ;;  %v2179_v27 = vmul.f32 0.5, %v2173_v13 }
 0x922   :  { %v2188_v16 = vmul.f32 %v2617_v12, %v2178_v23  ;;  %v2181_v34 = vmul.f32 0.5, %v2175_v14  ;;  %v2176_v24 = vadd.f32 1.0, %v2619_v22  ;;  %v2621_v60 = vpop.eup %2620 }
 0x923   :  { %v2186_v58 = vmul.f32 %v2179_v27, %v3677_v50  ;;  %v2623_v44 = vpop.eup %2622 }
 0x924   :  { %v2182_v56 = vmul.f32 0.5, %v2176_v24  ;;  %v2189_v53 = vmul.f32 %v2621_v60, %v2181_v34  ;;  %v2625_v45 = vpop.eup %2624  ;;  %v2174_v17 = vadd.f32 1.0, %v2623_v44 }
 0x925   :  { %v2190_v54 = vadd.f32 %v2188_v16, %v2186_v58  ;;  %v2177_v21 = vadd.f32 1.0, %v2625_v45 }
 0x926   :  { %v2187_v42 = vmul.f32 %v2182_v56, %v3681_v61  ;;  %v2180_v30 = vmul.f32 0.5, %v2174_v17 }
 0x927   :  { %2626 = vtanh.f32 %v2190_v54  ;;  %v2183_v62 = vmul.f32 0.5, %v2177_v21 }
 0x928   :  { %v2191_v43 = vadd.f32 %v2189_v53, %v2187_v42 }
 0x92a   :  { %2628 = vtanh.f32 %v2191_v43 }
 0x931   :  { %v2627_v15 = vpop.eup %2626 }
 0x932   :  { %v2194_v55 = vmul.f32 %v2627_v15, %v2180_v30 }
 0x934   :  { %v2629_v51 = vpop.eup %2628  ;;  %2196 = vst [vmem:[#allocation9] sm:$0xff] %v2194_v55 }
 0x935   :  { %v2195_v31 = vmul.f32 %v2629_v51, %v2183_v62 }
 0x937   :  { %2197 = vst [vmem:[#allocation9 + $0x8] sm:$0xff] %v2195_v31 }
 0x938   :  { %2771 = shalt.err (!%p2768_p0)
}
 0x939   :  { %s2772_s27 = scalar_lea.hbm %s3733_s3, 256 }
 0x93a   :  { %p2773_p1 = scmp.ne.s32.totalorder %s3733_s3, %s2772_s27  ;;  %p2776_p2 = scmp.lt.u32.totalorder %s2772_s27, %s3733_s3 }
 0x93c   :  { %p2778_p3 = pnand %p2776_p2, %p2773_p1 }
 0x93e   :  { %2781 = shalt.err (!%p2778_p3)
}
 0x93f   :  { %s2798_s5 = smov 128   ;;  %s2799_s6 = smov 8  }
 0x940   :  { %2211 = dma.vmem_to_hbm [thread:$0]  %s2206_s22, 256, %s3733_s3, [#allocation5], %s2798_s5, %s2798_s5, %s2799_s6  }
 0x941   :  { %2786 = dma.done.wait [#allocation5], 256  }
 0x942   :  { %2787 = vsyncadd [#allocation5], 4294967040 }
 0x943   :  { %2215 = vsyncpa [#allocation4], 1 }
 0x944   :  { %2216 = vsyncpa [#allocation7], 1 }
 0x945   :  { %2217 = vsyncpa [#allocation5], 1 }

// kernel: tpu_custom_call.1
= control target key start
LH: loop header
LB: loop body
LE: loop exit
PB: predicated region body
PF: predicated region fallthrough
CT: control target
= control target key end

     0   :  { %8 = vsyncpa [#allocation4], 0  ;;  %s3730_s0 = inlined_call_operand.hbm [shape: bf16[8,16,128], index: 0, kind: input, shape index: {}]   ;;  %s3731_s1 = inlined_call_operand.hbm [shape: bf16[128,512], index: 1, kind: input, shape index: {}]   ;;  %s3732_s2 = inlined_call_operand.hbm [shape: bf16[128,512], index: 2, kind: input, shape index: {}]   ;;  %s3733_s3 = inlined_call_operand.hbm [shape: f32[16,128], index: 3, kind: output, shape index: {}]  }
   0x1   :  { %9 = vsyncpa [#allocation7], 0 }
   0x2   :  { %10 = vsyncpa [#allocation5], 0  ;;  %s2788_s12 = smov [#allocation6]   ;;  %s2694_s16 = scalar_lea.hbm %s3731_s1, 4096 }
   0x3   :  { %s28_s13 = sshll.u32 %s2788_s12, 4  ;;  %p2695_p0 = scmp.ne.s32.totalorder %s3731_s1, %s2694_s16  ;;  %s29_s13 = int_to_ptr.vmem [resolvable:$true] %s28_s13 }
   0x4   :  { %p2698_p1 = scmp.lt.u32.totalorder %s2694_s16, %s3731_s1 }
   0x6   :  { %p2700_p2 = pnand %p2698_p1, %p2695_p0 }
   0x8   :  { %2703 = shalt.err (!%p2700_p2)
}
   0x9   :  { %s2704_s21 = scalar_lea.vmem %s29_s13, 4096  ;;  %p2709_p4 = scmp.lt.s32.totalorder %s29_s13, %s29_s13 }
   0xa   :  { %p2705_p3 = scmp.ne.s32.totalorder %s29_s13, %s2704_s21  ;;  %p2710_p5 = scmp.lt.s32.totalorder %s2704_s21, %s2704_s21 }
   0xc   :  { %p2711_p6 = por %p2710_p5, %p2709_p4 }
   0xe   :  { %p2712_p7 = pnand %p2711_p6, %p2705_p3 }
  0x10   :  { %2715 = shalt.err (!%p2712_p7)
}
  0x11   :  { %s2789_s22 = smov 256   ;;  %s2790_s23 = smov 16  }
  0x12   :  { %34 = dma.hbm_to_vmem [thread:$0]  %s3731_s1, 4096, %s29_s13, [#allocation7], %s2789_s22, %s2789_s22, %s2790_s23  }
  0x13   :  { %s2791_s26 = smov [#allocation3]   ;;  %s2716_s30 = scalar_lea.hbm %s3730_s0, 1024 }
  0x14   :  { %s16_s27 = sshll.u32 %s2791_s26, 4  ;;  %p2717_p8 = scmp.ne.s32.totalorder %s3730_s0, %s2716_s30  ;;  %s17_s27 = int_to_ptr.vmem [resolvable:$true] %s16_s27 }
  0x15   :  { %p2720_p9 = scmp.lt.u32.totalorder %s2716_s30, %s3730_s0 }
  0x17   :  { %p2722_p10 = pnand %p2720_p9, %p2717_p8 }
  0x19   :  { %2725 = shalt.err (!%p2722_p10)
}
  0x1a   :  { %s2726_s8 = scalar_lea.vmem %s17_s27, 1024  ;;  %p2731_p12 = scmp.lt.s32.totalorder %s17_s27, %s17_s27 }
  0x1b   :  { %p2727_p11 = scmp.ne.s32.totalorder %s17_s27, %s2726_s8  ;;  %p2732_p13 = scmp.lt.s32.totalorder %s2726_s8, %s2726_s8 }
  0x1d   :  { %p2733_p0 = por %p2732_p13, %p2731_p12 }
  0x1f   :  { %p2734_p1 = pnand %p2733_p0, %p2727_p11 }
  0x21   :  { %2737 = shalt.err (!%p2734_p1)
}
  0x22   :  { %s2792_s1 = smov 64   ;;  %s2793_s9 = smov 4  }
  0x23   :  { %22 = dma.hbm_to_vmem [thread:$0]  %s3730_s0, 1024, %s17_s27, [#allocation4], %s2792_s1, %s2792_s1, %s2793_s9  }
  0x24   :  { %s2794_s12 = smov [#allocation8]   ;;  %s2738_s16 = scalar_lea.hbm %s3732_s2, 4096 }
  0x25   :  { %s40_s13 = sshll.u32 %s2794_s12, 4  ;;  %p2739_p2 = scmp.ne.s32.totalorder %s3732_s2, %s2738_s16  ;;  %s41_s13 = int_to_ptr.vmem [resolvable:$true] %s40_s13 }
  0x26   :  { %p2742_p3 = scmp.lt.u32.totalorder %s2738_s16, %s3732_s2 }
  0x28   :  { %p2744_p4 = pnand %p2742_p3, %p2739_p2 }
  0x2a   :  { %2747 = shalt.err (!%p2744_p4)
}
  0x2b   :  { %s2748_s21 = scalar_lea.vmem %s41_s13, 4096  ;;  %p2753_p6 = scmp.lt.s32.totalorder %s41_s13, %s41_s13 }
  0x2c   :  { %p2749_p5 = scmp.ne.s32.totalorder %s41_s13, %s2748_s21  ;;  %p2754_p7 = scmp.lt.s32.totalorder %s2748_s21, %s2748_s21 }
  0x2e   :  { %p2755_p8 = por %p2754_p7, %p2753_p6 }
  0x30   :  { %p2756_p9 = pnand %p2755_p8, %p2749_p5 }
  0x32   :  { %2759 = shalt.err (!%p2756_p9)
}
  0x33   :  { %46 = dma.hbm_to_vmem [thread:$0]  %s3732_s2, 4096, %s41_s13, [#allocation7], %s2789_s22, %s2789_s22, %s2790_s23  }
  0x34   :  { %2782 = dma.done.wait [#allocation4], 1024  }
  0x35   :  { %2783 = vsyncadd [#allocation4], 4294966272 }
  0x36   :  { %2784 = dma.done.wait [#allocation7], 8192  }
  0x37   :  { %2785 = vsyncadd [#allocation7], 4294959104  ;;  %v3734_v0 = vmov 0   ;;  %v2864_v1 = vld [vmem:[#allocation8 + $0x4] ss:$16 sps:$4 sm:$0xff]   ;;  %v2796_v39 = vmov 0.0|0.0  }
  0x38   :  { %328 = vmatprep.mubr.bf16.mxu0 %v3734_v0  ;;  %371 = vmatprep.mubr.bf16.mxu1 %v3734_v0  ;;  %v2866_v2 = vld [vmem:[#allocation8 + $0xc] ss:$16 sps:$4 sm:$0xff]   ;;  %v2869_v3 = vld [vmem:[#allocation8] ss:$16 sps:$4 sm:$0xff]   ;;  %v2871_v4 = vld [vmem:[#allocation8 + $0x8] ss:$16 sps:$4 sm:$0xff]  }
  0x39   :  { %296 = vmatprep.subr.bf16.mxu0 %v2864_v1  ;;  %339 = vmatprep.subr.bf16.mxu1 %v2866_v2  ;;  %v2874_v5 = vld [vmem:[#allocation8 + $0x24] ss:$16 sps:$4 sm:$0xff]   ;;  %v2878_v6 = vld [vmem:[#allocation8 + $0x2c] ss:$16 sps:$4 sm:$0xff]   ;;  %v2880_v7 = vld [vmem:[#allocation8 + $0x20] ss:$16 sps:$4 sm:$0xff]  }
  0x3a   :  { %297 = vmatpush1.bf16.msra.mxu0 %v2869_v3  ;;  %340 = vmatpush1.bf16.msra.mxu1 %v2871_v4  ;;  %v2883_v8 = vld [vmem:[#allocation8 + $0x28] ss:$16 sps:$4 sm:$0xff]   ;;  %v2886_v9 = vld [vmem:[#allocation8 + $0x44] ss:$16 sps:$4 sm:$0xff]   ;;  %v2888_v10 = vld [vmem:[#allocation8 + $0x4c] ss:$16 sps:$4 sm:$0xff]  }
  0x3b   :  { %298 = vmatprep.subr.bf16.mxu0 %v2874_v5  ;;  %341 = vmatprep.subr.bf16.mxu1 %v2878_v6  ;;  %v2890_v11 = vld [vmem:[#allocation8 + $0x40] ss:$16 sps:$4 sm:$0xff]   ;;  %v2892_v12 = vld [vmem:[#allocation8 + $0x48] ss:$16 sps:$4 sm:$0xff]   ;;  %v2896_v13 = vld [vmem:[#allocation8 + $0x64] ss:$16 sps:$4 sm:$0xff]  }
  0x3c   :  { %3836 = vst [vmem:[#allocation13_spill] sm:$0xff] %v2890_v11  ;;  %3837 = vst [vmem:[#allocation14_spill] sm:$0xff] %v2892_v12  ;;  %v2900_v14 = vld [vmem:[#allocation8 + $0x6c] ss:$16 sps:$4 sm:$0xff]   ;;  %v2902_v15 = vld [vmem:[#allocation8 + $0x60] ss:$16 sps:$4 sm:$0xff]  }
  0x3d   :  { %3838 = vst [vmem:[#allocation15_spill] sm:$0xff] %v2896_v13  ;;  %3839 = vst [vmem:[#allocation16_spill] sm:$0xff] %v2900_v14  ;;  %v2906_v16 = vld [vmem:[#allocation8 + $0x68] ss:$16 sps:$4 sm:$0xff]   ;;  %v2908_v17 = vld [vmem:[#allocation8 + $0x84] ss:$16 sps:$4 sm:$0xff]  }
  0x3e   :  { %299 = vmatpush1.bf16.msra.mxu0 %v2880_v7  ;;  %342 = vmatpush1.bf16.msra.mxu1 %v2883_v8  ;;  %3840 = vst [vmem:[#allocation17_spill] sm:$0xff] %v2902_v15  ;;  %3841 = vst [vmem:[#allocation18_spill] sm:$0xff] %v2906_v16  ;;  %v2912_v18 = vld [vmem:[#allocation8 + $0x8c] ss:$16 sps:$4 sm:$0xff]   ;;  %v2914_v19 = vld [vmem:[#allocation8 + $0x80] ss:$16 sps:$4 sm:$0xff]  }
  0x3f   :  { %300 = vmatprep.subr.bf16.mxu0 %v2886_v9  ;;  %343 = vmatprep.subr.bf16.mxu1 %v2888_v10  ;;  %3842 = vst [vmem:[#allocation19_spill] sm:$0xff] %v2908_v17  ;;  %3843 = vst [vmem:[#allocation20_spill] sm:$0xff] %v2912_v18  ;;  %v2916_v20 = vld [vmem:[#allocation8 + $0x88] ss:$16 sps:$4 sm:$0xff]   ;;  %v2920_v21 = vld [vmem:[#allocation8 + $0xa4] ss:$16 sps:$4 sm:$0xff]  }
  0x40   :  { %3844 = vst [vmem:[#allocation21_spill] sm:$0xff] %v2914_v19  ;;  %3845 = vst [vmem:[#allocation22_spill] sm:$0xff] %v2916_v20  ;;  %v2924_v22 = vld [vmem:[#allocation8 + $0xac] ss:$16 sps:$4 sm:$0xff]   ;;  %v2926_v23 = vld [vmem:[#allocation8 + $0xa0] ss:$16 sps:$4 sm:$0xff]  }
  0x41   :  { %3846 = vst [vmem:[#allocation23_spill] sm:$0xff] %v2920_v21  ;;  %3847 = vst [vmem:[#allocation24_spill] sm:$0xff] %v2924_v22  ;;  %v2930_v24 = vld [vmem:[#allocation8 + $0xa8] ss:$16 sps:$4 sm:$0xff]   ;;  %v2932_v25 = vld [vmem:[#allocation8 + $0xc4] ss:$16 sps:$4 sm:$0xff]  }
  0x42   :  { %301 = vmatpush1.bf16.msra.mxu0 %v2890_v11  ;;  %344 = vmatpush1.bf16.msra.mxu1 %v2892_v12  ;;  %3848 = vst [vmem:[#allocation25_spill] sm:$0xff] %v2926_v23  ;;  %3849 = vst [vmem:[#allocation26_spill] sm:$0xff] %v2930_v24  ;;  %v2936_v26 = vld [vmem:[#allocation8 + $0xcc] ss:$16 sps:$4 sm:$0xff]   ;;  %v2938_v27 = vld [vmem:[#allocation8 + $0xc0] ss:$16 sps:$4 sm:$0xff]  }
  0x43   :  { %302 = vmatprep.subr.bf16.mxu0 %v2896_v13  ;;  %345 = vmatprep.subr.bf16.mxu1 %v2900_v14  ;;  %3850 = vst [vmem:[#allocation27_spill] sm:$0xff] %v2932_v25  ;;  %3851 = vst [vmem:[#allocation28_spill] sm:$0xff] %v2936_v26  ;;  %v2940_v28 = vld [vmem:[#allocation8 + $0xc8] ss:$16 sps:$4 sm:$0xff]   ;;  %v2944_v29 = vld [vmem:[#allocation8 + $0xe4] ss:$16 sps:$4 sm:$0xff]  }
  0x44   :  { %3852 = vst [vmem:[#allocation29_spill] sm:$0xff] %v2938_v27  ;;  %3853 = vst [vmem:[#allocation30_spill] sm:$0xff] %v2940_v28  ;;  %v2948_v30 = vld [vmem:[#allocation8 + $0xec] ss:$16 sps:$4 sm:$0xff]   ;;  %v2950_v31 = vld [vmem:[#allocation8 + $0xe0] ss:$16 sps:$4 sm:$0xff]  }
  0x45   :  { %3854 = vst [vmem:[#allocation31_spill] sm:$0xff] %v2944_v29  ;;  %3855 = vst [vmem:[#allocation32_spill] sm:$0xff] %v2948_v30  ;;  %v2954_v32 = vld [vmem:[#allocation8 + $0xe8] ss:$16 sps:$4 sm:$0xff]   ;;  %v2956_v33 = vld [vmem:[#allocation6 + $0x4] ss:$16 sps:$4 sm:$0xff]  }
  0x46   :  { %303 = vmatpush1.bf16.msra.mxu0 %v2902_v15  ;;  %346 = vmatpush1.bf16.msra.mxu1 %v2906_v16  ;;  %3856 = vst [vmem:[#allocation33_spill] sm:$0xff] %v2950_v31  ;;  %3857 = vst [vmem:[#allocation34_spill] sm:$0xff] %v2954_v32  ;;  %v2960_v34 = vld [vmem:[#allocation6 + $0xc] ss:$16 sps:$4 sm:$0xff]   ;;  %v2962_v35 = vld [vmem:[#allocation6] ss:$16 sps:$4 sm:$0xff]  }
  0x47   :  { %304 = vmatprep.subr.bf16.mxu0 %v2908_v17  ;;  %347 = vmatprep.subr.bf16.mxu1 %v2912_v18  ;;  %3858 = vst [vmem:[#allocation35_spill] sm:$0xff] %v2956_v33  ;;  %3859 = vst [vmem:[#allocation36_spill] sm:$0xff] %v2960_v34  ;;  %v2964_v36 = vld [vmem:[#allocation6 + $0x8] ss:$16 sps:$4 sm:$0xff]   ;;  %v2968_v37 = vld [vmem:[#allocation6 + $0x24] ss:$16 sps:$4 sm:$0xff]  }
  0x48   :  { %v2972_v38 = vld [vmem:[#allocation6 + $0x2c] ss:$16 sps:$4 sm:$0xff]   ;;  %v2974_v40 = vld [vmem:[#allocation6 + $0x20] ss:$16 sps:$4 sm:$0xff]   ;;  %v2978_v41 = vld [vmem:[#allocation6 + $0x28] ss:$16 sps:$4 sm:$0xff]  }
  0x49   :  { %v2980_v42 = vld [vmem:[#allocation6 + $0x44] ss:$16 sps:$4 sm:$0xff]   ;;  %v2984_v43 = vld [vmem:[#allocation6 + $0x4c] ss:$16 sps:$4 sm:$0xff]   ;;  %v2988_v44 = vld [vmem:[#allocation6 + $0x40] ss:$16 sps:$4 sm:$0xff]  }
  0x4a   :  { %305 = vmatpush1.bf16.msra.mxu0 %v2914_v19  ;;  %348 = vmatpush1.bf16.msra.mxu1 %v2916_v20  ;;  %v2990_v45 = vld [vmem:[#allocation6 + $0x48] ss:$16 sps:$4 sm:$0xff]   ;;  %v2994_v46 = vld [vmem:[#allocation6 + $0x64] ss:$16 sps:$4 sm:$0xff]   ;;  %v2998_v47 = vld [vmem:[#allocation6 + $0x6c] ss:$16 sps:$4 sm:$0xff]  }
  0x4b   :  { %306 = vmatprep.subr.bf16.mxu0 %v2920_v21  ;;  %349 = vmatprep.subr.bf16.mxu1 %v2924_v22  ;;  %v3000_v48 = vld [vmem:[#allocation6 + $0x60] ss:$16 sps:$4 sm:$0xff]   ;;  %v3002_v49 = vld [vmem:[#allocation6 + $0x68] ss:$16 sps:$4 sm:$0xff]   ;;  %v3004_v50 = vld [vmem:[#allocation6 + $0x84] ss:$16 sps:$4 sm:$0xff]  }
  0x4c   :  { %v3006_v51 = vld [vmem:[#allocation6 + $0x8c] ss:$16 sps:$4 sm:$0xff]   ;;  %v3014_v52 = vld [vmem:[#allocation6 + $0x80] ss:$16 sps:$4 sm:$0xff]   ;;  %v3016_v53 = vld [vmem:[#allocation6 + $0x88] ss:$16 sps:$4 sm:$0xff]  }
  0x4d   :  { %v3020_v54 = vld [vmem:[#allocation6 + $0xa4] ss:$16 sps:$4 sm:$0xff]   ;;  %v3022_v55 = vld [vmem:[#allocation6 + $0xac] ss:$16 sps:$4 sm:$0xff]   ;;  %v3026_v56 = vld [vmem:[#allocation6 + $0xa0] ss:$16 sps:$4 sm:$0xff]  }
  0x4e   :  { %307 = vmatpush1.bf16.msra.mxu0 %v2926_v23  ;;  %350 = vmatpush1.bf16.msra.mxu1 %v2930_v24  ;;  %v3028_v57 = vld [vmem:[#allocation6 + $0xa8] ss:$16 sps:$4 sm:$0xff]   ;;  %v3032_v58 = vld [vmem:[#allocation6 + $0xc4] ss:$16 sps:$4 sm:$0xff]   ;;  %v3034_v59 = vld [vmem:[#allocation6 + $0xcc] ss:$16 sps:$4 sm:$0xff]  }
  0x4f   :  { %308 = vmatprep.subr.bf16.mxu0 %v2932_v25  ;;  %351 = vmatprep.subr.bf16.mxu1 %v2936_v26  ;;  %3860 = vst [vmem:[#allocation37_spill] sm:$0xff] %v3028_v57  ;;  %v3038_v60 = vld [vmem:[#allocation6 + $0xc0] ss:$16 sps:$4 sm:$0xff]   ;;  %v3040_v61 = vld [vmem:[#allocation6 + $0xc8] ss:$16 sps:$4 sm:$0xff]   ;;  %s2797_s2 = smov [#allocation9]  }
  0x50   :  { %v3044_v62 = vld [vmem:[#allocation6 + $0xe4] ss:$16 sps:$4 sm:$0xff]   ;;  %v3046_v63 = vld [vmem:[#allocation6 + $0xec] ss:$16 sps:$4 sm:$0xff]   ;;  %s2205_s22 = sshll.u32 %s2797_s2, 4  ;;  %s2206_s22 = int_to_ptr.vmem [resolvable:$true] %s2205_s22 }
  0x51   :  { %3861 = vst [vmem:[#allocation38_spill] sm:$0xff] %v3046_v63  ;;  %s2760_s23 = scalar_lea.vmem %s2206_s22, 256  ;;  %p2765_p11 = scmp.lt.s32.totalorder %s2206_s22, %s2206_s22 }
  0x52   :  { %309 = vmatpush1.bf16.msra.mxu0 %v2938_v27  ;;  %352 = vmatpush1.bf16.msra.mxu1 %v2940_v28  ;;  %p2761_p10 = scmp.ne.s32.totalorder %s2206_s22, %s2760_s23  ;;  %p2766_p12 = scmp.lt.s32.totalorder %s2760_s23, %s2760_s23 }
  0x53   :  { %310 = vmatprep.subr.bf16.mxu0 %v2944_v29  ;;  %353 = vmatprep.subr.bf16.mxu1 %v2948_v30 }
  0x54   :  { %p2767_p13 = por %p2766_p12, %p2765_p11 }
  0x56   :  { %311 = vmatpush1.bf16.msra.mxu0 %v2950_v31  ;;  %354 = vmatpush1.bf16.msra.mxu1 %v2954_v32  ;;  %p2768_p0 = pnand %p2767_p13, %p2761_p10 }
  0x57   :  { %548 = vmatprep.subr.bf16.mxu0 %v2956_v33  ;;  %591 = vmatprep.subr.bf16.mxu1 %v2960_v34 }
  0x59   :  { %329 = vmatmul.mubr.bf16.vlgmr.msra.gmra.mrb[0].mxu0 %v2796_v39  ;;  %372 = vmatmul.mubr.bf16.vlgmr.msra.gmra.mrb[0].mxu1 %v2796_v39  ;;  %v3050_v39 = vld [vmem:[#allocation6 + $0xe0] ss:$16 sps:$4 sm:$0xff]  }
  0x5a   :  { %549 = vmatpush1.bf16.msra.mxu0 %v2962_v35  ;;  %592 = vmatpush1.bf16.msra.mxu1 %v2964_v36 }
  0x5b   :  { %550 = vmatprep.subr.bf16.mxu0 %v2968_v37  ;;  %593 = vmatprep.subr.bf16.mxu1 %v2972_v38 }
  0x5c   :  { %580 = vmatprep.mubr.bf16.mxu0 %v3734_v0  ;;  %623 = vmatprep.mubr.bf16.mxu1 %v3734_v0  ;;  %v3052_v0 = vld [vmem:[#allocation6 + $0xe8] ss:$16 sps:$4 sm:$0xff]  }
  0x5e   :  { %551 = vmatpush1.bf16.msra.mxu0 %v2974_v40  ;;  %594 = vmatpush1.bf16.msra.mxu1 %v2978_v41 }
  0x5f   :  { %552 = vmatprep.subr.bf16.mxu0 %v2980_v42  ;;  %595 = vmatprep.subr.bf16.mxu1 %v2984_v43 }
  0x62   :  { %553 = vmatpush1.bf16.msra.mxu0 %v2988_v44  ;;  %596 = vmatpush1.bf16.msra.mxu1 %v2990_v45 }
  0x63   :  { %554 = vmatprep.subr.bf16.mxu0 %v2994_v46  ;;  %597 = vmatprep.subr.bf16.mxu1 %v2998_v47 }
  0x66   :  { %555 = vmatpush1.bf16.msra.mxu0 %v3000_v48  ;;  %598 = vmatpush1.bf16.msra.mxu1 %v3002_v49 }
  0x67   :  { %556 = vmatprep.subr.bf16.mxu0 %v3004_v50  ;;  %599 = vmatprep.subr.bf16.mxu1 %v3006_v51 }
  0x6a   :  { %557 = vmatpush1.bf16.msra.mxu0 %v3014_v52  ;;  %600 = vmatpush1.bf16.msra.mxu1 %v3016_v53 }
  0x6b   :  { %558 = vmatprep.subr.bf16.mxu0 %v3020_v54  ;;  %601 = vmatprep.subr.bf16.mxu1 %v3022_v55 }
  0x6e   :  { %559 = vmatpush1.bf16.msra.mxu0 %v3026_v56  ;;  %602 = vmatpush1.bf16.msra.mxu1 %v3028_v57  ;;  %v2462_v57 = vld [vmem:[#allocation3] sm:$0xff]  }
  0x6f   :  { %560 = vmatprep.subr.bf16.mxu0 %v3032_v58  ;;  %603 = vmatprep.subr.bf16.mxu1 %v3034_v59 }
  0x72   :  { %561 = vmatpush1.bf16.msra.mxu0 %v3038_v60  ;;  %604 = vmatpush1.bf16.msra.mxu1 %v3040_v61 }
  0x73   :  { %562 = vmatprep.subr.bf16.mxu0 %v3044_v62  ;;  %605 = vmatprep.subr.bf16.mxu1 %v3046_v63  ;;  %v3862_v63 = vmov 0  }
  0x76   :  { %563 = vmatpush1.bf16.msra.mxu0 %v3050_v39  ;;  %606 = vmatpush1.bf16.msra.mxu1 %v3052_v0 }
  0x77   :  { %674 = vmatprep.subr.bf16.mxu0 %v2864_v1  ;;  %717 = vmatprep.subr.bf16.mxu1 %v2866_v2 }
  0x79   :  { %581 = vmatmul.mubr.bf16.vlgmr.msra.gmra.mrb[0].mxu0 %v2462_v57  ;;  %624 = vmatmul.mubr.bf16.vlgmr.msra.gmra.mrb[0].mxu1 %v2462_v57 }
  0x7a   :  { %675 = vmatpush1.bf16.msra.mxu0 %v2869_v3  ;;  %718 = vmatpush1.bf16.msra.mxu1 %v2871_v4 }
  0x7b   :  { %676 = vmatprep.subr.bf16.mxu0 %v2874_v5  ;;  %719 = vmatprep.subr.bf16.mxu1 %v2878_v6 }
  0x7c   :  { %706 = vmatprep.mubr.bf16.mxu0 %v3862_v63  ;;  %749 = vmatprep.mubr.bf16.mxu1 %v3862_v63 }
  0x7e   :  { %677 = vmatpush1.bf16.msra.mxu0 %v2880_v7  ;;  %720 = vmatpush1.bf16.msra.mxu1 %v2883_v8 }
  0x7f   :  { %678 = vmatprep.subr.bf16.mxu0 %v2886_v9  ;;  %721 = vmatprep.subr.bf16.mxu1 %v2888_v10 }
  0x82   :  { %679 = vmatpush1.bf16.msra.mxu0 %v2890_v11  ;;  %722 = vmatpush1.bf16.msra.mxu1 %v2892_v12 }
  0x83   :  { %680 = vmatprep.subr.bf16.mxu0 %v2896_v13  ;;  %723 = vmatprep.subr.bf16.mxu1 %v2900_v14 }
  0x86   :  { %681 = vmatpush1.bf16.msra.mxu0 %v2902_v15  ;;  %724 = vmatpush1.bf16.msra.mxu1 %v2906_v16 }
  0x87   :  { %682 = vmatprep.subr.bf16.mxu0 %v2908_v17  ;;  %725 = vmatprep.subr.bf16.mxu1 %v2912_v18 }
  0x8a   :  { %683 = vmatpush1.bf16.msra.mxu0 %v2914_v19  ;;  %726 = vmatpush1.bf16.msra.mxu1 %v2916_v20 }
  0x8b   :  { %684 = vmatprep.subr.bf16.mxu0 %v2920_v21  ;;  %727 = vmatprep.subr.bf16.mxu1 %v2924_v22 }
  0x8e   :  { %685 = vmatpush1.bf16.msra.mxu0 %v2926_v23  ;;  %728 = vmatpush1.bf16.msra.mxu1 %v2930_v24 }
  0x8f   :  { %686 = vmatprep.subr.bf16.mxu0 %v2932_v25  ;;  %729 = vmatprep.subr.bf16.mxu1 %v2936_v26 }
  0x92   :  { %687 = vmatpush1.bf16.msra.mxu0 %v2938_v27  ;;  %730 = vmatpush1.bf16.msra.mxu1 %v2940_v28 }
  0x93   :  { %688 = vmatprep.subr.bf16.mxu0 %v2944_v29  ;;  %731 = vmatprep.subr.bf16.mxu1 %v2948_v30 }
  0x96   :  { %689 = vmatpush1.bf16.msra.mxu0 %v2950_v31  ;;  %732 = vmatpush1.bf16.msra.mxu1 %v2954_v32 }
  0x97   :  { %766 = vmatprep.subr.bf16.mxu0 %v2956_v33  ;;  %809 = vmatprep.subr.bf16.mxu1 %v2960_v34 }
 0x14c   :  { %v582_v57 = vpop.f32.mrb[0].mxu0  ;;  %v625_v25 = vpop.f32.mrb[0].mxu1 }
 0x14d   :  { %v634_v24 = vmul.f32 0.5, %v582_v57  ;;  %v584_v26 = vpop.f32.mrb[1].mxu0  ;;  %v627_v23 = vpop.f32.mrb[1].mxu1  ;;  %v636_v32 = vmul.f32 0.5, %v625_v25 }
 0x14e   :  { %v635_v27 = vmul.f32 0.5, %v584_v26  ;;  %v586_v22 = vpop.f32.mrb[2].mxu0  ;;  %v629_v28 = vpop.f32.mrb[2].mxu1 }
 0x14f   :  { %2470 = vtanh.f32 %v634_v24  ;;  %v637_v29 = vmul.f32 0.5, %v586_v22  ;;  %v588_v21 = vpop.f32.mrb[3].mxu0  ;;  %v631_v30 = vpop.f32.mrb[3].mxu1  ;;  %v639_v57 = vmul.f32 0.5, %v629_v28 }
 0x150   :  { %v638_v20 = vmul.f32 0.5, %v588_v21  ;;  %2472 = vtanh.f32 %v635_v27 }
 0x151   :  { %2474 = vtanh.f32 %v637_v29 }
 0x152   :  { %2476 = vtanh.f32 %v627_v23 }
 0x153   :  { %2478 = vtanh.f32 %v638_v20 }
 0x154   :  { %2480 = vtanh.f32 %v631_v30 }
 0x155   :  { %2482 = vtanh.f32 %v636_v32 }
 0x156   :  { %2484 = vtanh.f32 %v639_v57 }
 0x159   :  { %v2471_v33 = vpop.eup %2470 }
 0x15a   :  { %v646_v34 = vadd.f32 1.0, %v2471_v33  ;;  %v2473_v31 = vpop.eup %2472 }
 0x15b   :  { %v2475_v19 = vpop.eup %2474  ;;  %v647_v26 = vadd.f32 1.0, %v2473_v31 }
 0x15c   :  { %v652_v18 = vmul.f32 0.5, %v646_v34  ;;  %v2477_v17 = vpop.eup %2476  ;;  %v649_v16 = vadd.f32 1.0, %v2475_v19 }
 0x15d   :  { %v2479_v24 = vpop.eup %2478  ;;  %v653_v22 = vmul.f32 0.5, %v647_v26 }
 0x15e   :  { %v662_v15 = vmul.f32 %v2477_v17, %v652_v18  ;;  %v655_v21 = vmul.f32 0.5, %v649_v16  ;;  %v650_v27 = vadd.f32 1.0, %v2479_v24  ;;  %v2481_v23 = vpop.eup %2480 }
 0x15f   :  { %v660_v20 = vmul.f32 0.0, %v653_v22  ;;  %v2483_v19 = vpop.eup %2482 }
 0x160   :  { %v656_v29 = vmul.f32 0.5, %v650_v27  ;;  %v663_v30 = vmul.f32 %v2481_v23, %v655_v21  ;;  %v2485_v31 = vpop.eup %2484  ;;  %v648_v32 = vadd.f32 1.0, %v2483_v19  ;;  %v3864_v21 = vld [vmem:[#allocation38_spill] sm:$0xff]  ;;  %v2463_v27 = vld [vmem:[#allocation3 + $0x8] sm:$0xff]   ;;  %v3865_v23 = vld [vmem:[#allocation17_spill] sm:$0xff] }
 0x161   :  { %v3094_v33 = vadd.f32 %v662_v15, %v660_v20  ;;  %v651_v17 = vadd.f32 1.0, %v2485_v31  ;;  %v3863_v15 = vld [vmem:[#allocation37_spill] sm:$0xff]  ;;  %v3866_v20 = vld [vmem:[#allocation18_spill] sm:$0xff]  ;;  %v3871_v31 = vld [vmem:[#allocation23_spill] sm:$0xff] }
 0x162   :  { %v661_v25 = vmul.f32 0.0, %v656_v29  ;;  %v654_v18 = vmul.f32 0.5, %v648_v32  ;;  %v3867_v29 = vld [vmem:[#allocation19_spill] sm:$0xff]  ;;  %v3870_v19 = vld [vmem:[#allocation22_spill] sm:$0xff]  ;;  %v3872_v32 = vld [vmem:[#allocation24_spill] sm:$0xff] }
 0x163   :  { %2486 = vtanh.f32 %v3094_v33  ;;  %v657_v34 = vmul.f32 0.5, %v651_v17  ;;  %v3873_v17 = vld [vmem:[#allocation25_spill] sm:$0xff] }
 0x164   :  { %v3097_v28 = vadd.f32 %v663_v30, %v661_v25  ;;  %v3868_v30 = vld [vmem:[#allocation20_spill] sm:$0xff]  ;;  %v3869_v25 = vld [vmem:[#allocation21_spill] sm:$0xff] }
 0x166   :  { %2488 = vtanh.f32 %v3097_v28 }
 0x16d   :  { %v2487_v16 = vpop.eup %2486 }
 0x16e   :  { %v668_v26 = vmul.f32 %v2487_v16, %v654_v18  ;;  %v3874_v16 = vld [vmem:[#allocation26_spill] sm:$0xff]  ;;  %v3875_v18 = vld [vmem:[#allocation27_spill] sm:$0xff] }
 0x170   :  { %v2489_v57 = vpop.eup %2488 }
 0x171   :  { %v669_v24 = vmul.f32 %v2489_v57, %v657_v34  ;;  %v3876_v34 = vld [vmem:[#allocation28_spill] sm:$0xff]  ;;  %v3877_v57 = vld [vmem:[#allocation29_spill] sm:$0xff] }
 0x173   :  { %v673_v22 = vpack.c.bf16 %v669_v24, %v668_v26  ;;  %v3878_v26 = vld [vmem:[#allocation30_spill] sm:$0xff]  ;;  %v3879_v24 = vld [vmem:[#allocation31_spill] sm:$0xff] }
 0x175   :  { %707 = vmatmul.mubr.bf16.vlgmr.msra.gmra.mrb[4].mxu0 %v673_v22  ;;  %750 = vmatmul.mubr.bf16.vlgmr.msra.gmra.mrb[4].mxu1 %v673_v22  ;;  %v3880_v22 = vld [vmem:[#allocation32_spill] sm:$0xff] }
 0x176   :  { %767 = vmatpush1.bf16.msra.mxu0 %v2962_v35  ;;  %810 = vmatpush1.bf16.msra.mxu1 %v2964_v36 }
 0x177   :  { %768 = vmatprep.subr.bf16.mxu0 %v2968_v37  ;;  %811 = vmatprep.subr.bf16.mxu1 %v2972_v38 }
 0x178   :  { %798 = vmatprep.mubr.bf16.mxu0 %v3862_v63  ;;  %841 = vmatprep.mubr.bf16.mxu1 %v3862_v63 }
 0x17a   :  { %769 = vmatpush1.bf16.msra.mxu0 %v2974_v40  ;;  %812 = vmatpush1.bf16.msra.mxu1 %v2978_v41 }
 0x17b   :  { %770 = vmatprep.subr.bf16.mxu0 %v2980_v42  ;;  %813 = vmatprep.subr.bf16.mxu1 %v2984_v43 }
 0x17e   :  { %771 = vmatpush1.bf16.msra.mxu0 %v2988_v44  ;;  %814 = vmatpush1.bf16.msra.mxu1 %v2990_v45 }
 0x17f   :  { %772 = vmatprep.subr.bf16.mxu0 %v2994_v46  ;;  %815 = vmatprep.subr.bf16.mxu1 %v2998_v47 }
 0x182   :  { %773 = vmatpush1.bf16.msra.mxu0 %v3000_v48  ;;  %816 = vmatpush1.bf16.msra.mxu1 %v3002_v49 }
 0x183   :  { %774 = vmatprep.subr.bf16.mxu0 %v3004_v50  ;;  %817 = vmatprep.subr.bf16.mxu1 %v3006_v51 }
 0x186   :  { %775 = vmatpush1.bf16.msra.mxu0 %v3014_v52  ;;  %818 = vmatpush1.bf16.msra.mxu1 %v3016_v53 }
 0x187   :  { %776 = vmatprep.subr.bf16.mxu0 %v3020_v54  ;;  %819 = vmatprep.subr.bf16.mxu1 %v3022_v55 }
 0x18a   :  { %777 = vmatpush1.bf16.msra.mxu0 %v3026_v56  ;;  %820 = vmatpush1.bf16.msra.mxu1 %v3863_v15 }
 0x18b   :  { %778 = vmatprep.subr.bf16.mxu0 %v3032_v58  ;;  %821 = vmatprep.subr.bf16.mxu1 %v3034_v59 }
 0x18e   :  { %779 = vmatpush1.bf16.msra.mxu0 %v3038_v60  ;;  %822 = vmatpush1.bf16.msra.mxu1 %v3040_v61 }
 0x18f   :  { %780 = vmatprep.subr.bf16.mxu0 %v3044_v62  ;;  %823 = vmatprep.subr.bf16.mxu1 %v3864_v21 }
 0x192   :  { %781 = vmatpush1.bf16.msra.mxu0 %v3050_v39  ;;  %824 = vmatpush1.bf16.msra.mxu1 %v3052_v0 }
 0x193   :  { %892 = vmatprep.subr.bf16.mxu0 %v2864_v1  ;;  %935 = vmatprep.subr.bf16.mxu1 %v2866_v2 }
 0x195   :  { %799 = vmatmul.mubr.bf16.vlgmr.msra.gmra.mrb[4].mxu0 %v2463_v27  ;;  %842 = vmatmul.mubr.bf16.vlgmr.msra.gmra.mrb[4].mxu1 %v2463_v27  ;;  %v3881_v27 = vld [vmem:[#allocation33_spill] sm:$0xff] }
 0x196   :  { %893 = vmatpush1.bf16.msra.mxu0 %v2869_v3  ;;  %936 = vmatpush1.bf16.msra.mxu1 %v2871_v4 }
 0x197   :  { %894 = vmatprep.subr.bf16.mxu0 %v2874_v5  ;;  %937 = vmatprep.subr.bf16.mxu1 %v2878_v6 }
 0x198   :  { %924 = vmatprep.mubr.bf16.mxu0 %v3862_v63  ;;  %967 = vmatprep.mubr.bf16.mxu1 %v3862_v63 }
 0x19a   :  { %895 = vmatpush1.bf16.msra.mxu0 %v2880_v7  ;;  %938 = vmatpush1.bf16.msra.mxu1 %v2883_v8 }
 0x19b   :  { %896 = vmatprep.subr.bf16.mxu0 %v2886_v9  ;;  %939 = vmatprep.subr.bf16.mxu1 %v2888_v10 }
 0x19e   :  { %897 = vmatpush1.bf16.msra.mxu0 %v2890_v11  ;;  %940 = vmatpush1.bf16.msra.mxu1 %v2892_v12 }
 0x19f   :  { %898 = vmatprep.subr.bf16.mxu0 %v2896_v13  ;;  %941 = vmatprep.subr.bf16.mxu1 %v2900_v14 }
 0x1a2   :  { %899 = vmatpush1.bf16.msra.mxu0 %v3865_v23  ;;  %942 = vmatpush1.bf16.msra.mxu1 %v3866_v20 }
 0x1a3   :  { %900 = vmatprep.subr.bf16.mxu0 %v3867_v29  ;;  %943 = vmatprep.subr.bf16.mxu1 %v3868_v30 }
 0x1a6   :  { %901 = vmatpush1.bf16.msra.mxu0 %v3869_v25  ;;  %944 = vmatpush1.bf16.msra.mxu1 %v3870_v19 }
 0x1a7   :  { %902 = vmatprep.subr.bf16.mxu0 %v3871_v31  ;;  %945 = vmatprep.subr.bf16.mxu1 %v3872_v32  ;;  %v3882_v31 = vld [vmem:[#allocation34_spill] sm:$0xff]  ;;  %v3883_v32 = vld [vmem:[#allocation35_spill] sm:$0xff] }
 0x1aa   :  { %903 = vmatpush1.bf16.msra.mxu0 %v3873_v17  ;;  %946 = vmatpush1.bf16.msra.mxu1 %v3874_v16  ;;  %v3884_v17 = vld [vmem:[#allocation36_spill] sm:$0xff] }
 0x1ab   :  { %904 = vmatprep.subr.bf16.mxu0 %v3875_v18  ;;  %947 = vmatprep.subr.bf16.mxu1 %v3876_v34 }
 0x1ae   :  { %905 = vmatpush1.bf16.msra.mxu0 %v3877_v57  ;;  %948 = vmatpush1.bf16.msra.mxu1 %v3878_v26 }
 0x1af   :  { %906 = vmatprep.subr.bf16.mxu0 %v3879_v24  ;;  %949 = vmatprep.subr.bf16.mxu1 %v3880_v22 }
 0x1b2   :  { %907 = vmatpush1.bf16.msra.mxu0 %v3881_v27  ;;  %950 = vmatpush1.bf16.msra.mxu1 %v3882_v31 }
 0x1b3   :  { %984 = vmatprep.subr.bf16.mxu0 %v3883_v32  ;;  %1027 = vmatprep.subr.bf16.mxu1 %v3884_v17 }
 0x268   :  { %v800_v16 = vpop.f32.mrb[4].mxu0  ;;  %v843_v18 = vpop.f32.mrb[4].mxu1 }
 0x269   :  { %v852_v19 = vmul.f32 0.5, %v800_v16  ;;  %v802_v34 = vpop.f32.mrb[5].mxu0  ;;  %v845_v25 = vpop.f32.mrb[5].mxu1  ;;  %v854_v31 = vmul.f32 0.5, %v843_v18 }
 0x26a   :  { %v853_v57 = vmul.f32 0.5, %v802_v34  ;;  %v804_v30 = vpop.f32.mrb[6].mxu0  ;;  %v847_v26 = vpop.f32.mrb[6].mxu1 }
 0x26b   :  { %2490 = vtanh.f32 %v852_v19  ;;  %v855_v24 = vmul.f32 0.5, %v804_v30  ;;  %v806_v29 = vpop.f32.mrb[7].mxu0  ;;  %v849_v22 = vpop.f32.mrb[7].mxu1  ;;  %v857_v16 = vmul.f32 0.5, %v847_v26 }
 0x26c   :  { %v856_v20 = vmul.f32 0.5, %v806_v29  ;;  %2492 = vtanh.f32 %v853_v57 }
 0x26d   :  { %2494 = vtanh.f32 %v855_v24 }
 0x26e   :  { %2496 = vtanh.f32 %v845_v25 }
 0x26f   :  { %2498 = vtanh.f32 %v856_v20 }
 0x270   :  { %2500 = vtanh.f32 %v849_v22 }
 0x271   :  { %2502 = vtanh.f32 %v854_v31 }
 0x272   :  { %2504 = vtanh.f32 %v857_v16 }
 0x275   :  { %v2491_v32 = vpop.eup %2490 }
 0x276   :  { %v864_v17 = vadd.f32 1.0, %v2491_v32  ;;  %v2493_v27 = vpop.eup %2492 }
 0x277   :  { %v2495_v23 = vpop.eup %2494  ;;  %v865_v34 = vadd.f32 1.0, %v2493_v27 }
 0x278   :  { %v870_v14 = vmul.f32 0.5, %v864_v17  ;;  %v2497_v13 = vpop.eup %2496  ;;  %v867_v12 = vadd.f32 1.0, %v2495_v23 }
 0x279   :  { %v2499_v19 = vpop.eup %2498  ;;  %v871_v30 = vmul.f32 0.5, %v865_v34 }
 0x27a   :  { %v880_v11 = vmul.f32 %v2497_v13, %v870_v14  ;;  %v873_v29 = vmul.f32 0.5, %v867_v12  ;;  %v868_v57 = vadd.f32 1.0, %v2499_v19  ;;  %v2501_v25 = vpop.eup %2500  ;;  %v3891_v19 = vld [vmem:[#allocation19_spill] sm:$0xff] }
 0x27b   :  { %v878_v20 = vmul.f32 %v871_v30, %v3094_v33  ;;  %v2503_v23 = vpop.eup %2502  ;;  %v3896_v30 = vld [vmem:[#allocation24_spill] sm:$0xff] }
 0x27c   :  { %v874_v24 = vmul.f32 0.5, %v868_v57  ;;  %v881_v32 = vmul.f32 %v2501_v25, %v873_v29  ;;  %v2505_v13 = vpop.eup %2504  ;;  %v866_v12 = vadd.f32 1.0, %v2503_v23  ;;  %v3897_v29 = vld [vmem:[#allocation25_spill] sm:$0xff]  ;;  %v3898_v57 = vld [vmem:[#allocation26_spill] sm:$0xff]  ;;  %v3899_v25 = vld [vmem:[#allocation27_spill] sm:$0xff] }
 0x27d   :  { %v3169_v18 = vadd.f32 %v880_v11, %v878_v20  ;;  %v869_v14 = vadd.f32 1.0, %v2505_v13  ;;  %v3900_v20 = vld [vmem:[#allocation28_spill] sm:$0xff]  ;;  %v3905_v13 = vld [vmem:[#allocation33_spill] sm:$0xff] }
 0x27e   :  { %v879_v26 = vmul.f32 %v874_v24, %v3097_v28  ;;  %v872_v22 = vmul.f32 0.5, %v866_v12  ;;  %v2464_v28 = vld [vmem:[#allocation3 + $0x10] sm:$0xff]   ;;  %v3904_v23 = vld [vmem:[#allocation32_spill] sm:$0xff]  ;;  %v3906_v12 = vld [vmem:[#allocation34_spill] sm:$0xff] }
 0x27f   :  { %2506 = vtanh.f32 %v3169_v18  ;;  %v875_v27 = vmul.f32 0.5, %v869_v14  ;;  %v3901_v24 = vld [vmem:[#allocation29_spill] sm:$0xff]  ;;  %v3907_v14 = vld [vmem:[#allocation35_spill] sm:$0xff] }
 0x280   :  { %v3173_v17 = vadd.f32 %v881_v32, %v879_v26  ;;  %v3902_v32 = vld [vmem:[#allocation30_spill] sm:$0xff]  ;;  %v3903_v26 = vld [vmem:[#allocation31_spill] sm:$0xff] }
 0x282   :  { %2508 = vtanh.f32 %v3173_v17 }
 0x289   :  { %v2507_v31 = vpop.eup %2506 }
 0x28a   :  { %v886_v16 = vmul.f32 %v2507_v31, %v872_v22  ;;  %v3908_v31 = vld [vmem:[#allocation36_spill] sm:$0xff] }
 0x28c   :  { %v2509_v33 = vpop.eup %2508 }
 0x28d   :  { %v887_v34 = vmul.f32 %v2509_v33, %v875_v27 }
 0x28f   :  { %v891_v11 = vpack.c.bf16 %v887_v34, %v886_v16 }
 0x291   :  { %925 = vmatmul.mubr.bf16.vlgmr.msra.gmra.mrb[8].mxu0 %v891_v11  ;;  %968 = vmatmul.mubr.bf16.vlgmr.msra.gmra.mrb[8].mxu1 %v891_v11 }
 0x292   :  { %985 = vmatpush1.bf16.msra.mxu0 %v2962_v35  ;;  %1028 = vmatpush1.bf16.msra.mxu1 %v2964_v36 }
 0x293   :  { %986 = vmatprep.subr.bf16.mxu0 %v2968_v37  ;;  %1029 = vmatprep.subr.bf16.mxu1 %v2972_v38 }
 0x294   :  { %1016 = vmatprep.mubr.bf16.mxu0 %v3862_v63  ;;  %1059 = vmatprep.mubr.bf16.mxu1 %v3862_v63 }
 0x296   :  { %987 = vmatpush1.bf16.msra.mxu0 %v2974_v40  ;;  %1030 = vmatpush1.bf16.msra.mxu1 %v2978_v41 }
 0x297   :  { %988 = vmatprep.subr.bf16.mxu0 %v2980_v42  ;;  %1031 = vmatprep.subr.bf16.mxu1 %v2984_v43 }
 0x29a   :  { %989 = vmatpush1.bf16.msra.mxu0 %v2988_v44  ;;  %1032 = vmatpush1.bf16.msra.mxu1 %v2990_v45 }
 0x29b   :  { %990 = vmatprep.subr.bf16.mxu0 %v2994_v46  ;;  %1033 = vmatprep.subr.bf16.mxu1 %v2998_v47 }
 0x29e   :  { %991 = vmatpush1.bf16.msra.mxu0 %v3000_v48  ;;  %1034 = vmatpush1.bf16.msra.mxu1 %v3002_v49 }
 0x29f   :  { %992 = vmatprep.subr.bf16.mxu0 %v3004_v50  ;;  %1035 = vmatprep.subr.bf16.mxu1 %v3006_v51 }
 0x2a2   :  { %993 = vmatpush1.bf16.msra.mxu0 %v3014_v52  ;;  %1036 = vmatpush1.bf16.msra.mxu1 %v3016_v53 }
 0x2a3   :  { %994 = vmatprep.subr.bf16.mxu0 %v3020_v54  ;;  %1037 = vmatprep.subr.bf16.mxu1 %v3022_v55 }
 0x2a6   :  { %995 = vmatpush1.bf16.msra.mxu0 %v3026_v56  ;;  %1038 = vmatpush1.bf16.msra.mxu1 %v3863_v15 }
 0x2a7   :  { %996 = vmatprep.subr.bf16.mxu0 %v3032_v58  ;;  %1039 = vmatprep.subr.bf16.mxu1 %v3034_v59 }
 0x2aa   :  { %997 = vmatpush1.bf16.msra.mxu0 %v3038_v60  ;;  %1040 = vmatpush1.bf16.msra.mxu1 %v3040_v61 }
 0x2ab   :  { %998 = vmatprep.subr.bf16.mxu0 %v3044_v62  ;;  %1041 = vmatprep.subr.bf16.mxu1 %v3864_v21 }
 0x2ae   :  { %999 = vmatpush1.bf16.msra.mxu0 %v3050_v39  ;;  %1042 = vmatpush1.bf16.msra.mxu1 %v3052_v0 }
 0x2af   :  { %1110 = vmatprep.subr.bf16.mxu0 %v2864_v1  ;;  %1153 = vmatprep.subr.bf16.mxu1 %v2866_v2  ;;  %v3885_v1 = vld [vmem:[#allocation13_spill] sm:$0xff]  ;;  %v3886_v2 = vld [vmem:[#allocation14_spill] sm:$0xff] }
 0x2b1   :  { %1017 = vmatmul.mubr.bf16.vlgmr.msra.gmra.mrb[8].mxu0 %v2464_v28  ;;  %1060 = vmatmul.mubr.bf16.vlgmr.msra.gmra.mrb[8].mxu1 %v2464_v28 }
 0x2b2   :  { %1111 = vmatpush1.bf16.msra.mxu0 %v2869_v3  ;;  %1154 = vmatpush1.bf16.msra.mxu1 %v2871_v4  ;;  %v3887_v3 = vld [vmem:[#allocation15_spill] sm:$0xff]  ;;  %v3888_v4 = vld [vmem:[#allocation16_spill] sm:$0xff] }
 0x2b3   :  { %1112 = vmatprep.subr.bf16.mxu0 %v2874_v5  ;;  %1155 = vmatprep.subr.bf16.mxu1 %v2878_v6  ;;  %v3889_v5 = vld [vmem:[#allocation17_spill] sm:$0xff]  ;;  %v3890_v6 = vld [vmem:[#allocation18_spill] sm:$0xff] }
 0x2b4   :  { %1142 = vmatprep.mubr.bf16.mxu0 %v3862_v63  ;;  %1185 = vmatprep.mubr.bf16.mxu1 %v3862_v63 }
 0x2b6   :  { %1113 = vmatpush1.bf16.msra.mxu0 %v2880_v7  ;;  %1156 = vmatpush1.bf16.msra.mxu1 %v2883_v8  ;;  %v3892_v7 = vld [vmem:[#allocation20_spill] sm:$0xff]  ;;  %v3893_v8 = vld [vmem:[#allocation21_spill] sm:$0xff] }
 0x2b7   :  { %1114 = vmatprep.subr.bf16.mxu0 %v2886_v9  ;;  %1157 = vmatprep.subr.bf16.mxu1 %v2888_v10  ;;  %v3894_v9 = vld [vmem:[#allocation22_spill] sm:$0xff]  ;;  %v3895_v10 = vld [vmem:[#allocation23_spill] sm:$0xff] }
 0x2ba   :  { %1115 = vmatpush1.bf16.msra.mxu0 %v3885_v1  ;;  %1158 = vmatpush1.bf16.msra.mxu1 %v3886_v2 }
 0x2bb   :  { %1116 = vmatprep.subr.bf16.mxu0 %v3887_v3  ;;  %1159 = vmatprep.subr.bf16.mxu1 %v3888_v4 }
 0x2be   :  { %1117 = vmatpush1.bf16.msra.mxu0 %v3889_v5  ;;  %1160 = vmatpush1.bf16.msra.mxu1 %v3890_v6 }
 0x2bf   :  { %1118 = vmatprep.subr.bf16.mxu0 %v3891_v19  ;;  %1161 = vmatprep.subr.bf16.mxu1 %v3892_v7 }
 0x2c2   :  { %1119 = vmatpush1.bf16.msra.mxu0 %v3893_v8  ;;  %1162 = vmatpush1.bf16.msra.mxu1 %v3894_v9 }
 0x2c3   :  { %1120 = vmatprep.subr.bf16.mxu0 %v3895_v10  ;;  %1163 = vmatprep.subr.bf16.mxu1 %v3896_v30 }
 0x2c6   :  { %1121 = vmatpush1.bf16.msra.mxu0 %v3897_v29  ;;  %1164 = vmatpush1.bf16.msra.mxu1 %v3898_v57 }
 0x2c7   :  { %1122 = vmatprep.subr.bf16.mxu0 %v3899_v25  ;;  %1165 = vmatprep.subr.bf16.mxu1 %v3900_v20 }
 0x2ca   :  { %1123 = vmatpush1.bf16.msra.mxu0 %v3901_v24  ;;  %1166 = vmatpush1.bf16.msra.mxu1 %v3902_v32 }
 0x2cb   :  { %1124 = vmatprep.subr.bf16.mxu0 %v3903_v26  ;;  %1167 = vmatprep.subr.bf16.mxu1 %v3904_v23 }
 0x2ce   :  { %1125 = vmatpush1.bf16.msra.mxu0 %v3905_v13  ;;  %1168 = vmatpush1.bf16.msra.mxu1 %v3906_v12 }
 0x2cf   :  { %1202 = vmatprep.subr.bf16.mxu0 %v3907_v14  ;;  %1245 = vmatprep.subr.bf16.mxu1 %v3908_v31 }
 0x384   :  { %v1018_v22 = vpop.f32.mrb[8].mxu0  ;;  %v1061_v27 = vpop.f32.mrb[8].mxu1 }
 0x385   :  { %v1070_v33 = vmul.f32 0.5, %v1018_v22  ;;  %v1020_v16 = vpop.f32.mrb[9].mxu0  ;;  %v1063_v34 = vpop.f32.mrb[9].mxu1  ;;  %v1072_v7 = vmul.f32 0.5, %v1061_v27 }
 0x386   :  { %v1071_v11 = vmul.f32 0.5, %v1020_v16  ;;  %v1022_v28 = vpop.f32.mrb[10].mxu0  ;;  %v1065_v1 = vpop.f32.mrb[10].mxu1 }
 0x387   :  { %2510 = vtanh.f32 %v1070_v33  ;;  %v1073_v2 = vmul.f32 0.5, %v1022_v28  ;;  %v1024_v3 = vpop.f32.mrb[11].mxu0  ;;  %v1067_v4 = vpop.f32.mrb[11].mxu1  ;;  %v1075_v9 = vmul.f32 0.5, %v1065_v1 }
 0x388   :  { %v1074_v5 = vmul.f32 0.5, %v1024_v3  ;;  %2512 = vtanh.f32 %v1071_v11 }
 0x389   :  { %2514 = vtanh.f32 %v1073_v2 }
 0x38a   :  { %2516 = vtanh.f32 %v1063_v34 }
 0x38b   :  { %2518 = vtanh.f32 %v1074_v5 }
 0x38c   :  { %2520 = vtanh.f32 %v1067_v4 }
 0x38d   :  { %2522 = vtanh.f32 %v1072_v7  ;;  %v3379_v7 = vld [vmem:[#allocation8 + $0xe8] ss:$16 sps:$4 sm:$0xff]  }
 0x38e   :  { %2524 = vtanh.f32 %v1075_v9  ;;  %3930 = vst [vmem:[#allocation32_spill] sm:$0xff] %v3379_v7  ;;  %v3385_v9 = vld [vmem:[#allocation6 + $0xc] ss:$16 sps:$4 sm:$0xff]  }
 0x38f   :  { %3932 = vst [vmem:[#allocation34_spill] sm:$0xff] %v3385_v9 }
 0x391   :  { %v2511_v6 = vpop.eup %2510 }
 0x392   :  { %v1082_v19 = vadd.f32 1.0, %v2511_v6  ;;  %v2513_v8 = vpop.eup %2512 }
 0x393   :  { %v2515_v10 = vpop.eup %2514  ;;  %v1083_v29 = vadd.f32 1.0, %v2513_v8  ;;  %v3382_v8 = vld [vmem:[#allocation6 + $0x4] ss:$16 sps:$4 sm:$0xff]  }
 0x394   :  { %v1088_v30 = vmul.f32 0.5, %v1082_v19  ;;  %v2517_v57 = vpop.eup %2516  ;;  %v1085_v25 = vadd.f32 1.0, %v2515_v10  ;;  %v3376_v19 = vld [vmem:[#allocation8 + $0xe0] ss:$16 sps:$4 sm:$0xff]   ;;  %3931 = vst [vmem:[#allocation33_spill] sm:$0xff] %v3382_v8 }
 0x395   :  { %v2519_v20 = vpop.eup %2518  ;;  %v1089_v24 = vmul.f32 0.5, %v1083_v29  ;;  %3929 = vst [vmem:[#allocation31_spill] sm:$0xff] %v3376_v19 }
 0x396   :  { %v1098_v32 = vmul.f32 %v2517_v57, %v1088_v30  ;;  %v1091_v26 = vmul.f32 0.5, %v1085_v25  ;;  %v1086_v23 = vadd.f32 1.0, %v2519_v20  ;;  %v2521_v13 = vpop.eup %2520 }
 0x397   :  { %v1096_v12 = vmul.f32 %v1089_v24, %v3169_v18  ;;  %v2523_v16 = vpop.eup %2522 }
 0x398   :  { %v1092_v14 = vmul.f32 0.5, %v1086_v23  ;;  %v1099_v31 = vmul.f32 %v2521_v13, %v1091_v26  ;;  %v2525_v34 = vpop.eup %2524  ;;  %v1084_v11 = vadd.f32 1.0, %v2523_v16 }
 0x399   :  { %v3245_v22 = vadd.f32 %v1098_v32, %v1096_v12  ;;  %v1087_v28 = vadd.f32 1.0, %v2525_v34 }
 0x39a   :  { %v1097_v27 = vmul.f32 %v1092_v14, %v3173_v17  ;;  %v1090_v2 = vmul.f32 0.5, %v1084_v11  ;;  %v3373_v17 = vld [vmem:[#allocation8 + $0xec] ss:$16 sps:$4 sm:$0xff]  }
 0x39b   :  { %2526 = vtanh.f32 %v3245_v22  ;;  %v1093_v3 = vmul.f32 0.5, %v1087_v28  ;;  %3928 = vst [vmem:[#allocation30_spill] sm:$0xff] %v3373_v17 }
 0x39c   :  { %v3249_v33 = vadd.f32 %v1099_v31, %v1097_v27 }
 0x39e   :  { %2528 = vtanh.f32 %v3249_v33 }
 0x3a5   :  { %v2527_v1 = vpop.eup %2526 }
 0x3a6   :  { %v1104_v4 = vmul.f32 %v2527_v1, %v1090_v2 }
 0x3a8   :  { %v2529_v18 = vpop.eup %2528 }
 0x3a9   :  { %v1105_v5 = vmul.f32 %v2529_v18, %v1093_v3 }
 0x3ab   :  { %v1109_v6 = vpack.c.bf16 %v1105_v5, %v1104_v4 }
 0x3ad   :  { %1143 = vmatmul.mubr.bf16.vlgmr.msra.gmra.mrb[12].mxu0 %v1109_v6  ;;  %1186 = vmatmul.mubr.bf16.vlgmr.msra.gmra.mrb[12].mxu1 %v1109_v6 }
 0x3ae   :  { %1203 = vmatpush1.bf16.msra.mxu0 %v2962_v35  ;;  %1246 = vmatpush1.bf16.msra.mxu1 %v2964_v36  ;;  %v2465_v35 = vld [vmem:[#allocation3 + $0x18] sm:$0xff]   ;;  %v3284_v36 = vld [vmem:[#allocation8 + $0x4] ss:$16 sps:$4 sm:$0xff]  }
 0x3af   :  { %1204 = vmatprep.subr.bf16.mxu0 %v2968_v37  ;;  %1247 = vmatprep.subr.bf16.mxu1 %v2972_v38  ;;  %v3287_v37 = vld [vmem:[#allocation8 + $0xc] ss:$16 sps:$4 sm:$0xff]   ;;  %v3290_v38 = vld [vmem:[#allocation8] ss:$16 sps:$4 sm:$0xff]  }
 0x3b0   :  { %1234 = vmatprep.mubr.bf16.mxu0 %v3862_v63  ;;  %1277 = vmatprep.mubr.bf16.mxu1 %v3862_v63 }
 0x3b2   :  { %1205 = vmatpush1.bf16.msra.mxu0 %v2974_v40  ;;  %1248 = vmatpush1.bf16.msra.mxu1 %v2978_v41  ;;  %v3293_v40 = vld [vmem:[#allocation8 + $0x8] ss:$16 sps:$4 sm:$0xff]   ;;  %v3296_v41 = vld [vmem:[#allocation8 + $0x24] ss:$16 sps:$4 sm:$0xff]  }
 0x3b3   :  { %1206 = vmatprep.subr.bf16.mxu0 %v2980_v42  ;;  %1249 = vmatprep.subr.bf16.mxu1 %v2984_v43  ;;  %v3304_v42 = vld [vmem:[#allocation8 + $0x20] ss:$16 sps:$4 sm:$0xff]   ;;  %v3307_v43 = vld [vmem:[#allocation8 + $0x28] ss:$16 sps:$4 sm:$0xff]  }
 0x3b6   :  { %1207 = vmatpush1.bf16.msra.mxu0 %v2988_v44  ;;  %1250 = vmatpush1.bf16.msra.mxu1 %v2990_v45  ;;  %v3310_v44 = vld [vmem:[#allocation8 + $0x44] ss:$16 sps:$4 sm:$0xff]   ;;  %v3313_v45 = vld [vmem:[#allocation8 + $0x4c] ss:$16 sps:$4 sm:$0xff]  }
 0x3b7   :  { %1208 = vmatprep.subr.bf16.mxu0 %v2994_v46  ;;  %1251 = vmatprep.subr.bf16.mxu1 %v2998_v47  ;;  %v3316_v46 = vld [vmem:[#allocation8 + $0x40] ss:$16 sps:$4 sm:$0xff]   ;;  %v3319_v47 = vld [vmem:[#allocation8 + $0x48] ss:$16 sps:$4 sm:$0xff]  }
 0x3b8   :  { %3909 = vst [vmem:[#allocation37_spill] sm:$0xff] %v3316_v46  ;;  %3910 = vst [vmem:[#allocation38_spill] sm:$0xff] %v3319_v47 }
 0x3ba   :  { %1209 = vmatpush1.bf16.msra.mxu0 %v3000_v48  ;;  %1252 = vmatpush1.bf16.msra.mxu1 %v3002_v49  ;;  %v3322_v48 = vld [vmem:[#allocation8 + $0x64] ss:$16 sps:$4 sm:$0xff]   ;;  %v3325_v49 = vld [vmem:[#allocation8 + $0x6c] ss:$16 sps:$4 sm:$0xff]  }
 0x3bb   :  { %1210 = vmatprep.subr.bf16.mxu0 %v3004_v50  ;;  %1253 = vmatprep.subr.bf16.mxu1 %v3006_v51  ;;  %3911 = vst [vmem:[#allocation13_spill] sm:$0xff] %v3322_v48  ;;  %3912 = vst [vmem:[#allocation14_spill] sm:$0xff] %v3325_v49  ;;  %v3328_v50 = vld [vmem:[#allocation8 + $0x60] ss:$16 sps:$4 sm:$0xff]   ;;  %v3331_v51 = vld [vmem:[#allocation8 + $0x68] ss:$16 sps:$4 sm:$0xff]  }
 0x3bc   :  { %3913 = vst [vmem:[#allocation15_spill] sm:$0xff] %v3328_v50  ;;  %3914 = vst [vmem:[#allocation16_spill] sm:$0xff] %v3331_v51 }
 0x3be   :  { %1211 = vmatpush1.bf16.msra.mxu0 %v3014_v52  ;;  %1254 = vmatpush1.bf16.msra.mxu1 %v3016_v53  ;;  %v3334_v52 = vld [vmem:[#allocation8 + $0x84] ss:$16 sps:$4 sm:$0xff]   ;;  %v3337_v53 = vld [vmem:[#allocation8 + $0x8c] ss:$16 sps:$4 sm:$0xff]  }
 0x3bf   :  { %1212 = vmatprep.subr.bf16.mxu0 %v3020_v54  ;;  %1255 = vmatprep.subr.bf16.mxu1 %v3022_v55  ;;  %3915 = vst [vmem:[#allocation17_spill] sm:$0xff] %v3334_v52  ;;  %3916 = vst [vmem:[#allocation18_spill] sm:$0xff] %v3337_v53  ;;  %v3340_v54 = vld [vmem:[#allocation8 + $0x80] ss:$16 sps:$4 sm:$0xff]   ;;  %v3343_v55 = vld [vmem:[#allocation8 + $0x88] ss:$16 sps:$4 sm:$0xff]  }
 0x3c0   :  { %3917 = vst [vmem:[#allocation19_spill] sm:$0xff] %v3340_v54  ;;  %3918 = vst [vmem:[#allocation20_spill] sm:$0xff] %v3343_v55 }
 0x3c2   :  { %1213 = vmatpush1.bf16.msra.mxu0 %v3026_v56  ;;  %1256 = vmatpush1.bf16.msra.mxu1 %v3863_v15  ;;  %v3346_v56 = vld [vmem:[#allocation8 + $0xa4] ss:$16 sps:$4 sm:$0xff]   ;;  %v3367_v15 = vld [vmem:[#allocation8 + $0xc8] ss:$16 sps:$4 sm:$0xff]  }
 0x3c3   :  { %1214 = vmatprep.subr.bf16.mxu0 %v3032_v58  ;;  %1257 = vmatprep.subr.bf16.mxu1 %v3034_v59  ;;  %3919 = vst [vmem:[#allocation21_spill] sm:$0xff] %v3346_v56  ;;  %v3349_v58 = vld [vmem:[#allocation8 + $0xac] ss:$16 sps:$4 sm:$0xff]   ;;  %v3352_v59 = vld [vmem:[#allocation8 + $0xa0] ss:$16 sps:$4 sm:$0xff]   ;;  %3926 = vst [vmem:[#allocation28_spill] sm:$0xff] %v3367_v15 }
 0x3c4   :  { %3920 = vst [vmem:[#allocation22_spill] sm:$0xff] %v3349_v58  ;;  %3921 = vst [vmem:[#allocation23_spill] sm:$0xff] %v3352_v59 }
 0x3c6   :  { %1215 = vmatpush1.bf16.msra.mxu0 %v3038_v60  ;;  %1258 = vmatpush1.bf16.msra.mxu1 %v3040_v61  ;;  %v3355_v60 = vld [vmem:[#allocation8 + $0xa8] ss:$16 sps:$4 sm:$0xff]   ;;  %v3358_v61 = vld [vmem:[#allocation8 + $0xc4] ss:$16 sps:$4 sm:$0xff]  }
 0x3c7   :  { %1216 = vmatprep.subr.bf16.mxu0 %v3044_v62  ;;  %1259 = vmatprep.subr.bf16.mxu1 %v3864_v21  ;;  %3922 = vst [vmem:[#allocation24_spill] sm:$0xff] %v3355_v60  ;;  %3923 = vst [vmem:[#allocation25_spill] sm:$0xff] %v3358_v61  ;;  %v3361_v62 = vld [vmem:[#allocation8 + $0xcc] ss:$16 sps:$4 sm:$0xff]   ;;  %v3370_v21 = vld [vmem:[#allocation8 + $0xe4] ss:$16 sps:$4 sm:$0xff]  }
 0x3c8   :  { %3924 = vst [vmem:[#allocation26_spill] sm:$0xff] %v3361_v62  ;;  %3927 = vst [vmem:[#allocation29_spill] sm:$0xff] %v3370_v21 }
 0x3ca   :  { %1217 = vmatpush1.bf16.msra.mxu0 %v3050_v39  ;;  %1260 = vmatpush1.bf16.msra.mxu1 %v3052_v0  ;;  %v3299_v0 = vld [vmem:[#allocation8 + $0x2c] ss:$16 sps:$4 sm:$0xff]   ;;  %v3364_v39 = vld [vmem:[#allocation8 + $0xc0] ss:$16 sps:$4 sm:$0xff]  }
 0x3cb   :  { %1328 = vmatprep.subr.bf16.mxu0 %v3284_v36  ;;  %1371 = vmatprep.subr.bf16.mxu1 %v3287_v37  ;;  %3925 = vst [vmem:[#allocation27_spill] sm:$0xff] %v3364_v39 }
 0x3cd   :  { %1235 = vmatmul.mubr.bf16.vlgmr.msra.gmra.mrb[12].mxu0 %v2465_v35  ;;  %1278 = vmatmul.mubr.bf16.vlgmr.msra.gmra.mrb[12].mxu1 %v2465_v35 }
 0x3ce   :  { %1329 = vmatpush1.bf16.msra.mxu0 %v3290_v38  ;;  %1372 = vmatpush1.bf16.msra.mxu1 %v3293_v40 }
 0x3cf   :  { %1330 = vmatprep.subr.bf16.mxu0 %v3296_v41  ;;  %1373 = vmatprep.subr.bf16.mxu1 %v3299_v0 }
 0x3d0   :  { %1360 = vmatprep.mubr.bf16.mxu0 %v3862_v63  ;;  %1403 = vmatprep.mubr.bf16.mxu1 %v3862_v63 }
 0x3d2   :  { %1331 = vmatpush1.bf16.msra.mxu0 %v3304_v42  ;;  %1374 = vmatpush1.bf16.msra.mxu1 %v3307_v43 }
 0x3d3   :  { %1332 = vmatprep.subr.bf16.mxu0 %v3310_v44  ;;  %1375 = vmatprep.subr.bf16.mxu1 %v3313_v45 }
 0x3d6   :  { %1333 = vmatpush1.bf16.msra.mxu0 %v3316_v46  ;;  %1376 = vmatpush1.bf16.msra.mxu1 %v3319_v47 }
 0x3d7   :  { %1334 = vmatprep.subr.bf16.mxu0 %v3322_v48  ;;  %1377 = vmatprep.subr.bf16.mxu1 %v3325_v49 }
 0x3da   :  { %1335 = vmatpush1.bf16.msra.mxu0 %v3328_v50  ;;  %1378 = vmatpush1.bf16.msra.mxu1 %v3331_v51 }
 0x3db   :  { %1336 = vmatprep.subr.bf16.mxu0 %v3334_v52  ;;  %1379 = vmatprep.subr.bf16.mxu1 %v3337_v53 }
 0x3de   :  { %1337 = vmatpush1.bf16.msra.mxu0 %v3340_v54  ;;  %1380 = vmatpush1.bf16.msra.mxu1 %v3343_v55 }
 0x3df   :  { %1338 = vmatprep.subr.bf16.mxu0 %v3346_v56  ;;  %1381 = vmatprep.subr.bf16.mxu1 %v3349_v58 }
 0x3e2   :  { %1339 = vmatpush1.bf16.msra.mxu0 %v3352_v59  ;;  %1382 = vmatpush1.bf16.msra.mxu1 %v3355_v60 }
 0x3e3   :  { %1340 = vmatprep.subr.bf16.mxu0 %v3358_v61  ;;  %1383 = vmatprep.subr.bf16.mxu1 %v3361_v62 }
 0x3e6   :  { %1341 = vmatpush1.bf16.msra.mxu0 %v3364_v39  ;;  %1384 = vmatpush1.bf16.msra.mxu1 %v3367_v15 }
 0x3e7   :  { %1342 = vmatprep.subr.bf16.mxu0 %v3370_v21  ;;  %1385 = vmatprep.subr.bf16.mxu1 %v3373_v17 }
 0x3ea   :  { %1343 = vmatpush1.bf16.msra.mxu0 %v3376_v19  ;;  %1386 = vmatpush1.bf16.msra.mxu1 %v3379_v7 }
 0x3eb   :  { %1420 = vmatprep.subr.bf16.mxu0 %v3382_v8  ;;  %1463 = vmatprep.subr.bf16.mxu1 %v3385_v9 }
 0x4a0   :  { %v1236_v10 = vpop.f32.mrb[12].mxu0  ;;  %v1279_v30 = vpop.f32.mrb[12].mxu1 }
 0x4a1   :  { %v1288_v29 = vmul.f32 0.5, %v1236_v10  ;;  %v1238_v57 = vpop.f32.mrb[13].mxu0  ;;  %v1281_v25 = vpop.f32.mrb[13].mxu1  ;;  %v1290_v27 = vmul.f32 0.5, %v1279_v30 }
 0x4a2   :  { %v1289_v20 = vmul.f32 0.5, %v1238_v57  ;;  %v1240_v24 = vpop.f32.mrb[14].mxu0  ;;  %v1283_v32 = vpop.f32.mrb[14].mxu1 }
 0x4a3   :  { %2530 = vtanh.f32 %v1288_v29  ;;  %v1291_v26 = vmul.f32 0.5, %v1240_v24  ;;  %v1242_v23 = vpop.f32.mrb[15].mxu0  ;;  %v1285_v13 = vpop.f32.mrb[15].mxu1  ;;  %v1293_v34 = vmul.f32 0.5, %v1283_v32 }
 0x4a4   :  { %v1292_v12 = vmul.f32 0.5, %v1242_v23  ;;  %2532 = vtanh.f32 %v1289_v20 }
 0x4a5   :  { %2534 = vtanh.f32 %v1291_v26 }
 0x4a6   :  { %2536 = vtanh.f32 %v1281_v25 }
 0x4a7   :  { %2538 = vtanh.f32 %v1292_v12 }
 0x4a8   :  { %2540 = vtanh.f32 %v1285_v13 }
 0x4a9   :  { %2542 = vtanh.f32 %v1290_v27 }
 0x4aa   :  { %2544 = vtanh.f32 %v1293_v34 }
 0x4ad   :  { %v2531_v14 = vpop.eup %2530 }
 0x4ae   :  { %v1300_v31 = vadd.f32 1.0, %v2531_v14  ;;  %v2533_v16 = vpop.eup %2532 }
 0x4af   :  { %v2535_v11 = vpop.eup %2534  ;;  %v1301_v1 = vadd.f32 1.0, %v2533_v16 }
 0x4b0   :  { %v1306_v28 = vmul.f32 0.5, %v1300_v31  ;;  %v2537_v2 = vpop.eup %2536  ;;  %v1303_v3 = vadd.f32 1.0, %v2535_v11  ;;  %v3399_v11 = vld [vmem:[#allocation6 + $0x8] ss:$16 sps:$4 sm:$0xff]  }
 0x4b1   :  { %v2539_v18 = vpop.eup %2538  ;;  %v1307_v4 = vmul.f32 0.5, %v1301_v1  ;;  %v3405_v1 = vld [vmem:[#allocation6 + $0x2c] ss:$16 sps:$4 sm:$0xff]  }
 0x4b2   :  { %v1316_v5 = vmul.f32 %v2537_v2, %v1306_v28  ;;  %v1309_v6 = vmul.f32 0.5, %v1303_v3  ;;  %v1304_v35 = vadd.f32 1.0, %v2539_v18  ;;  %v2541_v10 = vpop.eup %2540  ;;  %v3402_v28 = vld [vmem:[#allocation6 + $0x24] ss:$16 sps:$4 sm:$0xff]   ;;  %v3410_v2 = vld [vmem:[#allocation6 + $0x20] ss:$16 sps:$4 sm:$0xff]  }
 0x4b3   :  { %v1314_v29 = vmul.f32 %v1307_v4, %v3245_v22  ;;  %v2543_v32 = vpop.eup %2542  ;;  %v3413_v3 = vld [vmem:[#allocation6 + $0x28] ss:$16 sps:$4 sm:$0xff]   ;;  %v3416_v18 = vld [vmem:[#allocation6 + $0x44] ss:$16 sps:$4 sm:$0xff]   ;;  %v3419_v4 = vld [vmem:[#allocation6 + $0x4c] ss:$16 sps:$4 sm:$0xff]  }
 0x4b4   :  { %v1310_v57 = vmul.f32 0.5, %v1304_v35  ;;  %v1317_v25 = vmul.f32 %v2541_v10, %v1309_v6  ;;  %v2545_v26 = vpop.eup %2544  ;;  %v1302_v23 = vadd.f32 1.0, %v2543_v32  ;;  %v3425_v6 = vld [vmem:[#allocation6 + $0x48] ss:$16 sps:$4 sm:$0xff]   ;;  %v3428_v35 = vld [vmem:[#allocation6 + $0x64] ss:$16 sps:$4 sm:$0xff]  }
 0x4b5   :  { %v3389_v30 = vadd.f32 %v1316_v5, %v1314_v29  ;;  %v1305_v13 = vadd.f32 1.0, %v2545_v26  ;;  %v3422_v5 = vld [vmem:[#allocation6 + $0x40] ss:$16 sps:$4 sm:$0xff]   ;;  %v3431_v10 = vld [vmem:[#allocation6 + $0x6c] ss:$16 sps:$4 sm:$0xff]  }
 0x4b6   :  { %v1315_v20 = vmul.f32 %v1310_v57, %v3249_v33  ;;  %v1308_v14 = vmul.f32 0.5, %v1302_v23  ;;  %v3396_v33 = vld [vmem:[#allocation6] ss:$16 sps:$4 sm:$0xff]   ;;  %v3437_v57 = vld [vmem:[#allocation6 + $0x68] ss:$16 sps:$4 sm:$0xff]  }
 0x4b7   :  { %2546 = vtanh.f32 %v3389_v30  ;;  %v1311_v31 = vmul.f32 0.5, %v1305_v13  ;;  %v3434_v29 = vld [vmem:[#allocation6 + $0x60] ss:$16 sps:$4 sm:$0xff]   ;;  %v3449_v26 = vld [vmem:[#allocation6 + $0x88] ss:$16 sps:$4 sm:$0xff]  }
 0x4b8   :  { %v3393_v24 = vadd.f32 %v1317_v25, %v1315_v20  ;;  %v3440_v25 = vld [vmem:[#allocation6 + $0x84] ss:$16 sps:$4 sm:$0xff]   ;;  %v3443_v20 = vld [vmem:[#allocation6 + $0x8c] ss:$16 sps:$4 sm:$0xff]   ;;  %v3446_v32 = vld [vmem:[#allocation6 + $0x80] ss:$16 sps:$4 sm:$0xff]  }
 0x4b9   :  { %v3452_v23 = vld [vmem:[#allocation6 + $0xa4] ss:$16 sps:$4 sm:$0xff]   ;;  %v3455_v13 = vld [vmem:[#allocation6 + $0xac] ss:$16 sps:$4 sm:$0xff]  }
 0x4ba   :  { %2548 = vtanh.f32 %v3393_v24 }
 0x4c1   :  { %v2547_v12 = vpop.eup %2546 }
 0x4c2   :  { %v1322_v27 = vmul.f32 %v2547_v12, %v1308_v14  ;;  %v3458_v12 = vld [vmem:[#allocation6 + $0xa0] ss:$16 sps:$4 sm:$0xff]   ;;  %v3461_v14 = vld [vmem:[#allocation6 + $0xa8] ss:$16 sps:$4 sm:$0xff]  }
 0x4c3   :  { %3933 = vst [vmem:[#allocation35_spill] sm:$0xff] %v3458_v12  ;;  %3934 = vst [vmem:[#allocation36_spill] sm:$0xff] %v3461_v14 }
 0x4c4   :  { %v2549_v22 = vpop.eup %2548 }
 0x4c5   :  { %v1323_v16 = vmul.f32 %v2549_v22, %v1311_v31  ;;  %v3464_v31 = vld [vmem:[#allocation6 + $0xc4] ss:$16 sps:$4 sm:$0xff]   ;;  %v3467_v22 = vld [vmem:[#allocation6 + $0xcc] ss:$16 sps:$4 sm:$0xff]  }
 0x4c6   :  { %3935 = vst [vmem:[#allocation39_spill] sm:$0xff] %v3464_v31  ;;  %3936 = vst [vmem:[#allocation40_spill] sm:$0xff] %v3467_v22 }
 0x4c7   :  { %v1327_v34 = vpack.c.bf16 %v1323_v16, %v1322_v27  ;;  %v3470_v27 = vld [vmem:[#allocation6 + $0xc0] ss:$16 sps:$4 sm:$0xff]   ;;  %v3473_v16 = vld [vmem:[#allocation6 + $0xc8] ss:$16 sps:$4 sm:$0xff]  }
 0x4c9   :  { %1361 = vmatmul.mubr.bf16.vlgmr.msra.gmra.mrb[16].mxu0 %v1327_v34  ;;  %1404 = vmatmul.mubr.bf16.vlgmr.msra.gmra.mrb[16].mxu1 %v1327_v34  ;;  %v3476_v34 = vld [vmem:[#allocation6 + $0xe4] ss:$16 sps:$4 sm:$0xff]  }
 0x4ca   :  { %1421 = vmatpush1.bf16.msra.mxu0 %v3396_v33  ;;  %1464 = vmatpush1.bf16.msra.mxu1 %v3399_v11 }
 0x4cb   :  { %1422 = vmatprep.subr.bf16.mxu0 %v3402_v28  ;;  %1465 = vmatprep.subr.bf16.mxu1 %v3405_v1 }
 0x4cc   :  { %1452 = vmatprep.mubr.bf16.mxu0 %v3862_v63  ;;  %1495 = vmatprep.mubr.bf16.mxu1 %v3862_v63 }
 0x4ce   :  { %1423 = vmatpush1.bf16.msra.mxu0 %v3410_v2  ;;  %1466 = vmatpush1.bf16.msra.mxu1 %v3413_v3 }
 0x4cf   :  { %1424 = vmatprep.subr.bf16.mxu0 %v3416_v18  ;;  %1467 = vmatprep.subr.bf16.mxu1 %v3419_v4 }
 0x4d2   :  { %1425 = vmatpush1.bf16.msra.mxu0 %v3422_v5  ;;  %1468 = vmatpush1.bf16.msra.mxu1 %v3425_v6 }
 0x4d3   :  { %1426 = vmatprep.subr.bf16.mxu0 %v3428_v35  ;;  %1469 = vmatprep.subr.bf16.mxu1 %v3431_v10 }
 0x4d6   :  { %1427 = vmatpush1.bf16.msra.mxu0 %v3434_v29  ;;  %1470 = vmatpush1.bf16.msra.mxu1 %v3437_v57 }
 0x4d7   :  { %1428 = vmatprep.subr.bf16.mxu0 %v3440_v25  ;;  %1471 = vmatprep.subr.bf16.mxu1 %v3443_v20 }
 0x4da   :  { %1429 = vmatpush1.bf16.msra.mxu0 %v3446_v32  ;;  %1472 = vmatpush1.bf16.msra.mxu1 %v3449_v26 }
 0x4db   :  { %1430 = vmatprep.subr.bf16.mxu0 %v3452_v23  ;;  %1473 = vmatprep.subr.bf16.mxu1 %v3455_v13 }
 0x4de   :  { %1431 = vmatpush1.bf16.msra.mxu0 %v3458_v12  ;;  %1474 = vmatpush1.bf16.msra.mxu1 %v3461_v14  ;;  %v3479_v14 = vld [vmem:[#allocation6 + $0xec] ss:$16 sps:$4 sm:$0xff]   ;;  %v3482_v12 = vld [vmem:[#allocation6 + $0xe0] ss:$16 sps:$4 sm:$0xff]  }
 0x4df   :  { %1432 = vmatprep.subr.bf16.mxu0 %v3464_v31  ;;  %1475 = vmatprep.subr.bf16.mxu1 %v3467_v22  ;;  %v2466_v31 = vld [vmem:[#allocation3 + $0x20] sm:$0xff]   ;;  %v3485_v22 = vld [vmem:[#allocation6 + $0xe8] ss:$16 sps:$4 sm:$0xff]  }
 0x4e2   :  { %1433 = vmatpush1.bf16.msra.mxu0 %v3470_v27  ;;  %1476 = vmatpush1.bf16.msra.mxu1 %v3473_v16 }
 0x4e3   :  { %1434 = vmatprep.subr.bf16.mxu0 %v3476_v34  ;;  %1477 = vmatprep.subr.bf16.mxu1 %v3479_v14 }
 0x4e6   :  { %1435 = vmatpush1.bf16.msra.mxu0 %v3482_v12  ;;  %1478 = vmatpush1.bf16.msra.mxu1 %v3485_v22 }
 0x4e7   :  { %1546 = vmatprep.subr.bf16.mxu0 %v3284_v36  ;;  %1589 = vmatprep.subr.bf16.mxu1 %v3287_v37 }
 0x4e9   :  { %1453 = vmatmul.mubr.bf16.vlgmr.msra.gmra.mrb[16].mxu0 %v2466_v31  ;;  %1496 = vmatmul.mubr.bf16.vlgmr.msra.gmra.mrb[16].mxu1 %v2466_v31 }
 0x4ea   :  { %1547 = vmatpush1.bf16.msra.mxu0 %v3290_v38  ;;  %1590 = vmatpush1.bf16.msra.mxu1 %v3293_v40 }
 0x4eb   :  { %1548 = vmatprep.subr.bf16.mxu0 %v3296_v41  ;;  %1591 = vmatprep.subr.bf16.mxu1 %v3299_v0 }
 0x4ec   :  { %1578 = vmatprep.mubr.bf16.mxu0 %v3862_v63  ;;  %1621 = vmatprep.mubr.bf16.mxu1 %v3862_v63 }
 0x4ee   :  { %1549 = vmatpush1.bf16.msra.mxu0 %v3304_v42  ;;  %1592 = vmatpush1.bf16.msra.mxu1 %v3307_v43 }
 0x4ef   :  { %1550 = vmatprep.subr.bf16.mxu0 %v3310_v44  ;;  %1593 = vmatprep.subr.bf16.mxu1 %v3313_v45 }
 0x4f2   :  { %1551 = vmatpush1.bf16.msra.mxu0 %v3316_v46  ;;  %1594 = vmatpush1.bf16.msra.mxu1 %v3319_v47 }
 0x4f3   :  { %1552 = vmatprep.subr.bf16.mxu0 %v3322_v48  ;;  %1595 = vmatprep.subr.bf16.mxu1 %v3325_v49 }
 0x4f6   :  { %1553 = vmatpush1.bf16.msra.mxu0 %v3328_v50  ;;  %1596 = vmatpush1.bf16.msra.mxu1 %v3331_v51 }
 0x4f7   :  { %1554 = vmatprep.subr.bf16.mxu0 %v3334_v52  ;;  %1597 = vmatprep.subr.bf16.mxu1 %v3337_v53 }
 0x4fa   :  { %1555 = vmatpush1.bf16.msra.mxu0 %v3340_v54  ;;  %1598 = vmatpush1.bf16.msra.mxu1 %v3343_v55 }
 0x4fb   :  { %1556 = vmatprep.subr.bf16.mxu0 %v3346_v56  ;;  %1599 = vmatprep.subr.bf16.mxu1 %v3349_v58 }
 0x4fe   :  { %1557 = vmatpush1.bf16.msra.mxu0 %v3352_v59  ;;  %1600 = vmatpush1.bf16.msra.mxu1 %v3355_v60 }
 0x4ff   :  { %1558 = vmatprep.subr.bf16.mxu0 %v3358_v61  ;;  %1601 = vmatprep.subr.bf16.mxu1 %v3361_v62 }
 0x502   :  { %1559 = vmatpush1.bf16.msra.mxu0 %v3364_v39  ;;  %1602 = vmatpush1.bf16.msra.mxu1 %v3367_v15 }
 0x503   :  { %1560 = vmatprep.subr.bf16.mxu0 %v3370_v21  ;;  %1603 = vmatprep.subr.bf16.mxu1 %v3373_v17 }
 0x506   :  { %1561 = vmatpush1.bf16.msra.mxu0 %v3376_v19  ;;  %1604 = vmatpush1.bf16.msra.mxu1 %v3379_v7 }
 0x507   :  { %1638 = vmatprep.subr.bf16.mxu0 %v3382_v8  ;;  %1681 = vmatprep.subr.bf16.mxu1 %v3385_v9 }
 0x5bc   :  { %v1454_v31 = vpop.f32.mrb[16].mxu0  ;;  %v1497_v61 = vpop.f32.mrb[16].mxu1 }
 0x5bd   :  { %v1506_v60 = vmul.f32 0.5, %v1454_v31  ;;  %v1456_v62 = vpop.f32.mrb[17].mxu0  ;;  %v1499_v59 = vpop.f32.mrb[17].mxu1  ;;  %v1508_v7 = vmul.f32 0.5, %v1497_v61 }
 0x5be   :  { %v1507_v39 = vmul.f32 0.5, %v1456_v62  ;;  %v1458_v58 = vpop.f32.mrb[18].mxu0  ;;  %v1501_v15 = vpop.f32.mrb[18].mxu1 }
 0x5bf   :  { %2550 = vtanh.f32 %v1506_v60  ;;  %v1509_v21 = vmul.f32 0.5, %v1458_v58  ;;  %v1460_v56 = vpop.f32.mrb[19].mxu0  ;;  %v1503_v17 = vpop.f32.mrb[19].mxu1  ;;  %v1511_v31 = vmul.f32 0.5, %v1501_v15 }
 0x5c0   :  { %v1510_v55 = vmul.f32 0.5, %v1460_v56  ;;  %2552 = vtanh.f32 %v1507_v39 }
 0x5c1   :  { %2554 = vtanh.f32 %v1509_v21 }
 0x5c2   :  { %2556 = vtanh.f32 %v1499_v59 }
 0x5c3   :  { %2558 = vtanh.f32 %v1510_v55 }
 0x5c4   :  { %2560 = vtanh.f32 %v1503_v17 }
 0x5c5   :  { %2562 = vtanh.f32 %v1508_v7 }
 0x5c6   :  { %2564 = vtanh.f32 %v1511_v31 }
 0x5c9   :  { %v2551_v8 = vpop.eup %2550 }
 0x5ca   :  { %v1518_v9 = vadd.f32 1.0, %v2551_v8  ;;  %v2553_v19 = vpop.eup %2552 }
 0x5cb   :  { %v2555_v54 = vpop.eup %2554  ;;  %v1519_v62 = vadd.f32 1.0, %v2553_v19 }
 0x5cc   :  { %v1524_v53 = vmul.f32 0.5, %v1518_v9  ;;  %v2557_v52 = vpop.eup %2556  ;;  %v1521_v51 = vadd.f32 1.0, %v2555_v54 }
 0x5cd   :  { %v2559_v60 = vpop.eup %2558  ;;  %v1525_v58 = vmul.f32 0.5, %v1519_v62 }
 0x5ce   :  { %v1534_v50 = vmul.f32 %v2557_v52, %v1524_v53  ;;  %v1527_v56 = vmul.f32 0.5, %v1521_v51  ;;  %v1522_v39 = vadd.f32 1.0, %v2559_v60  ;;  %v2561_v59 = vpop.eup %2560  ;;  %v3938_v60 = vld [vmem:[#allocation36_spill] sm:$0xff] }
 0x5cf   :  { %v1532_v55 = vmul.f32 %v1525_v58, %v3389_v30  ;;  %v2563_v54 = vpop.eup %2562  ;;  %v3939_v58 = vld [vmem:[#allocation39_spill] sm:$0xff] }
 0x5d0   :  { %v1528_v21 = vmul.f32 0.5, %v1522_v39  ;;  %v1535_v17 = vmul.f32 %v2561_v59, %v1527_v56  ;;  %v2565_v52 = vpop.eup %2564  ;;  %v1520_v51 = vadd.f32 1.0, %v2563_v54  ;;  %v3940_v56 = vld [vmem:[#allocation40_spill] sm:$0xff]  ;;  %v3941_v59 = vld [vmem:[#allocation15_spill] sm:$0xff] }
 0x5d1   :  { %v3525_v61 = vadd.f32 %v1534_v50, %v1532_v55  ;;  %v1523_v53 = vadd.f32 1.0, %v2565_v52  ;;  %v2467_v39 = vld [vmem:[#allocation3 + $0x28] sm:$0xff]   ;;  %v3947_v52 = vld [vmem:[#allocation21_spill] sm:$0xff] }
 0x5d2   :  { %v1533_v15 = vmul.f32 %v1528_v21, %v3393_v24  ;;  %v1526_v8 = vmul.f32 0.5, %v1520_v51  ;;  %v3937_v24 = vld [vmem:[#allocation35_spill] sm:$0xff]  ;;  %v3942_v55 = vld [vmem:[#allocation16_spill] sm:$0xff]  ;;  %v3943_v21 = vld [vmem:[#allocation17_spill] sm:$0xff] }
 0x5d3   :  { %2566 = vtanh.f32 %v3525_v61  ;;  %v1529_v9 = vmul.f32 0.5, %v1523_v53  ;;  %v3946_v54 = vld [vmem:[#allocation20_spill] sm:$0xff]  ;;  %v3948_v51 = vld [vmem:[#allocation22_spill] sm:$0xff]  ;;  %v3949_v53 = vld [vmem:[#allocation23_spill] sm:$0xff] }
 0x5d4   :  { %v3529_v19 = vadd.f32 %v1535_v17, %v1533_v15  ;;  %v3944_v17 = vld [vmem:[#allocation18_spill] sm:$0xff]  ;;  %v3945_v15 = vld [vmem:[#allocation19_spill] sm:$0xff] }
 0x5d6   :  { %2568 = vtanh.f32 %v3529_v19 }
 0x5dd   :  { %v2567_v7 = vpop.eup %2566 }
 0x5de   :  { %v1540_v31 = vmul.f32 %v2567_v7, %v1526_v8  ;;  %v3950_v7 = vld [vmem:[#allocation24_spill] sm:$0xff]  ;;  %v3951_v8 = vld [vmem:[#allocation25_spill] sm:$0xff] }
 0x5e0   :  { %v2569_v30 = vpop.eup %2568 }
 0x5e1   :  { %v1541_v62 = vmul.f32 %v2569_v30, %v1529_v9  ;;  %v3952_v9 = vld [vmem:[#allocation26_spill] sm:$0xff]  ;;  %v3953_v30 = vld [vmem:[#allocation27_spill] sm:$0xff] }
 0x5e3   :  { %v1545_v50 = vpack.c.bf16 %v1541_v62, %v1540_v31  ;;  %v3954_v31 = vld [vmem:[#allocation28_spill] sm:$0xff]  ;;  %v3955_v62 = vld [vmem:[#allocation29_spill] sm:$0xff] }
 0x5e5   :  { %1579 = vmatmul.mubr.bf16.vlgmr.msra.gmra.mrb[20].mxu0 %v1545_v50  ;;  %1622 = vmatmul.mubr.bf16.vlgmr.msra.gmra.mrb[20].mxu1 %v1545_v50  ;;  %v3956_v50 = vld [vmem:[#allocation30_spill] sm:$0xff] }
 0x5e6   :  { %1639 = vmatpush1.bf16.msra.mxu0 %v3396_v33  ;;  %1682 = vmatpush1.bf16.msra.mxu1 %v3399_v11 }
 0x5e7   :  { %1640 = vmatprep.subr.bf16.mxu0 %v3402_v28  ;;  %1683 = vmatprep.subr.bf16.mxu1 %v3405_v1 }
 0x5e8   :  { %1670 = vmatprep.mubr.bf16.mxu0 %v3862_v63  ;;  %1713 = vmatprep.mubr.bf16.mxu1 %v3862_v63 }
 0x5ea   :  { %1641 = vmatpush1.bf16.msra.mxu0 %v3410_v2  ;;  %1684 = vmatpush1.bf16.msra.mxu1 %v3413_v3 }
 0x5eb   :  { %1642 = vmatprep.subr.bf16.mxu0 %v3416_v18  ;;  %1685 = vmatprep.subr.bf16.mxu1 %v3419_v4 }
 0x5ee   :  { %1643 = vmatpush1.bf16.msra.mxu0 %v3422_v5  ;;  %1686 = vmatpush1.bf16.msra.mxu1 %v3425_v6 }
 0x5ef   :  { %1644 = vmatprep.subr.bf16.mxu0 %v3428_v35  ;;  %1687 = vmatprep.subr.bf16.mxu1 %v3431_v10 }
 0x5f2   :  { %1645 = vmatpush1.bf16.msra.mxu0 %v3434_v29  ;;  %1688 = vmatpush1.bf16.msra.mxu1 %v3437_v57 }
 0x5f3   :  { %1646 = vmatprep.subr.bf16.mxu0 %v3440_v25  ;;  %1689 = vmatprep.subr.bf16.mxu1 %v3443_v20 }
 0x5f6   :  { %1647 = vmatpush1.bf16.msra.mxu0 %v3446_v32  ;;  %1690 = vmatpush1.bf16.msra.mxu1 %v3449_v26 }
 0x5f7   :  { %1648 = vmatprep.subr.bf16.mxu0 %v3452_v23  ;;  %1691 = vmatprep.subr.bf16.mxu1 %v3455_v13 }
 0x5fa   :  { %1649 = vmatpush1.bf16.msra.mxu0 %v3937_v24  ;;  %1692 = vmatpush1.bf16.msra.mxu1 %v3938_v60 }
 0x5fb   :  { %1650 = vmatprep.subr.bf16.mxu0 %v3939_v58  ;;  %1693 = vmatprep.subr.bf16.mxu1 %v3940_v56 }
 0x5fe   :  { %1651 = vmatpush1.bf16.msra.mxu0 %v3470_v27  ;;  %1694 = vmatpush1.bf16.msra.mxu1 %v3473_v16 }
 0x5ff   :  { %1652 = vmatprep.subr.bf16.mxu0 %v3476_v34  ;;  %1695 = vmatprep.subr.bf16.mxu1 %v3479_v14 }
 0x602   :  { %1653 = vmatpush1.bf16.msra.mxu0 %v3482_v12  ;;  %1696 = vmatpush1.bf16.msra.mxu1 %v3485_v22 }
 0x603   :  { %1764 = vmatprep.subr.bf16.mxu0 %v3284_v36  ;;  %1807 = vmatprep.subr.bf16.mxu1 %v3287_v37 }
 0x605   :  { %1671 = vmatmul.mubr.bf16.vlgmr.msra.gmra.mrb[20].mxu0 %v2467_v39  ;;  %1714 = vmatmul.mubr.bf16.vlgmr.msra.gmra.mrb[20].mxu1 %v2467_v39  ;;  %v3957_v39 = vld [vmem:[#allocation31_spill] sm:$0xff] }
 0x606   :  { %1765 = vmatpush1.bf16.msra.mxu0 %v3290_v38  ;;  %1808 = vmatpush1.bf16.msra.mxu1 %v3293_v40 }
 0x607   :  { %1766 = vmatprep.subr.bf16.mxu0 %v3296_v41  ;;  %1809 = vmatprep.subr.bf16.mxu1 %v3299_v0 }
 0x608   :  { %1796 = vmatprep.mubr.bf16.mxu0 %v3862_v63  ;;  %1839 = vmatprep.mubr.bf16.mxu1 %v3862_v63 }
 0x60a   :  { %1767 = vmatpush1.bf16.msra.mxu0 %v3304_v42  ;;  %1810 = vmatpush1.bf16.msra.mxu1 %v3307_v43 }
 0x60b   :  { %1768 = vmatprep.subr.bf16.mxu0 %v3310_v44  ;;  %1811 = vmatprep.subr.bf16.mxu1 %v3313_v45 }
 0x60e   :  { %1769 = vmatpush1.bf16.msra.mxu0 %v3316_v46  ;;  %1812 = vmatpush1.bf16.msra.mxu1 %v3319_v47 }
 0x60f   :  { %1770 = vmatprep.subr.bf16.mxu0 %v3322_v48  ;;  %1813 = vmatprep.subr.bf16.mxu1 %v3325_v49 }
 0x612   :  { %1771 = vmatpush1.bf16.msra.mxu0 %v3941_v59  ;;  %1814 = vmatpush1.bf16.msra.mxu1 %v3942_v55 }
 0x613   :  { %1772 = vmatprep.subr.bf16.mxu0 %v3943_v21  ;;  %1815 = vmatprep.subr.bf16.mxu1 %v3944_v17 }
 0x616   :  { %1773 = vmatpush1.bf16.msra.mxu0 %v3945_v15  ;;  %1816 = vmatpush1.bf16.msra.mxu1 %v3946_v54 }
 0x617   :  { %1774 = vmatprep.subr.bf16.mxu0 %v3947_v52  ;;  %1817 = vmatprep.subr.bf16.mxu1 %v3948_v51  ;;  %v3958_v52 = vld [vmem:[#allocation32_spill] sm:$0xff]  ;;  %v3959_v51 = vld [vmem:[#allocation33_spill] sm:$0xff] }
 0x61a   :  { %1775 = vmatpush1.bf16.msra.mxu0 %v3949_v53  ;;  %1818 = vmatpush1.bf16.msra.mxu1 %v3950_v7  ;;  %v3960_v53 = vld [vmem:[#allocation34_spill] sm:$0xff] }
 0x61b   :  { %1776 = vmatprep.subr.bf16.mxu0 %v3951_v8  ;;  %1819 = vmatprep.subr.bf16.mxu1 %v3952_v9 }
 0x61e   :  { %1777 = vmatpush1.bf16.msra.mxu0 %v3953_v30  ;;  %1820 = vmatpush1.bf16.msra.mxu1 %v3954_v31 }
 0x61f   :  { %1778 = vmatprep.subr.bf16.mxu0 %v3955_v62  ;;  %1821 = vmatprep.subr.bf16.mxu1 %v3956_v50 }
 0x622   :  { %1779 = vmatpush1.bf16.msra.mxu0 %v3957_v39  ;;  %1822 = vmatpush1.bf16.msra.mxu1 %v3958_v52 }
 0x623   :  { %1856 = vmatprep.subr.bf16.mxu0 %v3959_v51  ;;  %1899 = vmatprep.subr.bf16.mxu1 %v3960_v53 }
 0x6d8   :  { %v1672_v7 = vpop.f32.mrb[20].mxu0  ;;  %v1715_v8 = vpop.f32.mrb[20].mxu1 }
 0x6d9   :  { %v1724_v54 = vmul.f32 0.5, %v1672_v7  ;;  %v1674_v9 = vpop.f32.mrb[21].mxu0  ;;  %v1717_v15 = vpop.f32.mrb[21].mxu1  ;;  %v1726_v52 = vmul.f32 0.5, %v1715_v8 }
 0x6da   :  { %v1725_v30 = vmul.f32 0.5, %v1674_v9  ;;  %v1676_v17 = vpop.f32.mrb[22].mxu0  ;;  %v1719_v31 = vpop.f32.mrb[22].mxu1 }
 0x6db   :  { %2570 = vtanh.f32 %v1724_v54  ;;  %v1727_v62 = vmul.f32 0.5, %v1676_v17  ;;  %v1678_v21 = vpop.f32.mrb[23].mxu0  ;;  %v1721_v50 = vpop.f32.mrb[23].mxu1  ;;  %v1729_v7 = vmul.f32 0.5, %v1719_v31 }
 0x6dc   :  { %v1728_v55 = vmul.f32 0.5, %v1678_v21  ;;  %2572 = vtanh.f32 %v1725_v30 }
 0x6dd   :  { %2574 = vtanh.f32 %v1727_v62 }
 0x6de   :  { %2576 = vtanh.f32 %v1717_v15 }
 0x6df   :  { %2578 = vtanh.f32 %v1728_v55 }
 0x6e0   :  { %2580 = vtanh.f32 %v1721_v50 }
 0x6e1   :  { %2582 = vtanh.f32 %v1726_v52 }
 0x6e2   :  { %2584 = vtanh.f32 %v1729_v7 }
 0x6e5   :  { %v2571_v51 = vpop.eup %2570 }
 0x6e6   :  { %v1736_v53 = vadd.f32 1.0, %v2571_v51  ;;  %v2573_v39 = vpop.eup %2572 }
 0x6e7   :  { %v2575_v59 = vpop.eup %2574  ;;  %v1737_v9 = vadd.f32 1.0, %v2573_v39 }
 0x6e8   :  { %v1742_v49 = vmul.f32 0.5, %v1736_v53  ;;  %v2577_v48 = vpop.eup %2576  ;;  %v1739_v47 = vadd.f32 1.0, %v2575_v59 }
 0x6e9   :  { %v2579_v54 = vpop.eup %2578  ;;  %v1743_v17 = vmul.f32 0.5, %v1737_v9 }
 0x6ea   :  { %v1752_v46 = vmul.f32 %v2577_v48, %v1742_v49  ;;  %v1745_v21 = vmul.f32 0.5, %v1739_v47  ;;  %v1740_v30 = vadd.f32 1.0, %v2579_v54  ;;  %v2581_v15 = vpop.eup %2580  ;;  %v3967_v54 = vld [vmem:[#allocation17_spill] sm:$0xff] }
 0x6eb   :  { %v1750_v55 = vmul.f32 %v1743_v17, %v3525_v61  ;;  %v2583_v59 = vpop.eup %2582  ;;  %v3972_v17 = vld [vmem:[#allocation22_spill] sm:$0xff] }
 0x6ec   :  { %v1746_v62 = vmul.f32 0.5, %v1740_v30  ;;  %v1753_v51 = vmul.f32 %v2581_v15, %v1745_v21  ;;  %v2585_v48 = vpop.eup %2584  ;;  %v1738_v47 = vadd.f32 1.0, %v2583_v59  ;;  %v3973_v21 = vld [vmem:[#allocation23_spill] sm:$0xff]  ;;  %v3974_v30 = vld [vmem:[#allocation24_spill] sm:$0xff]  ;;  %v3975_v15 = vld [vmem:[#allocation25_spill] sm:$0xff] }
 0x6ed   :  { %v3601_v8 = vadd.f32 %v1752_v46, %v1750_v55  ;;  %v1741_v49 = vadd.f32 1.0, %v2585_v48  ;;  %v3976_v55 = vld [vmem:[#allocation26_spill] sm:$0xff]  ;;  %v3981_v48 = vld [vmem:[#allocation31_spill] sm:$0xff] }
 0x6ee   :  { %v1751_v31 = vmul.f32 %v1746_v62, %v3529_v19  ;;  %v1744_v50 = vmul.f32 0.5, %v1738_v47  ;;  %v2468_v19 = vld [vmem:[#allocation3 + $0x30] sm:$0xff]   ;;  %v3977_v62 = vld [vmem:[#allocation27_spill] sm:$0xff]  ;;  %v3980_v59 = vld [vmem:[#allocation30_spill] sm:$0xff] }
 0x6ef   :  { %2586 = vtanh.f32 %v3601_v8  ;;  %v1747_v39 = vmul.f32 0.5, %v1741_v49  ;;  %v3982_v47 = vld [vmem:[#allocation32_spill] sm:$0xff]  ;;  %v3983_v49 = vld [vmem:[#allocation33_spill] sm:$0xff] }
 0x6f0   :  { %v3605_v53 = vadd.f32 %v1753_v51, %v1751_v31  ;;  %v3978_v51 = vld [vmem:[#allocation28_spill] sm:$0xff]  ;;  %v3979_v31 = vld [vmem:[#allocation29_spill] sm:$0xff] }
 0x6f2   :  { %2588 = vtanh.f32 %v3605_v53 }
 0x6f9   :  { %v2587_v52 = vpop.eup %2586 }
 0x6fa   :  { %v1758_v7 = vmul.f32 %v2587_v52, %v1744_v50  ;;  %v3984_v52 = vld [vmem:[#allocation34_spill] sm:$0xff] }
 0x6fc   :  { %v2589_v61 = vpop.eup %2588 }
 0x6fd   :  { %v1759_v9 = vmul.f32 %v2589_v61, %v1747_v39 }
 0x6ff   :  { %v1763_v46 = vpack.c.bf16 %v1759_v9, %v1758_v7 }
 0x701   :  { %1797 = vmatmul.mubr.bf16.vlgmr.msra.gmra.mrb[24].mxu0 %v1763_v46  ;;  %1840 = vmatmul.mubr.bf16.vlgmr.msra.gmra.mrb[24].mxu1 %v1763_v46 }
 0x702   :  { %1857 = vmatpush1.bf16.msra.mxu0 %v3396_v33  ;;  %1900 = vmatpush1.bf16.msra.mxu1 %v3399_v11 }
 0x703   :  { %1858 = vmatprep.subr.bf16.mxu0 %v3402_v28  ;;  %1901 = vmatprep.subr.bf16.mxu1 %v3405_v1 }
 0x704   :  { %1888 = vmatprep.mubr.bf16.mxu0 %v3862_v63  ;;  %1931 = vmatprep.mubr.bf16.mxu1 %v3862_v63 }
 0x706   :  { %1859 = vmatpush1.bf16.msra.mxu0 %v3410_v2  ;;  %1902 = vmatpush1.bf16.msra.mxu1 %v3413_v3 }
 0x707   :  { %1860 = vmatprep.subr.bf16.mxu0 %v3416_v18  ;;  %1903 = vmatprep.subr.bf16.mxu1 %v3419_v4 }
 0x70a   :  { %1861 = vmatpush1.bf16.msra.mxu0 %v3422_v5  ;;  %1904 = vmatpush1.bf16.msra.mxu1 %v3425_v6 }
 0x70b   :  { %1862 = vmatprep.subr.bf16.mxu0 %v3428_v35  ;;  %1905 = vmatprep.subr.bf16.mxu1 %v3431_v10 }
 0x70e   :  { %1863 = vmatpush1.bf16.msra.mxu0 %v3434_v29  ;;  %1906 = vmatpush1.bf16.msra.mxu1 %v3437_v57 }
 0x70f   :  { %1864 = vmatprep.subr.bf16.mxu0 %v3440_v25  ;;  %1907 = vmatprep.subr.bf16.mxu1 %v3443_v20 }
 0x712   :  { %1865 = vmatpush1.bf16.msra.mxu0 %v3446_v32  ;;  %1908 = vmatpush1.bf16.msra.mxu1 %v3449_v26 }
 0x713   :  { %1866 = vmatprep.subr.bf16.mxu0 %v3452_v23  ;;  %1909 = vmatprep.subr.bf16.mxu1 %v3455_v13 }
 0x716   :  { %1867 = vmatpush1.bf16.msra.mxu0 %v3937_v24  ;;  %1910 = vmatpush1.bf16.msra.mxu1 %v3938_v60 }
 0x717   :  { %1868 = vmatprep.subr.bf16.mxu0 %v3939_v58  ;;  %1911 = vmatprep.subr.bf16.mxu1 %v3940_v56 }
 0x71a   :  { %1869 = vmatpush1.bf16.msra.mxu0 %v3470_v27  ;;  %1912 = vmatpush1.bf16.msra.mxu1 %v3473_v16 }
 0x71b   :  { %1870 = vmatprep.subr.bf16.mxu0 %v3476_v34  ;;  %1913 = vmatprep.subr.bf16.mxu1 %v3479_v14 }
 0x71e   :  { %1871 = vmatpush1.bf16.msra.mxu0 %v3482_v12  ;;  %1914 = vmatpush1.bf16.msra.mxu1 %v3485_v22 }
 0x71f   :  { %1982 = vmatprep.subr.bf16.mxu0 %v3284_v36  ;;  %2025 = vmatprep.subr.bf16.mxu1 %v3287_v37  ;;  %v3961_v36 = vld [vmem:[#allocation37_spill] sm:$0xff]  ;;  %v3962_v37 = vld [vmem:[#allocation38_spill] sm:$0xff] }
 0x721   :  { %1889 = vmatmul.mubr.bf16.vlgmr.msra.gmra.mrb[24].mxu0 %v2468_v19  ;;  %1932 = vmatmul.mubr.bf16.vlgmr.msra.gmra.mrb[24].mxu1 %v2468_v19 }
 0x722   :  { %1983 = vmatpush1.bf16.msra.mxu0 %v3290_v38  ;;  %2026 = vmatpush1.bf16.msra.mxu1 %v3293_v40  ;;  %v3963_v38 = vld [vmem:[#allocation13_spill] sm:$0xff]  ;;  %v3964_v40 = vld [vmem:[#allocation14_spill] sm:$0xff] }
 0x723   :  { %1984 = vmatprep.subr.bf16.mxu0 %v3296_v41  ;;  %2027 = vmatprep.subr.bf16.mxu1 %v3299_v0  ;;  %v3965_v41 = vld [vmem:[#allocation15_spill] sm:$0xff]  ;;  %v3966_v0 = vld [vmem:[#allocation16_spill] sm:$0xff] }
 0x724   :  { %2014 = vmatprep.mubr.bf16.mxu0 %v3862_v63  ;;  %2057 = vmatprep.mubr.bf16.mxu1 %v3862_v63 }
 0x726   :  { %1985 = vmatpush1.bf16.msra.mxu0 %v3304_v42  ;;  %2028 = vmatpush1.bf16.msra.mxu1 %v3307_v43  ;;  %v3968_v42 = vld [vmem:[#allocation18_spill] sm:$0xff]  ;;  %v3969_v43 = vld [vmem:[#allocation19_spill] sm:$0xff] }
 0x727   :  { %1986 = vmatprep.subr.bf16.mxu0 %v3310_v44  ;;  %2029 = vmatprep.subr.bf16.mxu1 %v3313_v45  ;;  %v3970_v44 = vld [vmem:[#allocation20_spill] sm:$0xff]  ;;  %v3971_v45 = vld [vmem:[#allocation21_spill] sm:$0xff] }
 0x72a   :  { %1987 = vmatpush1.bf16.msra.mxu0 %v3961_v36  ;;  %2030 = vmatpush1.bf16.msra.mxu1 %v3962_v37 }
 0x72b   :  { %1988 = vmatprep.subr.bf16.mxu0 %v3963_v38  ;;  %2031 = vmatprep.subr.bf16.mxu1 %v3964_v40 }
 0x72e   :  { %1989 = vmatpush1.bf16.msra.mxu0 %v3965_v41  ;;  %2032 = vmatpush1.bf16.msra.mxu1 %v3966_v0 }
 0x72f   :  { %1990 = vmatprep.subr.bf16.mxu0 %v3967_v54  ;;  %2033 = vmatprep.subr.bf16.mxu1 %v3968_v42 }
 0x732   :  { %1991 = vmatpush1.bf16.msra.mxu0 %v3969_v43  ;;  %2034 = vmatpush1.bf16.msra.mxu1 %v3970_v44 }
 0x733   :  { %1992 = vmatprep.subr.bf16.mxu0 %v3971_v45  ;;  %2035 = vmatprep.subr.bf16.mxu1 %v3972_v17 }
 0x736   :  { %1993 = vmatpush1.bf16.msra.mxu0 %v3973_v21  ;;  %2036 = vmatpush1.bf16.msra.mxu1 %v3974_v30 }
 0x737   :  { %1994 = vmatprep.subr.bf16.mxu0 %v3975_v15  ;;  %2037 = vmatprep.subr.bf16.mxu1 %v3976_v55 }
 0x73a   :  { %1995 = vmatpush1.bf16.msra.mxu0 %v3977_v62  ;;  %2038 = vmatpush1.bf16.msra.mxu1 %v3978_v51 }
 0x73b   :  { %1996 = vmatprep.subr.bf16.mxu0 %v3979_v31  ;;  %2039 = vmatprep.subr.bf16.mxu1 %v3980_v59 }
 0x73e   :  { %1997 = vmatpush1.bf16.msra.mxu0 %v3981_v48  ;;  %2040 = vmatpush1.bf16.msra.mxu1 %v3982_v47 }
 0x73f   :  { %2074 = vmatprep.subr.bf16.mxu0 %v3983_v49  ;;  %2117 = vmatprep.subr.bf16.mxu1 %v3984_v52 }
 0x7f4   :  { %v1890_v50 = vpop.f32.mrb[24].mxu0  ;;  %v1933_v39 = vpop.f32.mrb[24].mxu1 }
 0x7f5   :  { %v1942_v61 = vmul.f32 0.5, %v1890_v50  ;;  %v1892_v7 = vpop.f32.mrb[25].mxu0  ;;  %v1935_v9 = vpop.f32.mrb[25].mxu1  ;;  %v1944_v42 = vmul.f32 0.5, %v1933_v39 }
 0x7f6   :  { %v1943_v46 = vmul.f32 0.5, %v1892_v7  ;;  %v1894_v19 = vpop.f32.mrb[26].mxu0  ;;  %v1937_v36 = vpop.f32.mrb[26].mxu1 }
 0x7f7   :  { %2590 = vtanh.f32 %v1942_v61  ;;  %v1945_v37 = vmul.f32 0.5, %v1894_v19  ;;  %v1896_v38 = vpop.f32.mrb[27].mxu0  ;;  %v1939_v40 = vpop.f32.mrb[27].mxu1  ;;  %v1947_v44 = vmul.f32 0.5, %v1937_v36 }
 0x7f8   :  { %v1946_v41 = vmul.f32 0.5, %v1896_v38  ;;  %2592 = vtanh.f32 %v1943_v46 }
 0x7f9   :  { %2594 = vtanh.f32 %v1945_v37 }
 0x7fa   :  { %2596 = vtanh.f32 %v1935_v9 }
 0x7fb   :  { %2598 = vtanh.f32 %v1946_v41 }
 0x7fc   :  { %2600 = vtanh.f32 %v1939_v40 }
 0x7fd   :  { %2602 = vtanh.f32 %v1944_v42 }
 0x7fe   :  { %2604 = vtanh.f32 %v1947_v44 }
 0x801   :  { %v2591_v0 = vpop.eup %2590 }
 0x802   :  { %v1954_v54 = vadd.f32 1.0, %v2591_v0  ;;  %v2593_v43 = vpop.eup %2592 }
 0x803   :  { %v2595_v45 = vpop.eup %2594  ;;  %v1955_v21 = vadd.f32 1.0, %v2593_v43 }
 0x804   :  { %v1960_v17 = vmul.f32 0.5, %v1954_v54  ;;  %v2597_v30 = vpop.eup %2596  ;;  %v1957_v15 = vadd.f32 1.0, %v2595_v45 }
 0x805   :  { %v2599_v55 = vpop.eup %2598  ;;  %v1961_v62 = vmul.f32 0.5, %v1955_v21 }
 0x806   :  { %v1970_v51 = vmul.f32 %v2597_v30, %v1960_v17  ;;  %v1963_v31 = vmul.f32 0.5, %v1957_v15  ;;  %v1958_v59 = vadd.f32 1.0, %v2599_v55  ;;  %v2601_v48 = vpop.eup %2600 }
 0x807   :  { %v1968_v47 = vmul.f32 %v1961_v62, %v3601_v8  ;;  %v2603_v7 = vpop.eup %2602 }
 0x808   :  { %v1964_v49 = vmul.f32 0.5, %v1958_v59  ;;  %v1971_v52 = vmul.f32 %v2601_v48, %v1963_v31  ;;  %v2605_v9 = vpop.eup %2604  ;;  %v1956_v46 = vadd.f32 1.0, %v2603_v7 }
 0x809   :  { %v3677_v50 = vadd.f32 %v1970_v51, %v1968_v47  ;;  %v1959_v19 = vadd.f32 1.0, %v2605_v9 }
 0x80a   :  { %v1969_v39 = vmul.f32 %v1964_v49, %v3605_v53  ;;  %v1962_v37 = vmul.f32 0.5, %v1956_v46 }
 0x80b   :  { %2606 = vtanh.f32 %v3677_v50  ;;  %v1965_v38 = vmul.f32 0.5, %v1959_v19 }
 0x80c   :  { %v3681_v61 = vadd.f32 %v1971_v52, %v1969_v39 }
 0x80e   :  { %2608 = vtanh.f32 %v3681_v61 }
 0x815   :  { %v2607_v36 = vpop.eup %2606 }
 0x816   :  { %v1976_v40 = vmul.f32 %v2607_v36, %v1962_v37 }
 0x818   :  { %v2609_v8 = vpop.eup %2608 }
 0x819   :  { %v1977_v41 = vmul.f32 %v2609_v8, %v1965_v38 }
 0x81b   :  { %v1981_v0 = vpack.c.bf16 %v1977_v41, %v1976_v40 }
 0x81d   :  { %2015 = vmatmul.mubr.bf16.vlgmr.msra.gmra.mrb[28].mxu0 %v1981_v0  ;;  %2058 = vmatmul.mubr.bf16.vlgmr.msra.gmra.mrb[28].mxu1 %v1981_v0 }
 0x81e   :  { %2075 = vmatpush1.bf16.msra.mxu0 %v3396_v33  ;;  %2118 = vmatpush1.bf16.msra.mxu1 %v3399_v11 }
 0x81f   :  { %2076 = vmatprep.subr.bf16.mxu0 %v3402_v28  ;;  %2119 = vmatprep.subr.bf16.mxu1 %v3405_v1 }
 0x820   :  { %2106 = vmatprep.mubr.bf16.mxu0 %v3862_v63  ;;  %2149 = vmatprep.mubr.bf16.mxu1 %v3862_v63  ;;  %v2469_v63 = vld [vmem:[#allocation3 + $0x38] sm:$0xff]  }
 0x822   :  { %2077 = vmatpush1.bf16.msra.mxu0 %v3410_v2  ;;  %2120 = vmatpush1.bf16.msra.mxu1 %v3413_v3 }
 0x823   :  { %2078 = vmatprep.subr.bf16.mxu0 %v3416_v18  ;;  %2121 = vmatprep.subr.bf16.mxu1 %v3419_v4 }
 0x826   :  { %2079 = vmatpush1.bf16.msra.mxu0 %v3422_v5  ;;  %2122 = vmatpush1.bf16.msra.mxu1 %v3425_v6 }
 0x827   :  { %2080 = vmatprep.subr.bf16.mxu0 %v3428_v35  ;;  %2123 = vmatprep.subr.bf16.mxu1 %v3431_v10 }
 0x82a   :  { %2081 = vmatpush1.bf16.msra.mxu0 %v3434_v29  ;;  %2124 = vmatpush1.bf16.msra.mxu1 %v3437_v57 }
 0x82b   :  { %2082 = vmatprep.subr.bf16.mxu0 %v3440_v25  ;;  %2125 = vmatprep.subr.bf16.mxu1 %v3443_v20 }
 0x82e   :  { %2083 = vmatpush1.bf16.msra.mxu0 %v3446_v32  ;;  %2126 = vmatpush1.bf16.msra.mxu1 %v3449_v26 }
 0x82f   :  { %2084 = vmatprep.subr.bf16.mxu0 %v3452_v23  ;;  %2127 = vmatprep.subr.bf16.mxu1 %v3455_v13 }
 0x832   :  { %2085 = vmatpush1.bf16.msra.mxu0 %v3937_v24  ;;  %2128 = vmatpush1.bf16.msra.mxu1 %v3938_v60 }
 0x833   :  { %2086 = vmatprep.subr.bf16.mxu0 %v3939_v58  ;;  %2129 = vmatprep.subr.bf16.mxu1 %v3940_v56 }
 0x836   :  { %2087 = vmatpush1.bf16.msra.mxu0 %v3470_v27  ;;  %2130 = vmatpush1.bf16.msra.mxu1 %v3473_v16 }
 0x837   :  { %2088 = vmatprep.subr.bf16.mxu0 %v3476_v34  ;;  %2131 = vmatprep.subr.bf16.mxu1 %v3479_v14 }
 0x83a   :  { %2089 = vmatpush1.bf16.msra.mxu0 %v3482_v12  ;;  %2132 = vmatpush1.bf16.msra.mxu1 %v3485_v22 }
 0x83d   :  { %2107 = vmatmul.mubr.bf16.vlgmr.msra.gmra.mrb[28].mxu0 %v2469_v63  ;;  %2150 = vmatmul.mubr.bf16.vlgmr.msra.gmra.mrb[28].mxu1 %v2469_v63 }
 0x910   :  { %v2108_v33 = vpop.f32.mrb[28].mxu0  ;;  %v2151_v11 = vpop.f32.mrb[28].mxu1 }
 0x911   :  { %v2160_v28 = vmul.f32 0.5, %v2108_v33  ;;  %v2110_v1 = vpop.f32.mrb[29].mxu0  ;;  %v2153_v2 = vpop.f32.mrb[29].mxu1  ;;  %v2162_v29 = vmul.f32 0.5, %v2151_v11 }
 0x912   :  { %v2161_v3 = vmul.f32 0.5, %v2110_v1  ;;  %v2112_v18 = vpop.f32.mrb[30].mxu0  ;;  %v2155_v4 = vpop.f32.mrb[30].mxu1 }
 0x913   :  { %2610 = vtanh.f32 %v2160_v28  ;;  %v2163_v5 = vmul.f32 0.5, %v2112_v18  ;;  %v2114_v6 = vpop.f32.mrb[31].mxu0  ;;  %v2157_v35 = vpop.f32.mrb[31].mxu1  ;;  %v2165_v32 = vmul.f32 0.5, %v2155_v4 }
 0x914   :  { %v2164_v10 = vmul.f32 0.5, %v2114_v6  ;;  %2612 = vtanh.f32 %v2161_v3 }
 0x915   :  { %2614 = vtanh.f32 %v2163_v5 }
 0x916   :  { %2616 = vtanh.f32 %v2153_v2 }
 0x917   :  { %2618 = vtanh.f32 %v2164_v10 }
 0x918   :  { %2620 = vtanh.f32 %v2157_v35 }
 0x919   :  { %2622 = vtanh.f32 %v2162_v29 }
 0x91a   :  { %2624 = vtanh.f32 %v2165_v32 }
 0x91d   :  { %v2611_v57 = vpop.eup %2610 }
 0x91e   :  { %v2172_v25 = vadd.f32 1.0, %v2611_v57  ;;  %v2613_v20 = vpop.eup %2612 }
 0x91f   :  { %v2615_v26 = vpop.eup %2614  ;;  %v2173_v13 = vadd.f32 1.0, %v2613_v20 }
 0x920   :  { %v2178_v23 = vmul.f32 0.5, %v2172_v25  ;;  %v2617_v12 = vpop.eup %2616  ;;  %v2175_v14 = vadd.f32 1.0, %v2615_v26 }
 0x921   :  { %v2619_v22 = vpop.eup %2618  ;;  %v2179_v27 = vmul.f32 0.5, %v2173_v13 }
 0x922   :  { %v2188_v16 = vmul.f32 %v2617_v12, %v2178_v23  ;;  %v2181_v34 = vmul.f32 0.5, %v2175_v14  ;;  %v2176_v24 = vadd.f32 1.0, %v2619_v22  ;;  %v2621_v60 = vpop.eup %2620 }
 0x923   :  { %v2186_v58 = vmul.f32 %v2179_v27, %v3677_v50  ;;  %v2623_v44 = vpop.eup %2622 }
 0x924   :  { %v2182_v56 = vmul.f32 0.5, %v2176_v24  ;;  %v2189_v53 = vmul.f32 %v2621_v60, %v2181_v34  ;;  %v2625_v45 = vpop.eup %2624  ;;  %v2174_v17 = vadd.f32 1.0, %v2623_v44 }
 0x925   :  { %v2190_v54 = vadd.f32 %v2188_v16, %v2186_v58  ;;  %v2177_v21 = vadd.f32 1.0, %v2625_v45 }
 0x926   :  { %v2187_v42 = vmul.f32 %v2182_v56, %v3681_v61  ;;  %v2180_v30 = vmul.f32 0.5, %v2174_v17 }
 0x927   :  { %2626 = vtanh.f32 %v2190_v54  ;;  %v2183_v62 = vmul.f32 0.5, %v2177_v21 }
 0x928   :  { %v2191_v43 = vadd.f32 %v2189_v53, %v2187_v42 }
 0x92a   :  { %2628 = vtanh.f32 %v2191_v43 }
 0x931   :  { %v2627_v15 = vpop.eup %2626 }
 0x932   :  { %v2194_v55 = vmul.f32 %v2627_v15, %v2180_v30 }
 0x934   :  { %v2629_v51 = vpop.eup %2628  ;;  %2196 = vst [vmem:[#allocation9] sm:$0xff] %v2194_v55 }
 0x935   :  { %v2195_v31 = vmul.f32 %v2629_v51, %v2183_v62 }
 0x937   :  { %2197 = vst [vmem:[#allocation9 + $0x8] sm:$0xff] %v2195_v31 }
 0x938   :  { %2771 = shalt.err (!%p2768_p0)
}
 0x939   :  { %s2772_s27 = scalar_lea.hbm %s3733_s3, 256 }
 0x93a   :  { %p2773_p1 = scmp.ne.s32.totalorder %s3733_s3, %s2772_s27  ;;  %p2776_p2 = scmp.lt.u32.totalorder %s2772_s27, %s3733_s3 }
 0x93c   :  { %p2778_p3 = pnand %p2776_p2, %p2773_p1 }
 0x93e   :  { %2781 = shalt.err (!%p2778_p3)
}
 0x93f   :  { %s2798_s5 = smov 128   ;;  %s2799_s6 = smov 8  }
 0x940   :  { %2211 = dma.vmem_to_hbm [thread:$0]  %s2206_s22, 256, %s3733_s3, [#allocation5], %s2798_s5, %s2798_s5, %s2799_s6  }
 0x941   :  { %2786 = dma.done.wait [#allocation5], 256  }
 0x942   :  { %2787 = vsyncadd [#allocation5], 4294967040 }
 0x943   :  { %2215 = vsyncpa [#allocation4], 1 }
 0x944   :  { %2216 = vsyncpa [#allocation7], 1 }
 0x945   :  { %2217 = vsyncpa [#allocation5], 1 }

</bundles_post_ra>
